<compile_context>
chip_gen: v7x
topology: tpu7x:2x2x1
jax: 0.10.0
libtpu: 0.0.40
codegen_flags: <defaults>
</compile_context>

<pallas_src>
import functools
import math

import jax
import jax.numpy as jnp
from jax.experimental import pallas as pl
from jax.experimental.pallas import tpu as pltpu

# per-block partial sums written by the kernel (first _N_SUMS lanes of a row):
# [g_adv_bce, l1, d_fake_bce, d_real_bce, mse, min(fake), max(fake), sum(fake)]
_N_SUMS = 8
_SUM_LANES = 128          # sums row padded to a full lane group (lane-dense store)


# ---------------------------------------------------------------------------
# Fused Pallas kernel (one batch tile per grid step, everything in VMEM)
# ---------------------------------------------------------------------------
def _fused_forward_kernel(
    x_ref, real_ref, masks_ref,
    g1w_ref, g1b_ref, g2w_ref, g2b_ref, g3w_ref, g3b_ref,
    d1w_ref, d1b_ref, d2w_ref, d2b_ref,
    fake_ref, sums_ref, *, W):
    """Generator + discriminator forward + all loss reductions, fused.

    Activations: channel-major (C, lanes) with the flat batch*H*W on the lane
    axis.  3x3 taps: pltpu.roll on the flat spatial axis (XLU slot) with a
    jnp.where edge-validity select.  Channel contraction: a single MXU matmul
    (Cout, 9*Cin) x (9*Cin, lanes) per conv, bf16 operands, f32 accumulate.
    """
    L = x_ref.shape[1]                      # batch_tile * H * W  (generator lanes)
    mask_full = masks_ref[...] > 0.5        # (9, 2L) bool, hoisted load
    mask_half = mask_full[:, :L]            # (9, L)  (per-image pattern, tiled)

    def conv3x3(x, w_ref, b_ref, act, mask):
        # x: (Cin, lanes) f32 -> (Cout, lanes) f32.
        lanes = x.shape[1]
        taps = []
        t = 0
        for dh in (-1, 0, 1):
            for dw in (-1, 0, 1):
                shift = dh * W + dw
                if shift == 0:
                    tap = x                               # center tap always valid
                else:
                    # tap[:, p] = x[:, p + dh*W + dw]; wrapped / out-of-image
                    # pixels are zeroed by the precomputed validity mask.
                    tap = pltpu.roll(x, shift=(-shift) % lanes, axis=1)
                    tap = jnp.where(mask[t:t + 1, :], tap, 0.0)
                taps.append(tap)
                t += 1
        # (9*Cin, lanes) tap stack; single MXU contraction (weights pre-packed
        # as (Cout, 9*Cin) with column = (kh*3 + kw)*Cin + ci).
        stack = jnp.concatenate(taps, axis=0).astype(jnp.bfloat16)
        acc = jnp.dot(w_ref[...], stack, preferred_element_type=jnp.float32)
        acc = acc + b_ref[...]                            # (Cout, 1) broadcast
        if act == "relu":
            acc = jnp.maximum(acc, 0.0)
        elif act == "lrelu":
            acc = jnp.where(acc > 0.0, acc, 0.2 * acc)
        elif act == "tanh":
            acc = jnp.tanh(acc)
        return acc                                        # "none": raw logits

    x = x_ref[...].astype(jnp.float32)                    # (Cin,  L) = concat(T1, T2)
    real = real_ref[...].astype(jnp.float32)              # (Cimg, L) = T1CE

    # ---- Generator ----
    h = conv3x3(x, g1w_ref, g1b_ref, "relu", mask_half)
    h = conv3x3(h, g2w_ref, g2b_ref, "relu", mask_half)
    fake = conv3x3(h, g3w_ref, g3b_ref, "tanh", mask_half)
    fake_ref[...] = fake.astype(fake_ref.dtype)

    # ---- Discriminator: run ONCE on fake|real lane-concat (2x lane density) ----
    fr = jnp.concatenate([fake, real], axis=1)            # (Cimg, 2L)
    hd = conv3x3(fr, d1w_ref, d1b_ref, "lrelu", mask_full)
    logits = conv3x3(hd, d2w_ref, d2b_ref, "none", mask_full)   # (1, 2L)
    fake_logits = logits[:, :L]
    real_logits = logits[:, L:]

    # ---- Loss reductions (per-block partial sums) ----
    def softplus_neg_abs(lg):                 # log(1 + exp(-|lg|)), stable
        return jnp.maximum(lg, 0.0) + jnp.log1p(jnp.exp(-jnp.abs(lg)))

    sp_f = softplus_neg_abs(fake_logits)
    sp_r = softplus_neg_abs(real_logits)
    diff = fake - real
    partials = (
        jnp.sum(sp_f - fake_logits),   # generator adversarial BCE (target 1)
        jnp.sum(jnp.abs(diff)),        # L1(fake, real)
        jnp.sum(sp_f),                 # discriminator BCE: fake -> 0
        jnp.sum(sp_r - real_logits),   # discriminator BCE: real -> 1
        jnp.sum(diff * diff),          # MSE (for PSNR)
        jnp.min(fake),
        jnp.max(fake),
        jnp.sum(fake),
    )
    # Pack the 8 scalars into a full 128-lane row -> one unmasked vector store.
    lane = jax.lax.broadcasted_iota(jnp.int32, (1, _SUM_LANES), 1)
    row = jnp.zeros((1, _SUM_LANES), jnp.float32)
    for i, v in enumerate(partials):
        row = jnp.where(lane == i, v, row)
    sums_ref[0] = row


# ---------------------------------------------------------------------------
# JAX wrapper (single jitted call: one pallas_call + a tiny scalar epilogue)
# ---------------------------------------------------------------------------
def _make_tap_masks(H, W, reps):
    """(9, reps*H*W) validity masks for the 3x3 taps, per-image pattern tiled."""
    hw = H * W
    idx = jnp.arange(hw, dtype=jnp.int32)
    hh = idx // W
    ww = idx % W
    rows = []
    for dh in (-1, 0, 1):
        for dw in (-1, 0, 1):
            rows.append((hh + dh >= 0) & (hh + dh < H) & (ww + dw >= 0) & (ww + dw < W))
    m = jnp.stack(rows, axis=0).astype(jnp.float32)       # (9, HW)
    return jnp.tile(m, (1, reps))


def _pick_batch_tile(B, HW, lane_budget=8192):
    """Images folded onto the lane axis per grid step.

    Largest divisor of B that fits the lane budget while leaving >= 2 grid
    steps when possible (v7x: 2 TensorCores share the 'parallel' axis).
    """
    max_bt = max(1, lane_budget // HW)
    divs = [d for d in range(1, B + 1) if B % d == 0 and d <= max_bt]
    multi = [d for d in divs if B // d >= 2]
    if multi:
        return max(multi)
    return max(divs) if divs else 1


@jax.jit
def _forward_impl(t1, t2, t1ce, params):
    B, _, H, W = t1.shape
    HW = H * W
    cin = t1.shape[1] + t2.shape[1]
    cimg = t1ce.shape[1]
    (g1w, g1b), (g2w, g2b), (g3w, g3b), (d1w, d1b), (d2w, d2b) = params
    hidden = g1w.shape[0]

    BT = _pick_batch_tile(B, HW)
    nblk = B // BT
    L = BT * HW

    # NCHW -> channel-major with images concatenated on the lane axis: (C, B*H*W).
    # (Wrapper-side layout plumbing; presents a lane-dense slab to the kernel.)
    x = jnp.concatenate([t1, t2], axis=1)
    x = jnp.transpose(x, (1, 0, 2, 3)).reshape(cin, B * HW).astype(jnp.float32)
    real = jnp.transpose(t1ce, (1, 0, 2, 3)).reshape(cimg, B * HW).astype(jnp.float32)
    masks = _make_tap_masks(H, W, 2 * BT)     # (9, 2*L): generator half + fake|real

    # Advisory cost estimate so XLA schedules around the fused call sensibly.
    flops = (2 * (hidden * 9 * cin + hidden * 9 * hidden + cimg * 9 * hidden) * (B * HW)
             + 2 * (hidden * 9 * cimg + 1 * 9 * hidden) * (2 * B * HW))
    transcendentals = (cimg + 4) * B * HW
    bytes_accessed = 4 * (x.size + real.size + masks.size + cimg * B * HW
                          + nblk * _SUM_LANES)
    bytes_accessed += sum(int(a.size) * a.dtype.itemsize
                          for pair in params for a in pair)

    kernel = functools.partial(_fused_forward_kernel, W=W)
    fake_flat, sums = pl.pallas_call(
        kernel,
        out_shape=(
            jax.ShapeDtypeStruct((cimg, B * HW), jnp.float32),
            jax.ShapeDtypeStruct((nblk, 1, _SUM_LANES), jnp.float32),
        ),
        grid_spec=pltpu.PrefetchScalarGridSpec(
            num_scalar_prefetch=0,
            grid=(nblk,),
            in_specs=[
                pl.BlockSpec((cin, L), lambda b: (0, b)),
                pl.BlockSpec((cimg, L), lambda b: (0, b)),
                pl.BlockSpec((9, 2 * L), lambda b: (0, 0)),
                # TODO(synk): constants could use pipeline_mode=pl.Buffered(1) /
                # SMEM biases; negligible at this size.
                pl.BlockSpec(g1w.shape, lambda b: (0, 0)),
                pl.BlockSpec(g1b.shape, lambda b: (0, 0)),
                pl.BlockSpec(g2w.shape, lambda b: (0, 0)),
                pl.BlockSpec(g2b.shape, lambda b: (0, 0)),
                pl.BlockSpec(g3w.shape, lambda b: (0, 0)),
                pl.BlockSpec(g3b.shape, lambda b: (0, 0)),
                pl.BlockSpec(d1w.shape, lambda b: (0, 0)),
                pl.BlockSpec(d1b.shape, lambda b: (0, 0)),
                pl.BlockSpec(d2w.shape, lambda b: (0, 0)),
                pl.BlockSpec(d2b.shape, lambda b: (0, 0)),
            ],
            out_specs=(
                pl.BlockSpec((cimg, L), lambda b: (0, b)),
                pl.BlockSpec((1, 1, _SUM_LANES), lambda b: (b, 0, 0)),
            ),
        ),
        compiler_params=pltpu.CompilerParams(
            # batch-tile axis is independent -> shardable across the 2 TCs on v7x
            dimension_semantics=("parallel",),
            vmem_limit_bytes=32 * 1024 * 1024,
        ),
        cost_estimate=pl.CostEstimate(
            flops=int(flops),
            transcendentals=int(transcendentals),
            bytes_accessed=int(bytes_accessed)),
    )(x, real, masks, g1w, g1b, g2w, g2b, g3w, g3b, d1w, d1b, d2w, d2b)

    rows = sums[:, 0, :]                                  # (nblk, 128)
    totals = jnp.sum(rows, axis=0)
    n_pix = B * cimg * HW                                 # elements of fake / t1ce
    n_logit = B * HW                                      # 1-channel patch logits
    g_adv = totals[0] / n_logit
    g_l1 = totals[1] / n_pix
    g_loss = g_adv + 100.0 * g_l1
    d_loss = 0.5 * (totals[2] + totals[3]) / n_logit
    loss = g_loss + d_loss
    mse = totals[4] / n_pix
    psnr = 10.0 * jnp.log10(4.0 / jnp.maximum(mse, 1e-12))   # tanh output, range 2
    f_min = jnp.min(rows[:, 5])
    f_max = jnp.max(rows[:, 6])
    f_mean = totals[7] / n_pix

    # (Cimg, B*HW) -> NCHW like torch.
    fake = jnp.transpose(fake_flat.reshape(cimg, B, H, W), (1, 0, 2, 3))
    return fake, loss, g_loss, d_loss, psnr, f_min, f_max, f_mean


# ---------------------------------------------------------------------------
# Model (parameters, metric accumulation)
# ---------------------------------------------------------------------------
def _init_conv(key, cin, cout):
    kw, _ = jax.random.split(key)
    fan_in = 3 * 3 * cin
    w = jax.random.normal(kw, (3, 3, cin, cout), jnp.float32) / math.sqrt(fan_in)
    b = jnp.zeros((cout,), jnp.float32)
    return w, b


def _prep_conv(w, b):
    """Pack (3,3,Cin,Cout) weights to bf16 (Cout, 9*Cin); col = (kh*3+kw)*Cin + ci."""
    cout = w.shape[-1]
    cin = w.shape[2]
    w_mat = jnp.transpose(w, (3, 0, 1, 2)).reshape(cout, 9 * cin).astype(jnp.bfloat16)
    return w_mat, b.reshape(cout, 1).astype(jnp.float32)


def accumulate_cv_data(psnr, acc_result, host_sync=False):
    if acc_result is None:
        acc_result = {"PSNR": [], "SSIM": []}
    # Keep PSNR as a device scalar unless the caller explicitly wants a host sync.
    acc_result["PSNR"].append(float(psnr) if host_sync else psnr)
    # TODO(synk): SSIM (windowed structural similarity) not implemented.
    acc_result["SSIM"].append(float("nan"))
    return acc_result


class ProposedModelPallas:
    def __init__(self, input_dim, output_dim, hidden=8, seed=42):
        self.input_dim = input_dim
        self.output_dim = output_dim
        key = jax.random.PRNGKey(seed)
        ks = jax.random.split(key, 5)
        raw = (
            _init_conv(ks[0], input_dim, hidden),    # generator conv1 (relu)
            _init_conv(ks[1], hidden, hidden),       # generator conv2 (relu)
            _init_conv(ks[2], hidden, output_dim),   # generator conv3 (tanh)
            _init_conv(ks[3], output_dim, hidden),   # discriminator conv1 (lrelu)
            _init_conv(ks[4], hidden, 1),            # discriminator conv2 (logits)
        )
        # Pre-pack weights once into the kernel's MXU layout.
        self.params = tuple(_prep_conv(w, b) for (w, b) in raw)

    def forward(self, data, mode="train", acc_result=None, local=None, host_sync=False):
        t1 = jnp.asarray(data["t1"], jnp.float32)     # (B, 1, H, W) NCHW
        t2 = jnp.asarray(data["t2"], jnp.float32)
        t1ce = jnp.asarray(data["t1ce"], jnp.float32)

        fake, loss, g_loss, d_loss, psnr, f_min, f_max, f_mean = _forward_impl(
            t1, t2, t1ce, self.params)

        acc_result = accumulate_cv_data(psnr, acc_result, host_sync=host_sync)
        # TODO(synk): SummaryWriter logging (local.writer) has no JAX equivalent.

        fake_sq = jnp.squeeze(fake)                   # (B, H, W)
        generated = list(jnp.split(fake_sq, fake_sq.shape[0], axis=0))
        if host_sync:                                 # device->host sync only on demand
            stats = [(float(f_min), float(f_max), float(f_mean))]
        else:
            stats = [(f_min, f_max, f_mean)]
        return {"loss": loss, "acc_result": acc_result,
                "generated": generated, "output": stats}


# ---------------------------------------------------------------------------
if __name__ == "__main__":
    key = jax.random.PRNGKey(0)
    k1, k2, k3 = jax.random.split(key, 3)
    B, H, W = 2, 16, 16
    input_dim, output_dim = 2, 1                      # (T1, T2) -> T1CE

    # Inputs in PyTorch NCHW convention.
    t1 = jax.random.uniform(k1, (B, 1, H, W), jnp.float32, -1.0, 1.0)
    t2 = jax.random.uniform(k2, (B, 1, H, W), jnp.float32, -1.0, 1.0)
    t1ce = jax.random.uniform(k3, (B, 1, H, W), jnp.float32, -1.0, 1.0)

    model = ProposedModelPallas(input_dim, output_dim, hidden=8)
    out = model.forward({"t1": t1, "t2": t2, "t1ce": t1ce}, mode="train")

    jax.block_until_ready(out["loss"])
    jax.block_until_ready(out["generated"][0])
    print("KERNEL_OK")
</pallas_src>

<mosaic_0001>
module attributes {stable_mosaic.version = 11 : i64} {
  func.func @_fused_forward_kernel(%arg0: i32, %arg1: memref<2x256xf32, #tpu.memory_space<vmem>>, %arg2: memref<1x256xf32, #tpu.memory_space<vmem>>, %arg3: memref<9x512xf32, #tpu.memory_space<vmem>>, %arg4: memref<8x18xbf16, #tpu.memory_space<vmem>>, %arg5: memref<8x1xf32, #tpu.memory_space<vmem>>, %arg6: memref<8x72xbf16, #tpu.memory_space<vmem>>, %arg7: memref<8x1xf32, #tpu.memory_space<vmem>>, %arg8: memref<1x72xbf16, #tpu.memory_space<vmem>>, %arg9: memref<1x1xf32, #tpu.memory_space<vmem>>, %arg10: memref<8x9xbf16, #tpu.memory_space<vmem>>, %arg11: memref<8x1xf32, #tpu.memory_space<vmem>>, %arg12: memref<1x72xbf16, #tpu.memory_space<vmem>>, %arg13: memref<1x1xf32, #tpu.memory_space<vmem>>, %arg14: memref<1x256xf32, #tpu.memory_space<vmem>>, %arg15: memref<1x1x128xf32, #tpu.memory_space<vmem>>) attributes {dimension_semantics = [#tpu.dimension_semantics<parallel>], iteration_bounds = array<i64: 2>, scalar_prefetch = 0 : i64, scratch_operands = 0 : i64, tpu.core_type = #tpu.core_type<tc>, window_params = [{transform_indices = @transform_0, window_bounds = array<i64: 2, 256>}, {transform_indices = @transform_1, window_bounds = array<i64: 1, 256>}, {pipeline_mode = #tpu.pipeline_mode<synchronous>, transform_indices = @transform_2, window_bounds = array<i64: 9, 512>}, {pipeline_mode = #tpu.pipeline_mode<synchronous>, transform_indices = @transform_3, window_bounds = array<i64: 8, 18>}, {pipeline_mode = #tpu.pipeline_mode<synchronous>, transform_indices = @transform_4, window_bounds = array<i64: 8, 1>}, {pipeline_mode = #tpu.pipeline_mode<synchronous>, transform_indices = @transform_5, window_bounds = array<i64: 8, 72>}, {pipeline_mode = #tpu.pipeline_mode<synchronous>, transform_indices = @transform_6, window_bounds = array<i64: 8, 1>}, {pipeline_mode = #tpu.pipeline_mode<synchronous>, transform_indices = @transform_7, window_bounds = array<i64: 1, 72>}, {pipeline_mode = #tpu.pipeline_mode<synchronous>, transform_indices = @transform_8, window_bounds = array<i64: 1, 1>}, {pipeline_mode = #tpu.pipeline_mode<synchronous>, transform_indices = @transform_9, window_bounds = array<i64: 8, 9>}, {pipeline_mode = #tpu.pipeline_mode<synchronous>, transform_indices = @transform_10, window_bounds = array<i64: 8, 1>}, {pipeline_mode = #tpu.pipeline_mode<synchronous>, transform_indices = @transform_11, window_bounds = array<i64: 1, 72>}, {pipeline_mode = #tpu.pipeline_mode<synchronous>, transform_indices = @transform_12, window_bounds = array<i64: 1, 1>}, {transform_indices = @transform_13, window_bounds = array<i64: 1, 256>}, {transform_indices = @transform_14, window_bounds = array<i64: 1, 1, 128>}]} {
    %c0 = arith.constant 0 : index
    %c0_0 = arith.constant 0 : index
    %0 = vector.load %arg3[%c0, %c0_0] : memref<9x512xf32, #tpu.memory_space<vmem>>, vector<9x512xf32>
    %cst = arith.constant 5.000000e-01 : f32
    %1 = vector.broadcast %cst : f32 to vector<9x512xf32>
    %2 = arith.cmpf ogt, %0, %1 : vector<9x512xf32>
    %3 = vector.extract_strided_slice %2 {offsets = [0, 0], sizes = [9, 256], strides = [1, 1]} : vector<9x512xi1> to vector<9x256xi1>
    %c0_1 = arith.constant 0 : index
    %c0_2 = arith.constant 0 : index
    %4 = vector.load %arg1[%c0_1, %c0_2] : memref<2x256xf32, #tpu.memory_space<vmem>>, vector<2x256xf32>
    %c0_3 = arith.constant 0 : index
    %c0_4 = arith.constant 0 : index
    %5 = vector.load %arg2[%c0_3, %c0_4] : memref<1x256xf32, #tpu.memory_space<vmem>>, vector<1x256xf32>
    %c17_i32 = arith.constant 17 : i32
    %6 = tpu.dynamic_rotate %4 by %c17_i32 dim 1 : vector<2x256xf32>, i32 -> vector<2x256xf32>
    %7 = vector.extract_strided_slice %3 {offsets = [0, 0], sizes = [1, 256], strides = [1, 1]} : vector<9x256xi1> to vector<1x256xi1>
    %cst_5 = arith.constant 0.000000e+00 : f32
    %8 = vector.shape_cast %7 : vector<1x256xi1> to vector<1x256xi1>
    %9 = vector.broadcast %8 : vector<1x256xi1> to vector<2x256xi1>
    %10 = vector.broadcast %cst_5 : f32 to vector<2x256xf32>
    %11 = arith.select %9, %6, %10 : vector<2x256xi1>, vector<2x256xf32>
    %c16_i32 = arith.constant 16 : i32
    %12 = tpu.dynamic_rotate %4 by %c16_i32 dim 1 : vector<2x256xf32>, i32 -> vector<2x256xf32>
    %13 = vector.extract_strided_slice %3 {offsets = [1, 0], sizes = [1, 256], strides = [1, 1]} : vector<9x256xi1> to vector<1x256xi1>
    %cst_6 = arith.constant 0.000000e+00 : f32
    %14 = vector.shape_cast %13 : vector<1x256xi1> to vector<1x256xi1>
    %15 = vector.broadcast %14 : vector<1x256xi1> to vector<2x256xi1>
    %16 = vector.broadcast %cst_6 : f32 to vector<2x256xf32>
    %17 = arith.select %15, %12, %16 : vector<2x256xi1>, vector<2x256xf32>
    %c15_i32 = arith.constant 15 : i32
    %18 = tpu.dynamic_rotate %4 by %c15_i32 dim 1 : vector<2x256xf32>, i32 -> vector<2x256xf32>
    %19 = vector.extract_strided_slice %3 {offsets = [2, 0], sizes = [1, 256], strides = [1, 1]} : vector<9x256xi1> to vector<1x256xi1>
    %cst_7 = arith.constant 0.000000e+00 : f32
    %20 = vector.shape_cast %19 : vector<1x256xi1> to vector<1x256xi1>
    %21 = vector.broadcast %20 : vector<1x256xi1> to vector<2x256xi1>
    %22 = vector.broadcast %cst_7 : f32 to vector<2x256xf32>
    %23 = arith.select %21, %18, %22 : vector<2x256xi1>, vector<2x256xf32>
    %c1_i32 = arith.constant 1 : i32
    %24 = tpu.dynamic_rotate %4 by %c1_i32 dim 1 : vector<2x256xf32>, i32 -> vector<2x256xf32>
    %25 = vector.extract_strided_slice %3 {offsets = [3, 0], sizes = [1, 256], strides = [1, 1]} : vector<9x256xi1> to vector<1x256xi1>
    %cst_8 = arith.constant 0.000000e+00 : f32
    %26 = vector.shape_cast %25 : vector<1x256xi1> to vector<1x256xi1>
    %27 = vector.broadcast %26 : vector<1x256xi1> to vector<2x256xi1>
    %28 = vector.broadcast %cst_8 : f32 to vector<2x256xf32>
    %29 = arith.select %27, %24, %28 : vector<2x256xi1>, vector<2x256xf32>
    %c255_i32 = arith.constant 255 : i32
    %30 = tpu.dynamic_rotate %4 by %c255_i32 dim 1 : vector<2x256xf32>, i32 -> vector<2x256xf32>
    %31 = vector.extract_strided_slice %3 {offsets = [5, 0], sizes = [1, 256], strides = [1, 1]} : vector<9x256xi1> to vector<1x256xi1>
    %cst_9 = arith.constant 0.000000e+00 : f32
    %32 = vector.shape_cast %31 : vector<1x256xi1> to vector<1x256xi1>
    %33 = vector.broadcast %32 : vector<1x256xi1> to vector<2x256xi1>
    %34 = vector.broadcast %cst_9 : f32 to vector<2x256xf32>
    %35 = arith.select %33, %30, %34 : vector<2x256xi1>, vector<2x256xf32>
    %c241_i32 = arith.constant 241 : i32
    %36 = tpu.dynamic_rotate %4 by %c241_i32 dim 1 : vector<2x256xf32>, i32 -> vector<2x256xf32>
    %37 = vector.extract_strided_slice %3 {offsets = [6, 0], sizes = [1, 256], strides = [1, 1]} : vector<9x256xi1> to vector<1x256xi1>
    %cst_10 = arith.constant 0.000000e+00 : f32
    %38 = vector.shape_cast %37 : vector<1x256xi1> to vector<1x256xi1>
    %39 = vector.broadcast %38 : vector<1x256xi1> to vector<2x256xi1>
    %40 = vector.broadcast %cst_10 : f32 to vector<2x256xf32>
    %41 = arith.select %39, %36, %40 : vector<2x256xi1>, vector<2x256xf32>
    %c240_i32 = arith.constant 240 : i32
    %42 = tpu.dynamic_rotate %4 by %c240_i32 dim 1 : vector<2x256xf32>, i32 -> vector<2x256xf32>
    %43 = vector.extract_strided_slice %3 {offsets = [7, 0], sizes = [1, 256], strides = [1, 1]} : vector<9x256xi1> to vector<1x256xi1>
    %cst_11 = arith.constant 0.000000e+00 : f32
    %44 = vector.shape_cast %43 : vector<1x256xi1> to vector<1x256xi1>
    %45 = vector.broadcast %44 : vector<1x256xi1> to vector<2x256xi1>
    %46 = vector.broadcast %cst_11 : f32 to vector<2x256xf32>
    %47 = arith.select %45, %42, %46 : vector<2x256xi1>, vector<2x256xf32>
    %c239_i32 = arith.constant 239 : i32
    %48 = tpu.dynamic_rotate %4 by %c239_i32 dim 1 : vector<2x256xf32>, i32 -> vector<2x256xf32>
    %49 = vector.extract_strided_slice %3 {offsets = [8, 0], sizes = [1, 256], strides = [1, 1]} : vector<9x256xi1> to vector<1x256xi1>
    %cst_12 = arith.constant 0.000000e+00 : f32
    %50 = vector.shape_cast %49 : vector<1x256xi1> to vector<1x256xi1>
    %51 = vector.broadcast %50 : vector<1x256xi1> to vector<2x256xi1>
    %52 = vector.broadcast %cst_12 : f32 to vector<2x256xf32>
    %53 = arith.select %51, %48, %52 : vector<2x256xi1>, vector<2x256xf32>
    %54 = tpu.concatenate %11, %17, %23, %29, %4, %35, %41, %47, %53 in 0 : vector<2x256xf32>, vector<2x256xf32>, vector<2x256xf32>, vector<2x256xf32>, vector<2x256xf32>, vector<2x256xf32>, vector<2x256xf32>, vector<2x256xf32>, vector<2x256xf32> -> vector<18x256xf32>
    %55 = arith.truncf %54 : vector<18x256xf32> to vector<18x256xbf16>
    %c0_13 = arith.constant 0 : index
    %c0_14 = arith.constant 0 : index
    %56 = vector.load %arg4[%c0_13, %c0_14] : memref<8x18xbf16, #tpu.memory_space<vmem>>, vector<8x18xbf16>
    %cst_15 = arith.constant dense<0.000000e+00> : vector<8x256xf32>
    %57 = tpu.matmul %56, %55, %cst_15 {dimension_numbers = #tpu.dot_dimension_numbers<[1], [0], [0], [1], [0, 0, 1, 1], [], []>} : vector<8x18xbf16>, vector<18x256xbf16>, vector<8x256xf32> -> vector<8x256xf32>
    %c0_16 = arith.constant 0 : index
    %c0_17 = arith.constant 0 : index
    %58 = vector.load %arg5[%c0_16, %c0_17] : memref<8x1xf32, #tpu.memory_space<vmem>>, vector<8x1xf32>
    %59 = vector.broadcast %58 : vector<8x1xf32> to vector<8x256xf32>
    %60 = arith.addf %57, %59 : vector<8x256xf32>
    %cst_18 = arith.constant 0.000000e+00 : f32
    %61 = vector.broadcast %cst_18 : f32 to vector<8x256xf32>
    %62 = arith.maximumf %60, %61 : vector<8x256xf32>
    %c17_i32_19 = arith.constant 17 : i32
    %63 = tpu.dynamic_rotate %62 by %c17_i32_19 dim 1 : vector<8x256xf32>, i32 -> vector<8x256xf32>
    %64 = vector.extract_strided_slice %3 {offsets = [0, 0], sizes = [1, 256], strides = [1, 1]} : vector<9x256xi1> to vector<1x256xi1>
    %cst_20 = arith.constant 0.000000e+00 : f32
    %65 = vector.shape_cast %64 : vector<1x256xi1> to vector<1x256xi1>
    %66 = vector.broadcast %65 : vector<1x256xi1> to vector<8x256xi1>
    %67 = vector.broadcast %cst_20 : f32 to vector<8x256xf32>
    %68 = arith.select %66, %63, %67 : vector<8x256xi1>, vector<8x256xf32>
    %c16_i32_21 = arith.constant 16 : i32
    %69 = tpu.dynamic_rotate %62 by %c16_i32_21 dim 1 : vector<8x256xf32>, i32 -> vector<8x256xf32>
    %70 = vector.extract_strided_slice %3 {offsets = [1, 0], sizes = [1, 256], strides = [1, 1]} : vector<9x256xi1> to vector<1x256xi1>
    %cst_22 = arith.constant 0.000000e+00 : f32
    %71 = vector.shape_cast %70 : vector<1x256xi1> to vector<1x256xi1>
    %72 = vector.broadcast %71 : vector<1x256xi1> to vector<8x256xi1>
    %73 = vector.broadcast %cst_22 : f32 to vector<8x256xf32>
    %74 = arith.select %72, %69, %73 : vector<8x256xi1>, vector<8x256xf32>
    %c15_i32_23 = arith.constant 15 : i32
    %75 = tpu.dynamic_rotate %62 by %c15_i32_23 dim 1 : vector<8x256xf32>, i32 -> vector<8x256xf32>
    %76 = vector.extract_strided_slice %3 {offsets = [2, 0], sizes = [1, 256], strides = [1, 1]} : vector<9x256xi1> to vector<1x256xi1>
    %cst_24 = arith.constant 0.000000e+00 : f32
    %77 = vector.shape_cast %76 : vector<1x256xi1> to vector<1x256xi1>
    %78 = vector.broadcast %77 : vector<1x256xi1> to vector<8x256xi1>
    %79 = vector.broadcast %cst_24 : f32 to vector<8x256xf32>
    %80 = arith.select %78, %75, %79 : vector<8x256xi1>, vector<8x256xf32>
    %c1_i32_25 = arith.constant 1 : i32
    %81 = tpu.dynamic_rotate %62 by %c1_i32_25 dim 1 : vector<8x256xf32>, i32 -> vector<8x256xf32>
    %82 = vector.extract_strided_slice %3 {offsets = [3, 0], sizes = [1, 256], strides = [1, 1]} : vector<9x256xi1> to vector<1x256xi1>
    %cst_26 = arith.constant 0.000000e+00 : f32
    %83 = vector.shape_cast %82 : vector<1x256xi1> to vector<1x256xi1>
    %84 = vector.broadcast %83 : vector<1x256xi1> to vector<8x256xi1>
    %85 = vector.broadcast %cst_26 : f32 to vector<8x256xf32>
    %86 = arith.select %84, %81, %85 : vector<8x256xi1>, vector<8x256xf32>
    %c255_i32_27 = arith.constant 255 : i32
    %87 = tpu.dynamic_rotate %62 by %c255_i32_27 dim 1 : vector<8x256xf32>, i32 -> vector<8x256xf32>
    %88 = vector.extract_strided_slice %3 {offsets = [5, 0], sizes = [1, 256], strides = [1, 1]} : vector<9x256xi1> to vector<1x256xi1>
    %cst_28 = arith.constant 0.000000e+00 : f32
    %89 = vector.shape_cast %88 : vector<1x256xi1> to vector<1x256xi1>
    %90 = vector.broadcast %89 : vector<1x256xi1> to vector<8x256xi1>
    %91 = vector.broadcast %cst_28 : f32 to vector<8x256xf32>
    %92 = arith.select %90, %87, %91 : vector<8x256xi1>, vector<8x256xf32>
    %c241_i32_29 = arith.constant 241 : i32
    %93 = tpu.dynamic_rotate %62 by %c241_i32_29 dim 1 : vector<8x256xf32>, i32 -> vector<8x256xf32>
    %94 = vector.extract_strided_slice %3 {offsets = [6, 0], sizes = [1, 256], strides = [1, 1]} : vector<9x256xi1> to vector<1x256xi1>
    %cst_30 = arith.constant 0.000000e+00 : f32
    %95 = vector.shape_cast %94 : vector<1x256xi1> to vector<1x256xi1>
    %96 = vector.broadcast %95 : vector<1x256xi1> to vector<8x256xi1>
    %97 = vector.broadcast %cst_30 : f32 to vector<8x256xf32>
    %98 = arith.select %96, %93, %97 : vector<8x256xi1>, vector<8x256xf32>
    %c240_i32_31 = arith.constant 240 : i32
    %99 = tpu.dynamic_rotate %62 by %c240_i32_31 dim 1 : vector<8x256xf32>, i32 -> vector<8x256xf32>
    %100 = vector.extract_strided_slice %3 {offsets = [7, 0], sizes = [1, 256], strides = [1, 1]} : vector<9x256xi1> to vector<1x256xi1>
    %cst_32 = arith.constant 0.000000e+00 : f32
    %101 = vector.shape_cast %100 : vector<1x256xi1> to vector<1x256xi1>
    %102 = vector.broadcast %101 : vector<1x256xi1> to vector<8x256xi1>
    %103 = vector.broadcast %cst_32 : f32 to vector<8x256xf32>
    %104 = arith.select %102, %99, %103 : vector<8x256xi1>, vector<8x256xf32>
    %c239_i32_33 = arith.constant 239 : i32
    %105 = tpu.dynamic_rotate %62 by %c239_i32_33 dim 1 : vector<8x256xf32>, i32 -> vector<8x256xf32>
    %106 = vector.extract_strided_slice %3 {offsets = [8, 0], sizes = [1, 256], strides = [1, 1]} : vector<9x256xi1> to vector<1x256xi1>
    %cst_34 = arith.constant 0.000000e+00 : f32
    %107 = vector.shape_cast %106 : vector<1x256xi1> to vector<1x256xi1>
    %108 = vector.broadcast %107 : vector<1x256xi1> to vector<8x256xi1>
    %109 = vector.broadcast %cst_34 : f32 to vector<8x256xf32>
    %110 = arith.select %108, %105, %109 : vector<8x256xi1>, vector<8x256xf32>
    %111 = tpu.concatenate %68, %74, %80, %86, %62, %92, %98, %104, %110 in 0 : vector<8x256xf32>, vector<8x256xf32>, vector<8x256xf32>, vector<8x256xf32>, vector<8x256xf32>, vector<8x256xf32>, vector<8x256xf32>, vector<8x256xf32>, vector<8x256xf32> -> vector<72x256xf32>
    %112 = arith.truncf %111 : vector<72x256xf32> to vector<72x256xbf16>
    %c0_35 = arith.constant 0 : index
    %c0_36 = arith.constant 0 : index
    %113 = vector.load %arg6[%c0_35, %c0_36] : memref<8x72xbf16, #tpu.memory_space<vmem>>, vector<8x72xbf16>
    %cst_37 = arith.constant dense<0.000000e+00> : vector<8x256xf32>
    %114 = tpu.matmul %113, %112, %cst_37 {dimension_numbers = #tpu.dot_dimension_numbers<[1], [0], [0], [1], [0, 0, 1, 1], [], []>} : vector<8x72xbf16>, vector<72x256xbf16>, vector<8x256xf32> -> vector<8x256xf32>
    %c0_38 = arith.constant 0 : index
    %c0_39 = arith.constant 0 : index
    %115 = vector.load %arg7[%c0_38, %c0_39] : memref<8x1xf32, #tpu.memory_space<vmem>>, vector<8x1xf32>
    %116 = vector.broadcast %115 : vector<8x1xf32> to vector<8x256xf32>
    %117 = arith.addf %114, %116 : vector<8x256xf32>
    %cst_40 = arith.constant 0.000000e+00 : f32
    %118 = vector.broadcast %cst_40 : f32 to vector<8x256xf32>
    %119 = arith.maximumf %117, %118 : vector<8x256xf32>
    %c17_i32_41 = arith.constant 17 : i32
    %120 = tpu.dynamic_rotate %119 by %c17_i32_41 dim 1 : vector<8x256xf32>, i32 -> vector<8x256xf32>
    %121 = vector.extract_strided_slice %3 {offsets = [0, 0], sizes = [1, 256], strides = [1, 1]} : vector<9x256xi1> to vector<1x256xi1>
    %cst_42 = arith.constant 0.000000e+00 : f32
    %122 = vector.shape_cast %121 : vector<1x256xi1> to vector<1x256xi1>
    %123 = vector.broadcast %122 : vector<1x256xi1> to vector<8x256xi1>
    %124 = vector.broadcast %cst_42 : f32 to vector<8x256xf32>
    %125 = arith.select %123, %120, %124 : vector<8x256xi1>, vector<8x256xf32>
    %c16_i32_43 = arith.constant 16 : i32
    %126 = tpu.dynamic_rotate %119 by %c16_i32_43 dim 1 : vector<8x256xf32>, i32 -> vector<8x256xf32>
    %127 = vector.extract_strided_slice %3 {offsets = [1, 0], sizes = [1, 256], strides = [1, 1]} : vector<9x256xi1> to vector<1x256xi1>
    %cst_44 = arith.constant 0.000000e+00 : f32
    %128 = vector.shape_cast %127 : vector<1x256xi1> to vector<1x256xi1>
    %129 = vector.broadcast %128 : vector<1x256xi1> to vector<8x256xi1>
    %130 = vector.broadcast %cst_44 : f32 to vector<8x256xf32>
    %131 = arith.select %129, %126, %130 : vector<8x256xi1>, vector<8x256xf32>
    %c15_i32_45 = arith.constant 15 : i32
    %132 = tpu.dynamic_rotate %119 by %c15_i32_45 dim 1 : vector<8x256xf32>, i32 -> vector<8x256xf32>
    %133 = vector.extract_strided_slice %3 {offsets = [2, 0], sizes = [1, 256], strides = [1, 1]} : vector<9x256xi1> to vector<1x256xi1>
    %cst_46 = arith.constant 0.000000e+00 : f32
    %134 = vector.shape_cast %133 : vector<1x256xi1> to vector<1x256xi1>
    %135 = vector.broadcast %134 : vector<1x256xi1> to vector<8x256xi1>
    %136 = vector.broadcast %cst_46 : f32 to vector<8x256xf32>
    %137 = arith.select %135, %132, %136 : vector<8x256xi1>, vector<8x256xf32>
    %c1_i32_47 = arith.constant 1 : i32
    %138 = tpu.dynamic_rotate %119 by %c1_i32_47 dim 1 : vector<8x256xf32>, i32 -> vector<8x256xf32>
    %139 = vector.extract_strided_slice %3 {offsets = [3, 0], sizes = [1, 256], strides = [1, 1]} : vector<9x256xi1> to vector<1x256xi1>
    %cst_48 = arith.constant 0.000000e+00 : f32
    %140 = vector.shape_cast %139 : vector<1x256xi1> to vector<1x256xi1>
    %141 = vector.broadcast %140 : vector<1x256xi1> to vector<8x256xi1>
    %142 = vector.broadcast %cst_48 : f32 to vector<8x256xf32>
    %143 = arith.select %141, %138, %142 : vector<8x256xi1>, vector<8x256xf32>
    %c255_i32_49 = arith.constant 255 : i32
    %144 = tpu.dynamic_rotate %119 by %c255_i32_49 dim 1 : vector<8x256xf32>, i32 -> vector<8x256xf32>
    %145 = vector.extract_strided_slice %3 {offsets = [5, 0], sizes = [1, 256], strides = [1, 1]} : vector<9x256xi1> to vector<1x256xi1>
    %cst_50 = arith.constant 0.000000e+00 : f32
    %146 = vector.shape_cast %145 : vector<1x256xi1> to vector<1x256xi1>
    %147 = vector.broadcast %146 : vector<1x256xi1> to vector<8x256xi1>
    %148 = vector.broadcast %cst_50 : f32 to vector<8x256xf32>
    %149 = arith.select %147, %144, %148 : vector<8x256xi1>, vector<8x256xf32>
    %c241_i32_51 = arith.constant 241 : i32
    %150 = tpu.dynamic_rotate %119 by %c241_i32_51 dim 1 : vector<8x256xf32>, i32 -> vector<8x256xf32>
    %151 = vector.extract_strided_slice %3 {offsets = [6, 0], sizes = [1, 256], strides = [1, 1]} : vector<9x256xi1> to vector<1x256xi1>
    %cst_52 = arith.constant 0.000000e+00 : f32
    %152 = vector.shape_cast %151 : vector<1x256xi1> to vector<1x256xi1>
    %153 = vector.broadcast %152 : vector<1x256xi1> to vector<8x256xi1>
    %154 = vector.broadcast %cst_52 : f32 to vector<8x256xf32>
    %155 = arith.select %153, %150, %154 : vector<8x256xi1>, vector<8x256xf32>
    %c240_i32_53 = arith.constant 240 : i32
    %156 = tpu.dynamic_rotate %119 by %c240_i32_53 dim 1 : vector<8x256xf32>, i32 -> vector<8x256xf32>
    %157 = vector.extract_strided_slice %3 {offsets = [7, 0], sizes = [1, 256], strides = [1, 1]} : vector<9x256xi1> to vector<1x256xi1>
    %cst_54 = arith.constant 0.000000e+00 : f32
    %158 = vector.shape_cast %157 : vector<1x256xi1> to vector<1x256xi1>
    %159 = vector.broadcast %158 : vector<1x256xi1> to vector<8x256xi1>
    %160 = vector.broadcast %cst_54 : f32 to vector<8x256xf32>
    %161 = arith.select %159, %156, %160 : vector<8x256xi1>, vector<8x256xf32>
    %c239_i32_55 = arith.constant 239 : i32
    %162 = tpu.dynamic_rotate %119 by %c239_i32_55 dim 1 : vector<8x256xf32>, i32 -> vector<8x256xf32>
    %163 = vector.extract_strided_slice %3 {offsets = [8, 0], sizes = [1, 256], strides = [1, 1]} : vector<9x256xi1> to vector<1x256xi1>
    %cst_56 = arith.constant 0.000000e+00 : f32
    %164 = vector.shape_cast %163 : vector<1x256xi1> to vector<1x256xi1>
    %165 = vector.broadcast %164 : vector<1x256xi1> to vector<8x256xi1>
    %166 = vector.broadcast %cst_56 : f32 to vector<8x256xf32>
    %167 = arith.select %165, %162, %166 : vector<8x256xi1>, vector<8x256xf32>
    %168 = tpu.concatenate %125, %131, %137, %143, %119, %149, %155, %161, %167 in 0 : vector<8x256xf32>, vector<8x256xf32>, vector<8x256xf32>, vector<8x256xf32>, vector<8x256xf32>, vector<8x256xf32>, vector<8x256xf32>, vector<8x256xf32>, vector<8x256xf32> -> vector<72x256xf32>
    %169 = arith.truncf %168 : vector<72x256xf32> to vector<72x256xbf16>
    %c0_57 = arith.constant 0 : index
    %c0_58 = arith.constant 0 : index
    %170 = vector.load %arg8[%c0_57, %c0_58] : memref<1x72xbf16, #tpu.memory_space<vmem>>, vector<1x72xbf16>
    %cst_59 = arith.constant dense<0.000000e+00> : vector<1x256xf32>
    %171 = tpu.matmul %170, %169, %cst_59 {dimension_numbers = #tpu.dot_dimension_numbers<[1], [0], [0], [1], [0, 0, 1, 1], [], []>} : vector<1x72xbf16>, vector<72x256xbf16>, vector<1x256xf32> -> vector<1x256xf32>
    %c0_60 = arith.constant 0 : index
    %c0_61 = arith.constant 0 : index
    %172 = vector.load %arg9[%c0_60, %c0_61] : memref<1x1xf32, #tpu.memory_space<vmem>>, vector<1x1xf32>
    %173 = vector.broadcast %172 : vector<1x1xf32> to vector<1x256xf32>
    %174 = arith.addf %171, %173 : vector<1x256xf32>
    %175 = math.tanh %174 : vector<1x256xf32>
    %c0_62 = arith.constant 0 : index
    %c0_63 = arith.constant 0 : index
    %176 = vector.load %arg14[%c0_62, %c0_63] : memref<1x256xf32, #tpu.memory_space<vmem>>, vector<1x256xf32>
    tpu.vector_store %arg14[%c0_62, %c0_63], %175 {strides = array<i32>} : memref<1x256xf32, #tpu.memory_space<vmem>>, vector<1x256xf32>,
    %177 = tpu.concatenate %175, %5 in 1 : vector<1x256xf32>, vector<1x256xf32> -> vector<1x512xf32>
    %c17_i32_64 = arith.constant 17 : i32
    %178 = tpu.dynamic_rotate %177 by %c17_i32_64 dim 1 : vector<1x512xf32>, i32 -> vector<1x512xf32>
    %179 = vector.extract_strided_slice %2 {offsets = [0, 0], sizes = [1, 512], strides = [1, 1]} : vector<9x512xi1> to vector<1x512xi1>
    %cst_65 = arith.constant 0.000000e+00 : f32
    %180 = vector.broadcast %cst_65 : f32 to vector<1x512xf32>
    %181 = arith.select %179, %178, %180 : vector<1x512xi1>, vector<1x512xf32>
    %c16_i32_66 = arith.constant 16 : i32
    %182 = tpu.dynamic_rotate %177 by %c16_i32_66 dim 1 : vector<1x512xf32>, i32 -> vector<1x512xf32>
    %183 = vector.extract_strided_slice %2 {offsets = [1, 0], sizes = [1, 512], strides = [1, 1]} : vector<9x512xi1> to vector<1x512xi1>
    %cst_67 = arith.constant 0.000000e+00 : f32
    %184 = vector.broadcast %cst_67 : f32 to vector<1x512xf32>
    %185 = arith.select %183, %182, %184 : vector<1x512xi1>, vector<1x512xf32>
    %c15_i32_68 = arith.constant 15 : i32
    %186 = tpu.dynamic_rotate %177 by %c15_i32_68 dim 1 : vector<1x512xf32>, i32 -> vector<1x512xf32>
    %187 = vector.extract_strided_slice %2 {offsets = [2, 0], sizes = [1, 512], strides = [1, 1]} : vector<9x512xi1> to vector<1x512xi1>
    %cst_69 = arith.constant 0.000000e+00 : f32
    %188 = vector.broadcast %cst_69 : f32 to vector<1x512xf32>
    %189 = arith.select %187, %186, %188 : vector<1x512xi1>, vector<1x512xf32>
    %c1_i32_70 = arith.constant 1 : i32
    %190 = tpu.dynamic_rotate %177 by %c1_i32_70 dim 1 : vector<1x512xf32>, i32 -> vector<1x512xf32>
    %191 = vector.extract_strided_slice %2 {offsets = [3, 0], sizes = [1, 512], strides = [1, 1]} : vector<9x512xi1> to vector<1x512xi1>
    %cst_71 = arith.constant 0.000000e+00 : f32
    %192 = vector.broadcast %cst_71 : f32 to vector<1x512xf32>
    %193 = arith.select %191, %190, %192 : vector<1x512xi1>, vector<1x512xf32>
    %c511_i32 = arith.constant 511 : i32
    %194 = tpu.dynamic_rotate %177 by %c511_i32 dim 1 : vector<1x512xf32>, i32 -> vector<1x512xf32>
    %195 = vector.extract_strided_slice %2 {offsets = [5, 0], sizes = [1, 512], strides = [1, 1]} : vector<9x512xi1> to vector<1x512xi1>
    %cst_72 = arith.constant 0.000000e+00 : f32
    %196 = vector.broadcast %cst_72 : f32 to vector<1x512xf32>
    %197 = arith.select %195, %194, %196 : vector<1x512xi1>, vector<1x512xf32>
    %c497_i32 = arith.constant 497 : i32
    %198 = tpu.dynamic_rotate %177 by %c497_i32 dim 1 : vector<1x512xf32>, i32 -> vector<1x512xf32>
    %199 = vector.extract_strided_slice %2 {offsets = [6, 0], sizes = [1, 512], strides = [1, 1]} : vector<9x512xi1> to vector<1x512xi1>
    %cst_73 = arith.constant 0.000000e+00 : f32
    %200 = vector.broadcast %cst_73 : f32 to vector<1x512xf32>
    %201 = arith.select %199, %198, %200 : vector<1x512xi1>, vector<1x512xf32>
    %c496_i32 = arith.constant 496 : i32
    %202 = tpu.dynamic_rotate %177 by %c496_i32 dim 1 : vector<1x512xf32>, i32 -> vector<1x512xf32>
    %203 = vector.extract_strided_slice %2 {offsets = [7, 0], sizes = [1, 512], strides = [1, 1]} : vector<9x512xi1> to vector<1x512xi1>
    %cst_74 = arith.constant 0.000000e+00 : f32
    %204 = vector.broadcast %cst_74 : f32 to vector<1x512xf32>
    %205 = arith.select %203, %202, %204 : vector<1x512xi1>, vector<1x512xf32>
    %c495_i32 = arith.constant 495 : i32
    %206 = tpu.dynamic_rotate %177 by %c495_i32 dim 1 : vector<1x512xf32>, i32 -> vector<1x512xf32>
    %207 = vector.extract_strided_slice %2 {offsets = [8, 0], sizes = [1, 512], strides = [1, 1]} : vector<9x512xi1> to vector<1x512xi1>
    %cst_75 = arith.constant 0.000000e+00 : f32
    %208 = vector.broadcast %cst_75 : f32 to vector<1x512xf32>
    %209 = arith.select %207, %206, %208 : vector<1x512xi1>, vector<1x512xf32>
    %210 = tpu.concatenate %181, %185, %189, %193, %177, %197, %201, %205, %209 in 0 : vector<1x512xf32>, vector<1x512xf32>, vector<1x512xf32>, vector<1x512xf32>, vector<1x512xf32>, vector<1x512xf32>, vector<1x512xf32>, vector<1x512xf32>, vector<1x512xf32> -> vector<9x512xf32>
    %211 = arith.truncf %210 : vector<9x512xf32> to vector<9x512xbf16>
    %c0_76 = arith.constant 0 : index
    %c0_77 = arith.constant 0 : index
    %212 = vector.load %arg10[%c0_76, %c0_77] : memref<8x9xbf16, #tpu.memory_space<vmem>>, vector<8x9xbf16>
    %cst_78 = arith.constant dense<0.000000e+00> : vector<8x512xf32>
    %213 = tpu.matmul %212, %211, %cst_78 {dimension_numbers = #tpu.dot_dimension_numbers<[1], [0], [0], [1], [0, 0, 1, 1], [], []>} : vector<8x9xbf16>, vector<9x512xbf16>, vector<8x512xf32> -> vector<8x512xf32>
    %c0_79 = arith.constant 0 : index
    %c0_80 = arith.constant 0 : index
    %214 = vector.load %arg11[%c0_79, %c0_80] : memref<8x1xf32, #tpu.memory_space<vmem>>, vector<8x1xf32>
    %215 = vector.broadcast %214 : vector<8x1xf32> to vector<8x512xf32>
    %216 = arith.addf %213, %215 : vector<8x512xf32>
    %cst_81 = arith.constant 0.000000e+00 : f32
    %217 = vector.broadcast %cst_81 : f32 to vector<8x512xf32>
    %218 = arith.cmpf ogt, %216, %217 : vector<8x512xf32>
    %cst_82 = arith.constant 2.000000e-01 : f32
    %219 = vector.broadcast %cst_82 : f32 to vector<8x512xf32>
    %220 = arith.mulf %219, %216 : vector<8x512xf32>
    %221 = arith.select %218, %216, %220 : vector<8x512xi1>, vector<8x512xf32>
    %c17_i32_83 = arith.constant 17 : i32
    %222 = tpu.dynamic_rotate %221 by %c17_i32_83 dim 1 : vector<8x512xf32>, i32 -> vector<8x512xf32>
    %223 = vector.extract_strided_slice %2 {offsets = [0, 0], sizes = [1, 512], strides = [1, 1]} : vector<9x512xi1> to vector<1x512xi1>
    %cst_84 = arith.constant 0.000000e+00 : f32
    %224 = vector.shape_cast %223 : vector<1x512xi1> to vector<1x512xi1>
    %225 = vector.broadcast %224 : vector<1x512xi1> to vector<8x512xi1>
    %226 = vector.broadcast %cst_84 : f32 to vector<8x512xf32>
    %227 = arith.select %225, %222, %226 : vector<8x512xi1>, vector<8x512xf32>
    %c16_i32_85 = arith.constant 16 : i32
    %228 = tpu.dynamic_rotate %221 by %c16_i32_85 dim 1 : vector<8x512xf32>, i32 -> vector<8x512xf32>
    %229 = vector.extract_strided_slice %2 {offsets = [1, 0], sizes = [1, 512], strides = [1, 1]} : vector<9x512xi1> to vector<1x512xi1>
    %cst_86 = arith.constant 0.000000e+00 : f32
    %230 = vector.shape_cast %229 : vector<1x512xi1> to vector<1x512xi1>
    %231 = vector.broadcast %230 : vector<1x512xi1> to vector<8x512xi1>
    %232 = vector.broadcast %cst_86 : f32 to vector<8x512xf32>
    %233 = arith.select %231, %228, %232 : vector<8x512xi1>, vector<8x512xf32>
    %c15_i32_87 = arith.constant 15 : i32
    %234 = tpu.dynamic_rotate %221 by %c15_i32_87 dim 1 : vector<8x512xf32>, i32 -> vector<8x512xf32>
    %235 = vector.extract_strided_slice %2 {offsets = [2, 0], sizes = [1, 512], strides = [1, 1]} : vector<9x512xi1> to vector<1x512xi1>
    %cst_88 = arith.constant 0.000000e+00 : f32
    %236 = vector.shape_cast %235 : vector<1x512xi1> to vector<1x512xi1>
    %237 = vector.broadcast %236 : vector<1x512xi1> to vector<8x512xi1>
    %238 = vector.broadcast %cst_88 : f32 to vector<8x512xf32>
    %239 = arith.select %237, %234, %238 : vector<8x512xi1>, vector<8x512xf32>
    %c1_i32_89 = arith.constant 1 : i32
    %240 = tpu.dynamic_rotate %221 by %c1_i32_89 dim 1 : vector<8x512xf32>, i32 -> vector<8x512xf32>
    %241 = vector.extract_strided_slice %2 {offsets = [3, 0], sizes = [1, 512], strides = [1, 1]} : vector<9x512xi1> to vector<1x512xi1>
    %cst_90 = arith.constant 0.000000e+00 : f32
    %242 = vector.shape_cast %241 : vector<1x512xi1> to vector<1x512xi1>
    %243 = vector.broadcast %242 : vector<1x512xi1> to vector<8x512xi1>
    %244 = vector.broadcast %cst_90 : f32 to vector<8x512xf32>
    %245 = arith.select %243, %240, %244 : vector<8x512xi1>, vector<8x512xf32>
    %c511_i32_91 = arith.constant 511 : i32
    %246 = tpu.dynamic_rotate %221 by %c511_i32_91 dim 1 : vector<8x512xf32>, i32 -> vector<8x512xf32>
    %247 = vector.extract_strided_slice %2 {offsets = [5, 0], sizes = [1, 512], strides = [1, 1]} : vector<9x512xi1> to vector<1x512xi1>
    %cst_92 = arith.constant 0.000000e+00 : f32
    %248 = vector.shape_cast %247 : vector<1x512xi1> to vector<1x512xi1>
    %249 = vector.broadcast %248 : vector<1x512xi1> to vector<8x512xi1>
    %250 = vector.broadcast %cst_92 : f32 to vector<8x512xf32>
    %251 = arith.select %249, %246, %250 : vector<8x512xi1>, vector<8x512xf32>
    %c497_i32_93 = arith.constant 497 : i32
    %252 = tpu.dynamic_rotate %221 by %c497_i32_93 dim 1 : vector<8x512xf32>, i32 -> vector<8x512xf32>
    %253 = vector.extract_strided_slice %2 {offsets = [6, 0], sizes = [1, 512], strides = [1, 1]} : vector<9x512xi1> to vector<1x512xi1>
    %cst_94 = arith.constant 0.000000e+00 : f32
    %254 = vector.shape_cast %253 : vector<1x512xi1> to vector<1x512xi1>
    %255 = vector.broadcast %254 : vector<1x512xi1> to vector<8x512xi1>
    %256 = vector.broadcast %cst_94 : f32 to vector<8x512xf32>
    %257 = arith.select %255, %252, %256 : vector<8x512xi1>, vector<8x512xf32>
    %c496_i32_95 = arith.constant 496 : i32
    %258 = tpu.dynamic_rotate %221 by %c496_i32_95 dim 1 : vector<8x512xf32>, i32 -> vector<8x512xf32>
    %259 = vector.extract_strided_slice %2 {offsets = [7, 0], sizes = [1, 512], strides = [1, 1]} : vector<9x512xi1> to vector<1x512xi1>
    %cst_96 = arith.constant 0.000000e+00 : f32
    %260 = vector.shape_cast %259 : vector<1x512xi1> to vector<1x512xi1>
    %261 = vector.broadcast %260 : vector<1x512xi1> to vector<8x512xi1>
    %262 = vector.broadcast %cst_96 : f32 to vector<8x512xf32>
    %263 = arith.select %261, %258, %262 : vector<8x512xi1>, vector<8x512xf32>
    %c495_i32_97 = arith.constant 495 : i32
    %264 = tpu.dynamic_rotate %221 by %c495_i32_97 dim 1 : vector<8x512xf32>, i32 -> vector<8x512xf32>
    %265 = vector.extract_strided_slice %2 {offsets = [8, 0], sizes = [1, 512], strides = [1, 1]} : vector<9x512xi1> to vector<1x512xi1>
    %cst_98 = arith.constant 0.000000e+00 : f32
    %266 = vector.shape_cast %265 : vector<1x512xi1> to vector<1x512xi1>
    %267 = vector.broadcast %266 : vector<1x512xi1> to vector<8x512xi1>
    %268 = vector.broadcast %cst_98 : f32 to vector<8x512xf32>
    %269 = arith.select %267, %264, %268 : vector<8x512xi1>, vector<8x512xf32>
    %270 = tpu.concatenate %227, %233, %239, %245, %221, %251, %257, %263, %269 in 0 : vector<8x512xf32>, vector<8x512xf32>, vector<8x512xf32>, vector<8x512xf32>, vector<8x512xf32>, vector<8x512xf32>, vector<8x512xf32>, vector<8x512xf32>, vector<8x512xf32> -> vector<72x512xf32>
    %271 = arith.truncf %270 : vector<72x512xf32> to vector<72x512xbf16>
    %c0_99 = arith.constant 0 : index
    %c0_100 = arith.constant 0 : index
    %272 = vector.load %arg12[%c0_99, %c0_100] : memref<1x72xbf16, #tpu.memory_space<vmem>>, vector<1x72xbf16>
    %cst_101 = arith.constant dense<0.000000e+00> : vector<1x512xf32>
    %273 = tpu.matmul %272, %271, %cst_101 {dimension_numbers = #tpu.dot_dimension_numbers<[1], [0], [0], [1], [0, 0, 1, 1], [], []>} : vector<1x72xbf16>, vector<72x512xbf16>, vector<1x512xf32> -> vector<1x512xf32>
    %c0_102 = arith.constant 0 : index
    %c0_103 = arith.constant 0 : index
    %274 = vector.load %arg13[%c0_102, %c0_103] : memref<1x1xf32, #tpu.memory_space<vmem>>, vector<1x1xf32>
    %275 = vector.broadcast %274 : vector<1x1xf32> to vector<1x512xf32>
    %276 = arith.addf %273, %275 : vector<1x512xf32>
    %277 = vector.extract_strided_slice %276 {offsets = [0, 0], sizes = [1, 256], strides = [1, 1]} : vector<1x512xf32> to vector<1x256xf32>
    %278 = vector.extract_strided_slice %276 {offsets = [0, 256], sizes = [1, 256], strides = [1, 1]} : vector<1x512xf32> to vector<1x256xf32>
    %cst_104 = arith.constant 0.000000e+00 : f32
    %279 = vector.broadcast %cst_104 : f32 to vector<1x256xf32>
    %280 = arith.maximumf %277, %279 : vector<1x256xf32>
    %281 = math.absf %277 : vector<1x256xf32>
    %cst_105 = arith.constant 0.000000e+00 : f32
    %282 = vector.broadcast %cst_105 : f32 to vector<1x256xf32>
    %283 = arith.subf %282, %281 : vector<1x256xf32>
    %284 = math.exp %283 : vector<1x256xf32>
    %285 = math.log1p %284 : vector<1x256xf32>
    %286 = arith.addf %280, %285 : vector<1x256xf32>
    %cst_106 = arith.constant 0.000000e+00 : f32
    %287 = vector.broadcast %cst_106 : f32 to vector<1x256xf32>
    %288 = arith.maximumf %278, %287 : vector<1x256xf32>
    %289 = math.absf %278 : vector<1x256xf32>
    %cst_107 = arith.constant 0.000000e+00 : f32
    %290 = vector.broadcast %cst_107 : f32 to vector<1x256xf32>
    %291 = arith.subf %290, %289 : vector<1x256xf32>
    %292 = math.exp %291 : vector<1x256xf32>
    %293 = math.log1p %292 : vector<1x256xf32>
    %294 = arith.addf %288, %293 : vector<1x256xf32>
    %295 = arith.subf %175, %5 : vector<1x256xf32>
    %296 = arith.subf %286, %277 : vector<1x256xf32>
    %297 = vector.shape_cast %296 : vector<1x256xf32> to vector<1x1x256xf32>
    %cst_108 = arith.constant dense<0.000000e+00> : vector<1xf32>
    %298 = vector.multi_reduction <add>, %297, %cst_108 [1, 2] : vector<1x1x256xf32> to vector<1xf32>
    %299 = vector.shape_cast %298 : vector<1xf32> to vector<1x1x1xf32>
    %300 = vector.extract %299[0, 0, 0] : f32 from vector<1x1x1xf32>
    %301 = math.absf %295 : vector<1x256xf32>
    %302 = vector.shape_cast %301 : vector<1x256xf32> to vector<1x1x256xf32>
    %cst_109 = arith.constant dense<0.000000e+00> : vector<1xf32>
    %303 = vector.multi_reduction <add>, %302, %cst_109 [1, 2] : vector<1x1x256xf32> to vector<1xf32>
    %304 = vector.shape_cast %303 : vector<1xf32> to vector<1x1x1xf32>
    %305 = vector.extract %304[0, 0, 0] : f32 from vector<1x1x1xf32>
    %306 = vector.shape_cast %286 : vector<1x256xf32> to vector<1x1x256xf32>
    %cst_110 = arith.constant dense<0.000000e+00> : vector<1xf32>
    %307 = vector.multi_reduction <add>, %306, %cst_110 [1, 2] : vector<1x1x256xf32> to vector<1xf32>
    %308 = vector.shape_cast %307 : vector<1xf32> to vector<1x1x1xf32>
    %309 = vector.extract %308[0, 0, 0] : f32 from vector<1x1x1xf32>
    %310 = arith.subf %294, %278 : vector<1x256xf32>
    %311 = vector.shape_cast %310 : vector<1x256xf32> to vector<1x1x256xf32>
    %cst_111 = arith.constant dense<0.000000e+00> : vector<1xf32>
    %312 = vector.multi_reduction <add>, %311, %cst_111 [1, 2] : vector<1x1x256xf32> to vector<1xf32>
    %313 = vector.shape_cast %312 : vector<1xf32> to vector<1x1x1xf32>
    %314 = vector.extract %313[0, 0, 0] : f32 from vector<1x1x1xf32>
    %315 = arith.mulf %295, %295 : vector<1x256xf32>
    %316 = vector.shape_cast %315 : vector<1x256xf32> to vector<1x1x256xf32>
    %cst_112 = arith.constant dense<0.000000e+00> : vector<1xf32>
    %317 = vector.multi_reduction <add>, %316, %cst_112 [1, 2] : vector<1x1x256xf32> to vector<1xf32>
    %318 = vector.shape_cast %317 : vector<1xf32> to vector<1x1x1xf32>
    %319 = vector.extract %318[0, 0, 0] : f32 from vector<1x1x1xf32>
    %320 = vector.shape_cast %175 : vector<1x256xf32> to vector<1x1x256xf32>
    %cst_113 = arith.constant dense<0x7F800000> : vector<1xf32>
    %321 = vector.multi_reduction <minimumf>, %320, %cst_113 [1, 2] : vector<1x1x256xf32> to vector<1xf32>
    %322 = vector.shape_cast %321 : vector<1xf32> to vector<1x1x1xf32>
    %323 = vector.extract %322[0, 0, 0] : f32 from vector<1x1x1xf32>
    %324 = vector.shape_cast %175 : vector<1x256xf32> to vector<1x1x256xf32>
    %cst_114 = arith.constant dense<0xFF800000> : vector<1xf32>
    %325 = vector.multi_reduction <maximumf>, %324, %cst_114 [1, 2] : vector<1x1x256xf32> to vector<1xf32>
    %326 = vector.shape_cast %325 : vector<1xf32> to vector<1x1x1xf32>
    %327 = vector.extract %326[0, 0, 0] : f32 from vector<1x1x1xf32>
    %328 = vector.shape_cast %175 : vector<1x256xf32> to vector<1x1x256xf32>
    %cst_115 = arith.constant dense<0.000000e+00> : vector<1xf32>
    %329 = vector.multi_reduction <add>, %328, %cst_115 [1, 2] : vector<1x1x256xf32> to vector<1xf32>
    %330 = vector.shape_cast %329 : vector<1xf32> to vector<1x1x1xf32>
    %331 = vector.extract %330[0, 0, 0] : f32 from vector<1x1x1xf32>
    %332 = tpu.iota {dimensions = array<i32: 1>} : vector<1x128xi32>
    %cst_116 = arith.constant 0.000000e+00 : f32
    %333 = vector.broadcast %cst_116 : f32 to vector<1x128xf32>
    %c0_i32 = arith.constant 0 : i32
    %334 = vector.broadcast %c0_i32 : i32 to vector<1x128xi32>
    %335 = arith.cmpi eq, %332, %334 : vector<1x128xi32>
    %336 = vector.broadcast %300 : f32 to vector<1x128xf32>
    %337 = arith.select %335, %336, %333 : vector<1x128xi1>, vector<1x128xf32>
    %c1_i32_117 = arith.constant 1 : i32
    %338 = vector.broadcast %c1_i32_117 : i32 to vector<1x128xi32>
    %339 = arith.cmpi eq, %332, %338 : vector<1x128xi32>
    %340 = vector.broadcast %305 : f32 to vector<1x128xf32>
    %341 = arith.select %339, %340, %337 : vector<1x128xi1>, vector<1x128xf32>
    %c2_i32 = arith.constant 2 : i32
    %342 = vector.broadcast %c2_i32 : i32 to vector<1x128xi32>
    %343 = arith.cmpi eq, %332, %342 : vector<1x128xi32>
    %344 = vector.broadcast %309 : f32 to vector<1x128xf32>
    %345 = arith.select %343, %344, %341 : vector<1x128xi1>, vector<1x128xf32>
    %c3_i32 = arith.constant 3 : i32
    %346 = vector.broadcast %c3_i32 : i32 to vector<1x128xi32>
    %347 = arith.cmpi eq, %332, %346 : vector<1x128xi32>
    %348 = vector.broadcast %314 : f32 to vector<1x128xf32>
    %349 = arith.select %347, %348, %345 : vector<1x128xi1>, vector<1x128xf32>
    %c4_i32 = arith.constant 4 : i32
    %350 = vector.broadcast %c4_i32 : i32 to vector<1x128xi32>
    %351 = arith.cmpi eq, %332, %350 : vector<1x128xi32>
    %352 = vector.broadcast %319 : f32 to vector<1x128xf32>
    %353 = arith.select %351, %352, %349 : vector<1x128xi1>, vector<1x128xf32>
    %c5_i32 = arith.constant 5 : i32
    %354 = vector.broadcast %c5_i32 : i32 to vector<1x128xi32>
    %355 = arith.cmpi eq, %332, %354 : vector<1x128xi32>
    %356 = vector.broadcast %323 : f32 to vector<1x128xf32>
    %357 = arith.select %355, %356, %353 : vector<1x128xi1>, vector<1x128xf32>
    %c6_i32 = arith.constant 6 : i32
    %358 = vector.broadcast %c6_i32 : i32 to vector<1x128xi32>
    %359 = arith.cmpi eq, %332, %358 : vector<1x128xi32>
    %360 = vector.broadcast %327 : f32 to vector<1x128xf32>
    %361 = arith.select %359, %360, %357 : vector<1x128xi1>, vector<1x128xf32>
    %c7_i32 = arith.constant 7 : i32
    %362 = vector.broadcast %c7_i32 : i32 to vector<1x128xi32>
    %363 = arith.cmpi eq, %332, %362 : vector<1x128xi32>
    %364 = vector.broadcast %331 : f32 to vector<1x128xf32>
    %365 = arith.select %363, %364, %361 : vector<1x128xi1>, vector<1x128xf32>
    %c0_118 = arith.constant 0 : index
    %c0_119 = arith.constant 0 : index
    %c0_120 = arith.constant 0 : index
    %366 = vector.load %arg15[%c0_118, %c0_119, %c0_120] : memref<1x1x128xf32, #tpu.memory_space<vmem>>, vector<1x1x128xf32>
    %367 = vector.shape_cast %366 : vector<1x1x128xf32> to vector<1x128xf32>
    %368 = vector.shape_cast %365 : vector<1x128xf32> to vector<1x1x128xf32>
    tpu.vector_store %arg15[%c0_118, %c0_119, %c0_120], %368 {strides = array<i32>} : memref<1x1x128xf32, #tpu.memory_space<vmem>>, vector<1x1x128xf32>,
    return
  }
  func.func @transform_0(%arg0: i32) -> (i32, i32) {
    %c0_i32 = arith.constant 0 : i32
    %c0_i32_0 = arith.constant 0 : i32
    return %c0_i32, %arg0 : i32, i32
  }
  func.func @transform_1(%arg0: i32) -> (i32, i32) {
    %c0_i32 = arith.constant 0 : i32
    %c0_i32_0 = arith.constant 0 : i32
    return %c0_i32, %arg0 : i32, i32
  }
  func.func @transform_2(%arg0: i32) -> (i32, i32) {
    %c0_i32 = arith.constant 0 : i32
    %c0_i32_0 = arith.constant 0 : i32
    %c0_i32_1 = arith.constant 0 : i32
    return %c0_i32, %c0_i32_0 : i32, i32
  }
  func.func @transform_3(%arg0: i32) -> (i32, i32) {
    %c0_i32 = arith.constant 0 : i32
    %c0_i32_0 = arith.constant 0 : i32
    %c0_i32_1 = arith.constant 0 : i32
    return %c0_i32, %c0_i32_0 : i32, i32
  }
  func.func @transform_4(%arg0: i32) -> (i32, i32) {
    %c0_i32 = arith.constant 0 : i32
    %c0_i32_0 = arith.constant 0 : i32
    %c0_i32_1 = arith.constant 0 : i32
    return %c0_i32, %c0_i32_0 : i32, i32
  }
  func.func @transform_5(%arg0: i32) -> (i32, i32) {
    %c0_i32 = arith.constant 0 : i32
    %c0_i32_0 = arith.constant 0 : i32
    %c0_i32_1 = arith.constant 0 : i32
    return %c0_i32, %c0_i32_0 : i32, i32
  }
  func.func @transform_6(%arg0: i32) -> (i32, i32) {
    %c0_i32 = arith.constant 0 : i32
    %c0_i32_0 = arith.constant 0 : i32
    %c0_i32_1 = arith.constant 0 : i32
    return %c0_i32, %c0_i32_0 : i32, i32
  }
  func.func @transform_7(%arg0: i32) -> (i32, i32) {
    %c0_i32 = arith.constant 0 : i32
    %c0_i32_0 = arith.constant 0 : i32
    %c0_i32_1 = arith.constant 0 : i32
    return %c0_i32, %c0_i32_0 : i32, i32
  }
  func.func @transform_8(%arg0: i32) -> (i32, i32) {
    %c0_i32 = arith.constant 0 : i32
    %c0_i32_0 = arith.constant 0 : i32
    %c0_i32_1 = arith.constant 0 : i32
    return %c0_i32, %c0_i32_0 : i32, i32
  }
  func.func @transform_9(%arg0: i32) -> (i32, i32) {
    %c0_i32 = arith.constant 0 : i32
    %c0_i32_0 = arith.constant 0 : i32
    %c0_i32_1 = arith.constant 0 : i32
    return %c0_i32, %c0_i32_0 : i32, i32
  }
  func.func @transform_10(%arg0: i32) -> (i32, i32) {
    %c0_i32 = arith.constant 0 : i32
    %c0_i32_0 = arith.constant 0 : i32
    %c0_i32_1 = arith.constant 0 : i32
    return %c0_i32, %c0_i32_0 : i32, i32
  }
  func.func @transform_11(%arg0: i32) -> (i32, i32) {
    %c0_i32 = arith.constant 0 : i32
    %c0_i32_0 = arith.constant 0 : i32
    %c0_i32_1 = arith.constant 0 : i32
    return %c0_i32, %c0_i32_0 : i32, i32
  }
  func.func @transform_12(%arg0: i32) -> (i32, i32) {
    %c0_i32 = arith.constant 0 : i32
    %c0_i32_0 = arith.constant 0 : i32
    %c0_i32_1 = arith.constant 0 : i32
    return %c0_i32, %c0_i32_0 : i32, i32
  }
  func.func @transform_13(%arg0: i32) -> (i32, i32) {
    %c0_i32 = arith.constant 0 : i32
    %c0_i32_0 = arith.constant 0 : i32
    return %c0_i32, %arg0 : i32, i32
  }
  func.func @transform_14(%arg0: i32) -> (i32, i32, i32) {
    %c0_i32 = arith.constant 0 : i32
    %c0_i32_0 = arith.constant 0 : i32
    %c0_i32_1 = arith.constant 0 : i32
    return %arg0, %c0_i32, %c0_i32_0 : i32, i32, i32
  }
}

</mosaic_0001>

<bundles_post_ra>
// kernel: _forward_impl.1
= control target key start
LH: loop header
LB: loop body
LE: loop exit
PB: predicated region body
PF: predicated region fallthrough
CT: control target
= control target key end

     0   :  { %s4000_s17 = smov 0   ;;  %s6424_s0 = inlined_call_operand.vmem [shape: f32[2,512], index: 0, kind: input, shape index: {}]   ;;  %s6425_s1 = inlined_call_operand.vmem [shape: f32[1,512], index: 1, kind: input, shape index: {}]   ;;  %s6426_s2 = inlined_call_operand.vmem [shape: f32[9,512], index: 2, kind: input, shape index: {}]   ;;  %s6427_s3 = inlined_call_operand.vmem [shape: bf16[8,18], index: 3, kind: input, shape index: {}]   ;;  %s6428_s4 = inlined_call_operand.vmem [shape: f32[8,1], index: 4, kind: input, shape index: {}]   ;;  %s6429_s5 = inlined_call_operand.vmem [shape: bf16[8,72], index: 5, kind: input, shape index: {}]   ;;  %s6430_s6 = inlined_call_operand.vmem [shape: f32[8,1], index: 6, kind: input, shape index: {}]   ;;  %s6431_s7 = inlined_call_operand.vmem [shape: bf16[1,72], index: 7, kind: input, shape index: {}]   ;;  %s6432_s8 = inlined_call_operand.<no memory space> [shape: f32[1,1], index: 8, kind: input, shape index: {}]   ;;  %s6433_s9 = inlined_call_operand.vmem [shape: bf16[8,9], index: 9, kind: input, shape index: {}]   ;;  %s6434_s10 = inlined_call_operand.vmem [shape: f32[8,1], index: 10, kind: input, shape index: {}]   ;;  %s6435_s11 = inlined_call_operand.vmem [shape: bf16[1,72], index: 11, kind: input, shape index: {}]   ;;  %s6436_s13 = inlined_call_operand.vmem [shape: f32[1,512], index: 13, kind: output, shape index: {0}]   ;;  %s6437_s14 = inlined_call_operand.vmem [shape: f32[2,1,128], index: 14, kind: output, shape index: {1}]   ;;  %s6438_s12 = inlined_call_operand.<no memory space> [shape: f32[1,1], index: 12, kind: input, shape index: {}]  }
   0x1   :  { %v20_v0 = vstv %s6432_s8  ;;  %v22_v1 = vstv %s6438_s12 }
   0x2   :  { %21 = vst [vmem:[#allocation2] sm:$0x1] %v20_v0  ;;  %23 = vst [vmem:[#allocation3] sm:$0x1] %v22_v1 }
   0x3 LB: > { %s4006_s18 = sadd.s32 4294967295, %s3905_s17   ;;  %p3498_p0 = scmp.ge.s32.totalorder %s3905_s17, 1  ;;  %s3905_s17 = sphi %s4000_s17, %s29_s17  }
   0x4   : > { %p430_p1 = scmp.lt.s32.totalorder %s3905_s17, 3 }
   0x6   : > { %p431_p2 = pnand %p3498_p0, %p430_p1 }
   0x8   : > { %434 = sbr.rel (%p431_p2) target bundleno = 2373 (0x945), region = 72 }
   0xf   : > { %s3499_s8 = sshll.u32 %s4006_s18, 1  ;;  %v535_v2 = vlaneseq  ;;  %v3907_v3 = vmov 0   ;;  %s3908_s25 = smov 15   ;;  %v745_v11 = vld [vmem:[%s6428_s4] sm:$0xff]  ;;  %v4061_v13 = vld [vmem:[%s6426_s2 + $0x8] sm:$0xff] }
  0x10   : > { %p483_p3 = scmp.lt.s32.totalorder %s3499_s8, 3  ;;  %794 = vmatprep.mubr.bf16.mxu0 %v3907_v3  ;;  %3642 = vset.pattern.permute.xlu0 %v3907_v3  ;;  %s3909_s26 = smov 16   ;;  %v4056_v12 = vld [vmem:[%s6426_s2] sm:$0xff]  ;;  %vm6439_vm1 = vcmp.gt.f32.partialorder %v4061_v13, 0.5  ;;  %v4084_v24 = vld [vmem:[%s6426_s2 + $0x28] sm:$0x1] }
  0x11   : > { %928 = vmatprep.mubr.bf16.mxu1 %v3907_v3  ;;  %3723 = vset.pattern.permute.xlu1 %v3907_v3  ;;  %v4018_v4 = vshrl.u32 %v535_v2, 7  ;;  %s3910_s27 = smov 113   ;;  %s3911_s28 = smov 127   ;;  %vm6440_vm0 = vcmp.gt.f32.partialorder %v4056_v12, 0.5  ;;  %v541_v16 = vsel %vm6439_vm1, 1, %v3907_v3  ;;  %v4074_v18 = vand.u32 127, %v535_v2 }
  0x12   : > { %s7062_s8 = smov (!%p483_p3, %s3499_s8), 3  ;;  %s3912_s29 = smov 1   ;;  %v540_v15 = vsel %vm6440_vm0, 1, %v3907_v3  ;;  %6538 = vst [vmem:[#allocation4_spill] sm:$0xff] %v4084_v24  ;;  %v4101_v30 = vld [vmem:[%s6426_s2 + $0x20] sm:$0x1] }
  0x13   : > { %s3500_s12 = sshll.u32 %s7062_s8, 1  ;;  %s491_s24 = scalar_lea.vmem %s6425_s1, %s7062_s8  ;;  %v563_v6 = vsub.s32 1, %v4018_v4  ;;  %v582_v14 = vsub.s32 2, %v4018_v4  ;;  %v639_v17 = vsub.s32 6, %v4018_v4  ;;  %v620_v19 = vsub.s32 5, %v4018_v4  ;;  %6540 = vst [vmem:[#allocation6_spill] sm:$0xff] %v4101_v30 }
  0x14   : > { %s486_s21 = scalar_lea.vmem %s6424_s0, %s3500_s12  ;;  %v4035_v8 = vld [vmem:[%s491_s24] sm:$0x3]  ;;  %s3913_s30 = smov 17   ;;  %v4087_v25 = vsub.s32 0, %v4018_v4  ;;  %vm6443_vm2 = vcmp.lt.s32.totalorder %v4074_v18, 15  ;;  %vm6446_vm3 = vcmp.lt.s32.totalorder %v4074_v18, 16 }
  0x15   : > { %v4024_v5 = vld.sshfl [vmem:[%s486_s21] sm:$0x33 pattern:$0x76325410]  ;;  %v4038_v9 = vrot.slane %v4035_v8, %v563_v6  ;;  %s3914_s15 = smov 112   ;;  %s3915_s16 = smov 111   ;;  %v4077_v20 = vrot.slane %v540_v15, %v582_v14  ;;  %v4079_v21 = vrot.slane %v541_v16, %v582_v14  ;;  %v564_v22 = vrot.slane %v540_v15, %v563_v6 }
  0x16   : > { %v4033_v7 = vcombine.high %v4024_v5, %v4024_v5  ;;  %v568_v23 = vrot.slane %v541_v16, %v563_v6  ;;  %6539 = vst [vmem:[#allocation5_spill] sm:$0xff] %v4087_v25  ;;  %v4089_v26 = vrot.slane %v540_v15, %v639_v17  ;;  %v4091_v27 = vrot.slane %v541_v16, %v639_v17  ;;  %v1013_v14 = vld [vmem:[%s6431_s7] sm:$0x1]  ;;  %s496_s24 = scalar_lea.vmem %s6436_s13, %s7062_s8  ;;  %p498_p4 = scmp.lt.s32.totalorder %s4006_s18, 1 }
  0x17   : > { %v4095_v28 = vrot.slane %v540_v15, %v620_v19  ;;  %v601_v29 = vsub.s32 3, %v4018_v4  ;;  %vm6444_vm4 = vcmp.eq.s32.totalorder %v4077_v20, 1  ;;  %vm6445_vm5 = vcmp.eq.s32.totalorder %v4079_v21, 1 }
  0x18   : > { %v3612_v10 = vpack.i.bf16 %v4033_v7, %v4024_v5  ;;  %vm6447_vm6 = vcmp.lt.s32.totalorder %v4074_v18, 113  ;;  %vm6455_vm7 = vcmp.lt.s32.totalorder %v4074_v18, 127  ;;  %vm6441_vm8 = vcmp.gt.f32.partialorder %v4084_v24, 0.5  ;;  %s7064_s18 = smov (!%p498_p4, %s4006_s18), 1 }
  0x19   : > { %vm4108_vm9 = vcmp.eq.s32.totalorder %v564_v22, 1  ;;  %vm4112_vm10 = vcmp.eq.s32.totalorder %v568_v23, 1  ;;  %v4116_v33 = vrot.slane %v541_v16, %v620_v19  ;;  %v658_v34 = vsub.s32 7, %v4018_v4 }
  0x1a   : > { %3613 = vrot.lane.b32.xlu1 %v3612_v10, %s3908_s25  ;;  %3603 = vrot.lane.b32.xlu0 %v3612_v10, %s3909_s26  ;;  %vm6448_vm11 = vcmp.eq.s32.totalorder %v4089_v26, 1  ;;  %vm6449_vm12 = vcmp.eq.s32.totalorder %v4091_v27, 1  ;;  %v545_v35 = vrot.slane %v540_v15, %v4087_v25  ;;  %vm6442_vm13 = vcmp.gt.f32.partialorder %v4101_v30, 0.5 }
  0x1b   : > { %vm6450_vm14 = vcmp.eq.s32.totalorder %v4095_v28, 1  ;;  %v549_v38 = vrot.slane %v541_v16, %v4087_v25  ;;  %v676_v39 = vsel %vm6441_vm8, 1, %v3907_v3  ;;  %v4128_v40 = vrot.slane %v541_v16, %v601_v29 }
  0x1c   : > { %v4133_v45 = vrot.slane %v541_v16, %v658_v34  ;;  %v4135_v46 = vrot.slane %v540_v15, %v601_v29  ;;  %v675_v47 = vsel %vm6442_vm13, 1, %v3907_v3  ;;  %vm4144_vm8 = vcmp.eq.s32.totalorder %v545_v35, 1 }
  0x1d   : > { %v684_v51 = vrot.slane %v676_v39, %v4087_v25  ;;  %v4149_v52 = vrot.slane %v540_v15, %v658_v34  ;;  %vm4163_vm13 = vcmp.eq.s32.totalorder %v549_v38, 1  ;;  %vm6452_vm0 = vcmask 1041408  }
  0x1e   : > { %3618 = vrot.lane.b32.xlu1 %v3612_v10, %s3910_s27  ;;  %3608 = vrot.lane.b32.xlu0 %v3612_v10, %s3911_s28  ;;  %v680_v60 = vrot.slane %v675_v47, %v4087_v25  ;;  %vm6457_vm1 = vcmask 1043456   ;;  %vm607_vm15 = vcmp.eq.s32.totalorder %v4135_v46, 1 }
  0x22   : > { %3628 = vrot.lane.b32.xlu1 %v3612_v10, %s3912_s29  ;;  %3623 = vrot.lane.b32.xlu0 %v3612_v10, %s3913_s30 }
  0x26   : > { %3633 = vrot.lane.b32.xlu0 %v3612_v10, %s3914_s15  ;;  %3638 = vrot.lane.b32.xlu1 %v3612_v10, %s3915_s16 }
  0x2a   : > { %748 = vperm.xlu0 %3642, %v745_v11  }
  0x8c   : > { %v3614_v36 = vpop.permute.xlu1 %3613  ;;  %v3604_v37 = vpop.permute.xlu0 %3603 }
  0x8d   : > { %v3616_v41 = vunpack.i.h.bf16 %v3614_v36  ;;  %v3615_v42 = vunpack.i.l.bf16 %v3614_v36  ;;  %v3606_v43 = vunpack.i.h.bf16 %v3604_v37  ;;  %v3605_v44 = vunpack.i.l.bf16 %v3604_v37 }
  0x8f   : > { %v578_v48 = vsel %vm6443_vm2, %v3615_v42, %v3616_v41  ;;  %v579_v49 = vsel %vm6443_vm2, %v3616_v41, %v3615_v42  ;;  %v559_v55 = vsel %vm6446_vm3, %v3605_v44, %v3606_v43  ;;  %v560_v56 = vsel %vm6446_vm3, %v3606_v43, %v3605_v44 }
  0x90   : > { %v4153_v53 = vsel %vm6444_vm4, %v579_v49, 0.0  ;;  %v4157_v54 = vsel %vm6445_vm5, %v578_v48, 0.0  ;;  %v3619_v57 = vpop.permute.xlu1 %3618  ;;  %v3609_v58 = vpop.permute.xlu0 %3608  ;;  %vm608_vm4 = vcmp.eq.s32.totalorder %v4128_v40, 1  ;;  %v571_v10 = vsel %vm4108_vm9, %v560_v56, 0.0 }
  0x91   : > { %v3621_v61 = vunpack.i.h.bf16 %v3619_v57  ;;  %v3620_v62 = vunpack.i.l.bf16 %v3619_v57  ;;  %v3611_v63 = vunpack.i.h.bf16 %v3609_v58  ;;  %v3610_v0 = vunpack.i.l.bf16 %v3609_v58 }
  0x92   : > { %v697_v1 = vrot.slane %v4153_v53, 4  ;;  %v698_v6 = vrot.slane %v4157_v54, 4  ;;  %v572_v11 = vsel %vm4112_vm10, %v559_v55, 0.0  ;;  %vm4179_vm2 = vcmp.eq.s32.totalorder %v684_v51, 1 }
  0x93   : > { %vm6451_vm5 = vcmask 1045504   ;;  %v635_v15 = vsel %vm6447_vm6, %v3620_v62, %v3621_v61  ;;  %v636_v16 = vsel %vm6447_vm6, %v3621_v61, %v3620_v62  ;;  %v616_v17 = vsel %vm6455_vm7, %v3610_v0, %v3611_v63 }
  0x94   : > { %v617_v19 = vsel %vm6455_vm7, %v3611_v63, %v3610_v0  ;;  %v3629_v22 = vpop.permute.xlu1 %3628  ;;  %v3624_v23 = vpop.permute.xlu0 %3623  ;;  %v647_v29 = vsel %vm6448_vm11, %v635_v15, 0.0  ;;  %v648_v34 = vsel %vm6449_vm12, %v636_v16, 0.0  ;;  %v628_v35 = vsel %vm6450_vm14, %v616_v17, 0.0 }
  0x95   : > { %vm6551_vm3 = vcmp.eq.s32.totalorder %v4116_v33, 1  ;;  %v691_v37 = vrot.slane %v571_v10, 6  ;;  %v692_v38 = vrot.slane %v572_v11, 6  ;;  %v709_v39 = vrot.slane %v628_v35, 6 }
  0x96   : > { %v629_v36 = vsel %vm6551_vm3, %v617_v19, 0.0  ;;  %vm4200_vm6 = vcmp.eq.s32.totalorder %v680_v60, 1  ;;  %v3631_v43 = vunpack.i.h.bf16 %v3629_v22  ;;  %v3630_v44 = vunpack.i.l.bf16 %v3629_v22 }
  0x97   : > { %v710_v41 = vrot.slane %v629_v36, 6  ;;  %v3626_v47 = vunpack.i.h.bf16 %v3624_v23  ;;  %v3625_v48 = vunpack.i.l.bf16 %v3624_v23  ;;  %v715_v49 = vrot.slane %v647_v29, 4 }
  0x98   : > { %v716_v51 = vrot.slane %v648_v34, 4  ;;  %v3634_v53 = vpop.permute.xlu0 %3633  ;;  %v3639_v54 = vpop.permute.xlu1 %3638  ;;  %v734_v56 = vsel %vm6452_vm0, %v4024_v5, %v709_v39  ;;  %vm6554_vm3 = vcmp.lt.s32.totalorder %v4074_v18, 1  ;;  %vm6556_vm12 = vcmp.lt.s32.totalorder %v4074_v18, 17 }
  0x99   : > { %v735_v55 = vsel %vm6452_vm0, %v4033_v7, %v710_v41  ;;  %v597_v57 = vsel %vm6554_vm3, %v3630_v44, %v3631_v43  ;;  %vm6555_vm11 = vmmov %vm6554_vm3  ;;  %v538_v60 = vsel %vm6556_vm12, %v3625_v48, %v3626_v47  ;;  %v3636_v63 = vunpack.i.h.bf16 %v3634_v53 }
  0x9a   : > { %v598_v58 = vsel %vm6555_vm11, %v3631_v43, %v3630_v44  ;;  %vm6557_vm14 = vmmov %vm6556_vm12  ;;  %v553_v7 = vsel %vm4163_vm13, %v538_v60, 0.0  ;;  %v3635_v5 = vunpack.i.l.bf16 %v3634_v53  ;;  %v3641_v0 = vunpack.i.h.bf16 %v3639_v54 }
  0x9b   : > { %v539_v61 = vsel %vm6557_vm14, %v3626_v47, %v3625_v48  ;;  %v3640_v10 = vunpack.i.l.bf16 %v3639_v54  ;;  %v610_v11 = vsel %vm608_vm4, %v597_v57, 0.0  ;;  %v727_v15 = vsel %vm6452_vm0, %v553_v7, %v692_v38 }
  0x9c   : > { %v552_v62 = vsel %vm4144_vm8, %v539_v61, 0.0  ;;  %vm6558_vm11 = vcmp.lt.s32.totalorder %v4074_v18, 112  ;;  %v704_v19 = vrot.slane %v610_v11, 2  ;;  %v730_v22 = vsel %vm6457_vm1, %v727_v15, %v698_v6 }
  0x9d   : > { %v654_v16 = vsel %vm6558_vm11, %v3635_v5, %v3636_v63  ;;  %vm6559_vm12 = vmmov %vm6558_vm11  ;;  %vm6560_vm14 = vcmp.lt.s32.totalorder %v4074_v18, 111  ;;  %vm6561_vm3 = vcmp.eq.s32.totalorder %v4133_v45, 1  ;;  %v737_v34 = vsel %vm6457_vm1, %v735_v55, %v716_v51 }
  0x9e   : > { %v655_v17 = vsel %vm6559_vm12, %v3636_v63, %v3635_v5  ;;  %v674_v23 = vsel %vm6560_vm14, %v3641_v0, %v3640_v10  ;;  %v609_v35 = vsel %vm607_vm15, %v598_v58, 0.0  ;;  %v733_v39 = vsel %vm6451_vm5, %v730_v22, %v704_v19  ;;  %vm6563_vm12 = vmmov %vm6560_vm14 }
  0x9f   : > { %v667_v29 = vsel %vm6561_vm3, %v655_v17, 0.0  ;;  %v688_v36 = vsel %vm4179_vm2, %v674_v23, 0.0  ;;  %vm6562_vm11 = vcmp.eq.s32.totalorder %v4149_v52, 1  ;;  %v703_v41 = vrot.slane %v609_v35, 2  ;;  %v880_v17 = vld [vmem:[%s6430_s6] sm:$0xff] }
  0xa0   : > { %v722_v38 = vrot.slane %v667_v29, 2  ;;  %v666_v6 = vsel %vm6562_vm11, %v654_v16, 0.0  ;;  %v726_v44 = vsel %vm6452_vm0, %v552_v62, %v691_v37  ;;  %v736_v47 = vsel %vm6457_vm1, %v734_v56, %v715_v49  ;;  %v744_v49 = vld [vmem:[%s6427_s3] sm:$0xf] }
  0xa1   : > { %v721_v43 = vrot.slane %v666_v6, 2  ;;  %v729_v51 = vsel %vm6457_vm1, %v726_v44, %v697_v1  ;;  %v743_v53 = vpack.c.bf16 %v688_v36, %v688_v36  ;;  %v673_v54 = vsel %vm6563_vm12, %v3640_v10, %v3641_v0 }
  0xa2   : > { %v739_v48 = vsel %vm6451_vm5, %v737_v34, %v722_v38  ;;  %v732_v57 = vsel %vm6451_vm5, %v729_v51, %v703_v41  ;;  %v687_v60 = vsel %vm4200_vm6, %v673_v54, 0.0  ;;  %vm6453_vm14 = vcmask 1040384  }
  0xa3   : > { %v741_v55 = vpack.c.bf16 %v739_v48, %v733_v39  ;;  %v738_v58 = vsel %vm6451_vm5, %v736_v47, %v721_v43  ;;  %v742_v37 = vpack.c.bf16 %v687_v60, %v687_v60  ;;  %vm751_vm3 = vcmask 146432   ;;  %vm6456_vm5 = vmpackc.low %vm4112_vm10, %vm4163_vm13 }
  0xa4   : > { %v740_v61 = vpack.c.bf16 %v738_v58, %v732_v57  ;;  %vm6564_vm11 = vcmp.lt.s32.totalorder %v4074_v18, 17  ;;  %v6579_v40 = vmov 0  ;;  %v4466_v42 = vrot.slane %v4035_v8, %v4087_v25 }
  0xa5   : > { %762 = vmatprep.subr.bf16.mxu0 %v741_v55  ;;  %v757_v1 = vsel %vm6453_vm14, %v742_v37, 0  ;;  %vm6565_vm12 = vmmov %vm6564_vm11 }
  0xa6   : > { %763 = vmatpush1.bf16.msra.mxu0 %v740_v61 }
  0xa7   : > { %3504 = vmatprep.subr.msk.bf16.mxu0 %vm6453_vm14, %v743_v53 }
  0xa9   : > { %v749_v56 = vpop.permute.xlu0 %748 }
  0xaa   : > { %765 = vmatpush1.bf16.msra.mxu0 %v757_v1 }
  0xad   : > { %3505 = vmatmul.mubr.msk.bf16.vlgmr.msra.gmra.mrb[0].mxu0 %vm751_vm3, %v744_v49  ;;  %vm6566_vm3 = vcmp.lt.s32.totalorder %v4074_v18, 16 }
  0xae   : > { %1065 = vmatprep.mubr.bf16.mxu0 %v3907_v3  ;;  %vm6567_vm0 = vmmov %vm6566_vm3 }
 0x180   : > { %v796_v62 = vpop.f32.mrb[0].mxu0 }
 0x181   : > { %v4256_v7 = vadd.f32 %v796_v62, %v749_v56  ;;  %v798_v63 = vpop.f32.mrb[1].mxu0 }
 0x182   : > { %v799_v5 = vadd.f32 %v798_v63, %v749_v56  ;;  %v800_v0 = vpop.f32.mrb[2].mxu0 }
 0x183   : > { %v803_v10 = vmax.f32 %v4256_v7, 0.0  ;;  %v801_v11 = vpop.f32.mrb[3].mxu0 }
 0x184   : > { %v804_v15 = vmax.f32 %v799_v5, 0.0 }
 0x186   : > { %v3653_v16 = vpack.i.bf16 %v804_v15, %v803_v10 }
 0x188   : > { %3654 = vrot.lane.b32.xlu0 %v3653_v16, %s3908_s25  ;;  %3644 = vrot.lane.b32.xlu1 %v3653_v16, %s3913_s30 }
 0x18c   : > { %3664 = vrot.lane.b32.xlu0 %v3653_v16, %s3911_s28  ;;  %3649 = vrot.lane.b32.xlu1 %v3653_v16, %s3909_s26 }
 0x190   : > { %3674 = vrot.lane.b32.xlu0 %v3653_v16, %s3914_s15  ;;  %3659 = vrot.lane.b32.xlu1 %v3653_v16, %s3912_s29 }
 0x194   : > { %883 = vperm.xlu0 %3642, %v880_v17   ;;  %3669 = vrot.lane.b32.xlu1 %v3653_v16, %s3910_s27 }
 0x198   : > { %3679 = vrot.lane.b32.xlu1 %v3653_v16, %s3915_s16 }
 0x1fa   : > { %v3655_v19 = vpop.permute.xlu0 %3654  ;;  %v3645_v22 = vpop.permute.xlu1 %3644 }
 0x1fb   : > { %v3647_v23 = vunpack.i.h.bf16 %v3645_v22  ;;  %v3646_v29 = vunpack.i.l.bf16 %v3645_v22  ;;  %v3657_v39 = vunpack.i.h.bf16 %v3655_v19  ;;  %v3656_v6 = vunpack.i.l.bf16 %v3655_v19 }
 0x1fd   : > { %v809_v41 = vsel %vm6564_vm11, %v3646_v29, %v3647_v23  ;;  %v810_v43 = vsel %vm6565_vm12, %v3647_v23, %v3646_v29  ;;  %vm6454_vm11 = vmpackc.low %vm4108_vm9, %vm4144_vm8  ;;  %vm6568_vm12 = vcmp.lt.s32.totalorder %v4074_v18, 15 }
 0x1fe   : > { %v3665_v34 = vpop.permute.xlu0 %3664  ;;  %v3650_v35 = vpop.permute.xlu1 %3649  ;;  %v825_v60 = vsel %vm6568_vm12, %v3656_v6, %v3657_v39 }
 0x1ff   : > { %v3652_v36 = vunpack.i.h.bf16 %v3650_v35  ;;  %v3651_v38 = vunpack.i.l.bf16 %v3650_v35  ;;  %v3667_v44 = vunpack.i.h.bf16 %v3665_v34  ;;  %v3666_v47 = vunpack.i.l.bf16 %v3665_v34 }
 0x201   : > { %v817_v48 = vsel %vm6566_vm3, %v3651_v38, %v3652_v36  ;;  %v818_v51 = vsel %vm6567_vm0, %v3652_v36, %v3651_v38  ;;  %vm6569_vm0 = vmmov %vm6568_vm12  ;;  %v842_v1 = vsel %vm6455_vm7, %v3667_v44, %v3666_v47  ;;  %vm6570_vm3 = vcmp.lt.s32.totalorder %v4074_v18, 1 }
 0x202   : > { %v3660_v53 = vpop.permute.xlu1 %3659  ;;  %v3507_v54 = vpack.c.bf16 %v817_v48, %v809_v41  ;;  %v3510_v55 = vpack.c.bf16 %v818_v51, %v810_v43  ;;  %v3675_v61 = vpop.permute.xlu0 %3674  ;;  %v826_v37 = vsel %vm6569_vm0, %v3657_v39, %v3656_v6  ;;  %vm6571_vm14 = vmmov %vm6570_vm3  ;;  %vm6572_vm12 = vcmp.eq.s32.totalorder %v4079_v21, 1 }
 0x203   : > { %v3662_v57 = vunpack.i.h.bf16 %v3660_v53  ;;  %v3661_v58 = vunpack.i.l.bf16 %v3660_v53  ;;  %vm4312_vm0 = vmpackc.low %vm608_vm4, %vm6572_vm12  ;;  %v3677_v16 = vunpack.i.h.bf16 %v3675_v61  ;;  %v3676_v17 = vunpack.i.l.bf16 %v3675_v61 }
 0x204   : > { %3508 = vmatprep.subr.msk.bf16.mxu1 %vm6456_vm5, %v3507_v54  ;;  %vm6578_vm4 = vcmp.eq.s32.totalorder %v4116_v33, 1  ;;  %v3519_v22 = vpack.c.bf16 %v842_v1, %v804_v15  ;;  %vm6587_vm5 = vcmp.eq.s32.totalorder %v4133_v45, 1  ;;  %v6596_v39 = vmov 0 }
 0x205   : > { %v833_v49 = vsel %vm6570_vm3, %v3661_v58, %v3662_v57  ;;  %v834_v56 = vsel %vm6571_vm14, %v3662_v57, %v3661_v58  ;;  %3511 = vmatpush1.bf16.msk.msra.mxu1 %vm6454_vm11, %v3510_v55  ;;  %vm6575_vm3 = vcmp.eq.s32.totalorder %v4077_v20, 1  ;;  %vm3916_vm11 = vmmov 1  }
 0x206   : > { %v3513_v63 = vpack.c.bf16 %v833_v49, %v825_v60  ;;  %v3516_v5 = vpack.c.bf16 %v834_v56, %v826_v37  ;;  %v3670_v0 = vpop.permute.xlu1 %3669  ;;  %vm4320_vm14 = vmpackc.low %vm607_vm15, %vm6575_vm3  ;;  %v841_v20 = vsel %vm6455_vm7, %v3666_v47, %v3667_v44  ;;  %vm6581_vm15 = vcmp.lt.s32.totalorder %v4074_v18, 113  ;;  %v1014_v37 = vld [vmem:[#allocation2] sm:$0x1] }
 0x207   : > { %v3672_v21 = vunpack.i.h.bf16 %v3670_v0  ;;  %v3671_v19 = vunpack.i.l.bf16 %v3670_v0  ;;  %vm4326_vm12 = vmpackc.low %vm6578_vm4, %vm3916_vm11  ;;  %vm6582_vm3 = vcmp.eq.s32.totalorder %v4095_v28, 1  ;;  %v3522_v15 = vpack.c.bf16 %v841_v20, %v803_v10 }
 0x208   : > { %v6580_v40 = vsel %vm4326_vm12, 4294967295, %v6579_v40  ;;  %3514 = vmatprep.subr.msk.bf16.mxu1 %vm4312_vm0, %v3513_v63  ;;  %vm4342_vm4 = vmpackc.low %vm6582_vm3, %vm3916_vm11  ;;  %vm6585_vm7 = vcmp.lt.s32.totalorder %v4074_v18, 112  ;;  %vm6590_vm11 = vcmp.lt.s32.totalorder %v4074_v18, 113  ;;  %vm6591_vm3 = vcmp.lt.s32.totalorder %v4074_v18, 111 }
 0x209   : > { %v850_v46 = vsel %vm6581_vm15, %v3672_v21, %v3671_v19  ;;  %3517 = vmatpush1.bf16.msk.msra.mxu1 %vm4320_vm14, %v3516_v5  ;;  %v858_v29 = vsel %vm6585_vm7, %v3677_v16, %v3676_v17  ;;  %vm6586_vm15 = vcmp.eq.s32.totalorder %v4091_v27, 1  ;;  %v849_v28 = vsel %vm6590_vm11, %v3671_v19, %v3672_v21  ;;  %vm6592_vm7 = vmmov %vm6591_vm3 }
 0x20a   : > { %v3680_v23 = vpop.permute.xlu1 %3679  ;;  %3520 = vmatprep.subr.msk.bf16.mxu1 %vm4326_vm12, %v3519_v22  ;;  %vm4354_vm1 = vmpackc.low %vm6587_vm5, %vm6586_vm15  ;;  %v3525_v38 = vpack.c.bf16 %v858_v29, %v850_v46  ;;  %vm6593_vm12 = vcmp.lt.s32.totalorder %v4074_v18, 112  ;;  %vm6594_vm5 = vcmp.eq.s32.totalorder %v4089_v26, 1  ;;  %vm6595_vm15 = vcmp.eq.s32.totalorder %v4149_v52, 1  ;;  %v879_v26 = vld [vmem:[%s6429_s5] sm:$0xf] }
 0x20b   : > { %v3682_v34 = vunpack.i.h.bf16 %v3680_v23  ;;  %v3681_v35 = vunpack.i.l.bf16 %v3680_v23  ;;  %v857_v27 = vsel %vm6593_vm12, %v3676_v17, %v3677_v16  ;;  %vm4376_vm11 = vmpackc.low %vm6595_vm15, %vm6594_vm5  ;;  %vm6598_vm12 = vcmask 1043456  }
 0x20c   : > { %v6597_v39 = vsel %vm4376_vm11, 4294967295, %v6596_v39  ;;  %v3528_v41 = vpack.c.bf16 %v857_v27, %v849_v28  ;;  %vm6600_vm5 = vcmp.lt.s32.totalorder %v4074_v18, 16  ;;  %v3729_v36 = vpack.i.bf16 %v4038_v9, %v4466_v42 }
 0x20d   : > { %v866_v7 = vsel %vm6591_vm3, %v3682_v34, %v3681_v35  ;;  %3523 = vmatpush1.bf16.msk.msra.mxu1 %vm4342_vm4, %v3522_v15  ;;  %v865_v10 = vsel %vm6592_vm7, %v3681_v35, %v3682_v34  ;;  %vm6599_vm3 = vmmov %vm6598_vm12  ;;  %vm6459_vm7 = vcmask 588800  }
 0x20e   : > { %v868_v45 = vsel %vm4179_vm2, %v866_v7, 0.0  ;;  %3526 = vmatprep.subr.msk.bf16.mxu1 %vm4354_vm1, %v3525_v38  ;;  %v867_v6 = vsel %vm4200_vm6, %v865_v10, 0.0  ;;  %vm6601_vm15 = vmmov %vm6600_vm5 }
 0x20f   : > { %v878_v43 = vpack.c.bf16 %v868_v45, %v868_v45  ;;  %v877_v44 = vpack.c.bf16 %v867_v6, %v867_v6 }
 0x211   : > { %3529 = vmatpush1.bf16.msk.msra.mxu1 %vm4376_vm11, %v3528_v41  ;;  %v891_v47 = vsel %vm6599_vm3, %v877_v44, 0  ;;  %vm6609_vm11 = vmpackc.low %vm4108_vm9, %vm4144_vm8  ;;  %vm6612_vm8 = vcmp.lt.s32.totalorder %v4074_v18, 113 }
 0x212   : > { %3530 = vmatprep.subr.msk.bf16.mxu1 %vm6598_vm12, %v878_v43  ;;  %vm6602_vm12 = vcmp.lt.s32.totalorder %v4074_v18, 17  ;;  %vm6613_vm9 = vmmov %vm6612_vm8 }
 0x213   : > { %v884_v52 = vpop.permute.xlu0 %883  ;;  %vm6603_vm3 = vmmov %vm6602_vm12 }
 0x215   : > { %905 = vmatpush1.bf16.msra.mxu1 %v891_v47 }
 0x218   : > { %3531 = vmatmul.mubr.msk.bf16.vlgmr.msra.gmra.mrb[0].mxu1 %vm6459_vm7, %v879_v26 }
 0x219   : > { %1410 = vmatprep.mubr.bf16.mxu1 %v3907_v3 }
 0x2eb   : > { %v930_v48 = vpop.f32.mrb[0].mxu1 }
 0x2ec   : > { %v931_v51 = vadd.f32 %v930_v48, %v884_v52  ;;  %v932_v53 = vpop.f32.mrb[1].mxu1 }
 0x2ed   : > { %v933_v54 = vadd.f32 %v932_v53, %v884_v52  ;;  %v934_v55 = vpop.f32.mrb[2].mxu1 }
 0x2ee   : > { %v937_v57 = vmax.f32 %v931_v51, 0.0  ;;  %v935_v58 = vpop.f32.mrb[3].mxu1 }
 0x2ef   : > { %v938_v60 = vmax.f32 %v933_v54, 0.0 }
 0x2f1   : > { %v3688_v61 = vpack.i.bf16 %v938_v60, %v937_v57 }
 0x2f3   : > { %3689 = vrot.lane.b32.xlu0 %v3688_v61, %s3909_s26  ;;  %3684 = vrot.lane.b32.xlu1 %v3688_v61, %s3913_s30 }
 0x2f7   : > { %3699 = vrot.lane.b32.xlu0 %v3688_v61, %s3912_s29  ;;  %3694 = vrot.lane.b32.xlu1 %v3688_v61, %s3908_s25 }
 0x2fb   : > { %3709 = vrot.lane.b32.xlu0 %v3688_v61, %s3910_s27  ;;  %3704 = vrot.lane.b32.xlu1 %v3688_v61, %s3911_s28 }
 0x2ff   : > { %3719 = vrot.lane.b32.xlu0 %v3688_v61, %s3915_s16  ;;  %3714 = vrot.lane.b32.xlu1 %v3688_v61, %s3914_s15 }
 0x303   : > { %1017 = vperm.xlu1 %3723, %v1014_v37   ;;  %3730 = vrot.lane.b32.xlu0 %v3729_v36, %s3908_s25 }
 0x307   : > { %3725 = vrot.lane.b32.xlu1 %v3729_v36, %s3909_s26  ;;  %3735 = vrot.lane.b32.xlu0 %v3729_v36, %s3913_s30 }
 0x30b   : > { %3740 = vrot.lane.b32.xlu1 %v3729_v36, %s3912_s29 }
 0x365   : > { %v3690_v1 = vpop.permute.xlu0 %3689  ;;  %v3685_v49 = vpop.permute.xlu1 %3684 }
 0x366   : > { %v3692_v56 = vunpack.i.h.bf16 %v3690_v1  ;;  %v3691_v63 = vunpack.i.l.bf16 %v3690_v1  ;;  %v3687_v5 = vunpack.i.h.bf16 %v3685_v49  ;;  %v3686_v0 = vunpack.i.l.bf16 %v3685_v49 }
 0x368   : > { %v951_v16 = vsel %vm6600_vm5, %v3691_v63, %v3692_v56  ;;  %v952_v17 = vsel %vm6601_vm15, %v3692_v56, %v3691_v63  ;;  %v943_v21 = vsel %vm6602_vm12, %v3686_v0, %v3687_v5  ;;  %v944_v19 = vsel %vm6603_vm3, %v3687_v5, %v3686_v0  ;;  %vm6604_vm5 = vmpackc.low %vm4112_vm10, %vm4163_vm13 }
 0x369   : > { %v3533_v20 = vpack.c.bf16 %v951_v16, %v943_v21  ;;  %v3536_v22 = vpack.c.bf16 %v952_v17, %v944_v19  ;;  %v3700_v46 = vpop.permute.xlu0 %3699  ;;  %v3695_v23 = vpop.permute.xlu1 %3694  ;;  %vm6605_vm15 = vcmp.lt.s32.totalorder %v4074_v18, 1  ;;  %vm6607_vm3 = vcmp.lt.s32.totalorder %v4074_v18, 15 }
 0x36a   : > { %v3702_v15 = vunpack.i.h.bf16 %v3700_v46  ;;  %v3701_v29 = vunpack.i.l.bf16 %v3700_v46  ;;  %v3697_v34 = vunpack.i.h.bf16 %v3695_v23  ;;  %v3696_v35 = vunpack.i.l.bf16 %v3695_v23  ;;  %vm6606_vm12 = vmmov %vm6605_vm15 }
 0x36b   : > { %3534 = vmatprep.subr.msk.bf16.mxu0 %vm6604_vm5, %v3533_v20  ;;  %vm6608_vm7 = vmmov %vm6607_vm3  ;;  %vm6610_vm10 = vcmp.lt.s32.totalorder %v4074_v18, 127  ;;  %v3917_v20 = vmov 1966171168  }
 0x36c   : > { %v967_v28 = vsel %vm6605_vm15, %v3701_v29, %v3702_v15  ;;  %v968_v38 = vsel %vm6606_vm12, %v3702_v15, %v3701_v29  ;;  %v959_v7 = vsel %vm6607_vm3, %v3696_v35, %v3697_v34  ;;  %v960_v10 = vsel %vm6608_vm7, %v3697_v34, %v3696_v35  ;;  %3537 = vmatpush1.bf16.msk.msra.mxu0 %vm6609_vm11, %v3536_v22  ;;  %vm6611_vm13 = vmmov %vm6610_vm10 }
 0x36d   : > { %v3539_v32 = vpack.c.bf16 %v967_v28, %v959_v7  ;;  %v3542_v59 = vpack.c.bf16 %v968_v38, %v960_v10  ;;  %v3710_v27 = vpop.permute.xlu0 %3709  ;;  %v3705_v45 = vpop.permute.xlu1 %3704  ;;  %vm6615_vm11 = vcmp.lt.s32.totalorder %v4074_v18, 111  ;;  %vm6617_vm7 = vcmp.lt.s32.totalorder %v4074_v18, 112 }
 0x36e   : > { %v3707_v6 = vunpack.i.h.bf16 %v3705_v45  ;;  %v3706_v41 = vunpack.i.l.bf16 %v3705_v45  ;;  %v3712_v43 = vunpack.i.h.bf16 %v3710_v27  ;;  %v3711_v44 = vunpack.i.l.bf16 %v3710_v27  ;;  %vm6618_vm5 = vmmov %vm6617_vm7 }
 0x36f   : > { %3540 = vmatprep.subr.msk.bf16.mxu0 %vm4312_vm0, %v3539_v32  ;;  %vm6614_vm0 = vnez %v6580_v40  ;;  %vm6619_vm15 = vnez %v6597_v39  ;;  %vm6620_vm12 = vcmask 1043456   ;;  %v1080_v22 = vunpack.c.l.s4 %v3917_v20 }
 0x370   : > { %v975_v47 = vsel %vm6610_vm10, %v3706_v41, %v3707_v6  ;;  %v976_v31 = vsel %vm6611_vm13, %v3707_v6, %v3706_v41  ;;  %3543 = vmatpush1.bf16.msk.msra.mxu0 %vm4320_vm14, %v3542_v59  ;;  %v983_v62 = vsel %vm6612_vm8, %v3711_v44, %v3712_v43  ;;  %v984_v58 = vsel %vm6613_vm9, %v3712_v43, %v3711_v44  ;;  %vm6616_vm14 = vmmov %vm6615_vm11 }
 0x371   : > { %v3545_v50 = vpack.c.bf16 %v976_v31, %v938_v60  ;;  %v3548_v26 = vpack.c.bf16 %v975_v47, %v937_v57  ;;  %v3720_v52 = vpop.permute.xlu0 %3719  ;;  %v3715_v48 = vpop.permute.xlu1 %3714  ;;  %vm6621_vm3 = vmmov %vm6620_vm12  ;;  %v1081_v46 = vunpack.c.0.s8 %v1080_v22  ;;  %vm6627_vm13 = vcmp.lt.s32.totalorder %v4074_v18, 17 }
 0x372   : > { %v3722_v51 = vunpack.i.h.bf16 %v3720_v52  ;;  %v3721_v53 = vunpack.i.l.bf16 %v3720_v52  ;;  %v3717_v54 = vunpack.i.h.bf16 %v3715_v48  ;;  %v3716_v55 = vunpack.i.l.bf16 %v3715_v48 }
 0x373   : > { %3546 = vmatprep.subr.msk.bf16.mxu0 %vm6614_vm0, %v3545_v50  ;;  %v1084_v15 = vsub.s32 %v1081_v46, %v4018_v4  ;;  %v4523_v50 = vld [vmem:[%s6426_s2 + $0x18] sm:$0xff]  ;;  %vm6628_vm8 = vcmp.lt.s32.totalorder %v4074_v18, 1  ;;  %vm6629_vm9 = vcmask 1040384   ;;  %vm6630_vm0 = vcmask 1041408  }
 0x374   : > { %v999_v11 = vsel %vm6615_vm11, %v3721_v53, %v3722_v51  ;;  %v1000_v57 = vsel %vm6616_vm14, %v3722_v51, %v3721_v53  ;;  %v991_v60 = vsel %vm6617_vm7, %v3716_v55, %v3717_v54  ;;  %v992_v61 = vsel %vm6618_vm5, %v3717_v54, %v3716_v55  ;;  %3549 = vmatpush1.bf16.msk.msra.mxu0 %vm4342_vm4, %v3548_v26  ;;  %vm6631_vm5 = vmmov %vm6621_vm3 }
 0x375   : > { %v1002_v37 = vsel %vm4179_vm2, %v1000_v57, 0.0  ;;  %v3551_v40 = vpack.c.bf16 %v992_v61, %v984_v58  ;;  %v3554_v1 = vpack.c.bf16 %v991_v60, %v983_v62  ;;  %v1001_v49 = vsel %vm4200_vm6, %v999_v11, 0.0  ;;  %v4508_v10 = vpop.permute.xlu0 %3730 }
 0x376   : > { %v1012_v56 = vpack.c.bf16 %v1002_v37, %v1002_v37  ;;  %v1011_v63 = vpack.c.bf16 %v1001_v49, %v1001_v49  ;;  %vm6622_vm2 = vcmask 588800   ;;  %v3733_v6 = vunpack.i.h.bf16 %v4508_v10 }
 0x377   : > { %3552 = vmatprep.subr.msk.bf16.mxu0 %vm4354_vm1, %v3551_v40  ;;  %vm1096_vm1 = vcmp.lt.s32.totalorder %v535_v2, 256  ;;  %v1354_v2 = vld [vmem:[%s6434_s10] sm:$0xff]  ;;  %v3732_v41 = vunpack.i.l.bf16 %v4508_v10  ;;  %vm6625_vm6 = vcmp.lt.s32.totalorder %v4074_v18, 16  ;;  %vm6626_vm4 = vcmp.lt.s32.totalorder %v4074_v18, 15 }
 0x378   : > { %3555 = vmatpush1.bf16.msk.msra.mxu0 %vm6619_vm15, %v3554_v1  ;;  %v1028_v33 = vsel %vm6621_vm3, %v1011_v63, 0  ;;  %vm513_vm10 = vcmp.gt.f32.partialorder %v4523_v50, 0.5  ;;  %vm1326_vm11 = vcmask 1042432   ;;  %v1313_v40 = vrot.slane %v4038_v9, 4  ;;  %v4556_v1 = vld [vmem:[%s6426_s2 + $0x10] sm:$0xff] }
 0x379   : > { %3556 = vmatprep.subr.msk.bf16.mxu0 %vm6620_vm12, %v1012_v56  ;;  %v4510_v45 = vpop.permute.xlu0 %3735  ;;  %v1162_v48 = vsel %vm6626_vm4, %v3732_v41, %v3733_v6  ;;  %vm1335_vm14 = vcmask 1044480   ;;  %vm512_vm7 = vcmp.gt.f32.partialorder %v4556_v1, 0.5  ;;  %vm6632_vm15 = vcmp.lt.s32.totalorder %v4074_v18, 127  ;;  %vm6633_vm12 = vmmov %vm6621_vm3 }
 0x37a   : > { %v3738_v47 = vunpack.i.h.bf16 %v4510_v45  ;;  %v3737_v31 = vunpack.i.l.bf16 %v4510_v45  ;;  %v1173_v54 = vrot.slane %v1162_v48, 6  ;;  %vm6634_vm3 = vmmov %vm6625_vm6 }
 0x37c   : > { %1042 = vmatpush1.bf16.msra.mxu0 %v1028_v33  ;;  %v1118_v53 = vsel %vm6627_vm13, %v3737_v31, %v3738_v47  ;;  %v1181_v57 = vsel %vm513_vm10, %v1173_v54, 0.0  ;;  %vm6638_vm13 = vmmov %vm6626_vm4 }
 0x37d   : > { %v1125_v58 = vsel %vm513_vm10, %v1118_v53, 0.0 }
 0x37f   : > { %3557 = vmatmul.mubr.msk.bf16.vlgmr.msra.gmra.mrb[4].mxu0 %vm6622_vm2, %v1013_v14  ;;  %vm6635_vm2 = vmmov %vm6634_vm3 }
 0x380   : > { %1451 = vmatprep.mubr.bf16.mxu0 %v3907_v3 }
 0x382   : > { %v1018_v39 = vpop.permute.xlu1 %1017 }
 0x383   : > { %v1023_v5 = vrot.slane %v1018_v39, %v4087_v25 }
 0x386   : > { %v3726_v32 = vpop.permute.xlu1 %3725 }
 0x387   : > { %v3728_v59 = vunpack.i.h.bf16 %v3726_v32  ;;  %v3727_v27 = vunpack.i.l.bf16 %v3726_v32 }
 0x389   : > { %v1134_v44 = vsel %vm6625_vm6, %v3727_v27, %v3728_v59  ;;  %vm6637_vm6 = vcmp.lt.s32.totalorder %v4074_v18, 113 }
 0x38a   : > { %v4514_v43 = vpop.permute.xlu1 %3740  ;;  %v1145_v51 = vrot.slane %v1134_v44, 7 }
 0x38b   : > { %v3743_v26 = vunpack.i.h.bf16 %v4514_v43  ;;  %v3742_v52 = vunpack.i.l.bf16 %v4514_v43 }
 0x38c   : > { %v1153_v62 = vsel %vm513_vm10, %v1145_v51, 0.0 }
 0x38d   : > { %v1190_v55 = vsel %vm6628_vm8, %v3742_v52, %v3743_v26  ;;  %v1321_v60 = vsel %vm6629_vm9, %v1125_v58, %v1153_v62  ;;  %vm6639_vm8 = vmmov %vm6626_vm4  ;;  %vm6640_vm9 = vcmp.gt.f32.partialorder %v4056_v12, 0.5 }
 0x38e   : > { %v1201_v11 = vrot.slane %v1190_v55, 5  ;;  %v1325_v61 = vsel %vm6630_vm0, %v1321_v60, %v1181_v57  ;;  %vm6641_vm0 = vcmp.gt.f32.partialorder %v4061_v13, 0.5 }
 0x390   : > { %v1209_v37 = vsel %vm513_vm10, %v1201_v11, 0.0 }
 0x391   : > { %v1330_v49 = vsel %vm1326_vm11, %v1325_v61, %v1209_v37 }
 0x452   : > { %v1067_v0 = vpop.f32.mrb[4].mxu0 }
 0x453   : > { %v1068_v16 = vadd.f32 %v1067_v0, %v1023_v5  ;;  %v1069_v17 = vpop.f32.mrb[5].mxu0 }
 0x454   : > { %v1070_v21 = vadd.f32 %v1069_v17, %v1023_v5  ;;  %v1071_v8 = vpop.f32.mrb[6].mxu0  ;;  %v1334_v5 = vsel %vm6631_vm5, %v1330_v49, %v1313_v40  ;;  %v3918_v17 = vmov 65535   ;;  %vm6642_vm5 = vcmp.lt.s32.totalorder %v4074_v18, 17 }
 0x455   : > { %3879 = vtanh.f32 %v1068_v16  ;;  %v1072_v19 = vpop.f32.mrb[7].mxu0 }
 0x456   : > { %3881 = vtanh.f32 %v1070_v21  ;;  %v1364_v21 = vsel %vm6633_vm12, 4294967295, %v3918_v17  ;;  %vm6644_vm12 = vmmov %vm6642_vm5 }
 0x457   : > { %v4589_v44 = vsel %vm1335_vm14, %v1364_v21, 0 }
 0x45f   : > { %v4475_v23 = vpop.eup %3879 }
 0x460   : > { %6623 = vst [vmem:[#allocation7_spill] sm:$0xff] %v4475_v23  ;;  %v4478_v29 = vpop.eup %3881  ;;  %v3744_v34 = vpack.i.bf16 %v4038_v9, %v4475_v23 }
 0x461   : > { %6624 = vst [vmem:[#allocation8_spill] sm:$0xff] %v4478_v29  ;;  %v1078_v35 = vcombine.low %v4475_v23, %v4478_v29  ;;  %v3754_v28 = vpack.i.bf16 %v4478_v29, %v4475_v23  ;;  %v3779_v7 = vpack.i.bf16 %v4466_v42, %v4478_v29  ;;  %v1311_v16 = vrot.slane %v4478_v29, 4 }
 0x462   : > { %3745 = vrot.lane.b32.xlu1 %v3744_v34, %s3911_s28 }
 0x463   : > { %v1085_v38 = vrot.slane %v1078_v35, %v1084_v15  ;;  %3755 = vrot.lane.b32.xlu0 %v3754_v28, %s3909_s26 }
 0x465   : > { %v1092_v4 = vrot.slane %v1085_v38, %v1084_v15  ;;  %v1310_v38 = vrot.slane %v4475_v23, 4 }
 0x466   : > { %3750 = vrot.lane.b32.xlu1 %v3744_v34, %s3910_s27 }
 0x467   : > { %1098 = vst.msk [vmem:[%s496_s24] sm:$0x3] %vm1096_vm1, %v1092_v4  ;;  %3760 = vrot.lane.b32.xlu0 %v3754_v28, %s3908_s25  ;;  %vm6636_vm1 = vmmov %vm6635_vm2  ;;  %s500_s24 = scalar_lea.vmem %s6437_s14, %s7064_s18 }
 0x46a   : > { %3765 = vrot.lane.b32.xlu1 %v3754_v28, %s3913_s30 }
 0x46b   : > { %3780 = vrot.lane.b32.xlu0 %v3779_v7, %s3911_s28 }
 0x46e   : > { %3770 = vrot.lane.b32.xlu1 %v3754_v28, %s3912_s29 }
 0x46f   : > { %3785 = vrot.lane.b32.xlu0 %v3779_v7, %s3910_s27 }
 0x472   : > { %3775 = vrot.lane.b32.xlu1 %v3744_v34, %s3914_s15 }
 0x473   : > { %3790 = vrot.lane.b32.xlu0 %v3779_v7, %s3914_s15 }
 0x476   : > { %3800 = vrot.lane.b32.xlu1 %v3744_v34, %s3915_s16 }
 0x477   : > { %3795 = vrot.lane.b32.xlu0 %v3779_v7, %s3915_s16 }
 0x47b   : > { %1357 = vperm.xlu0 %3642, %v1354_v2  }
 0x4d4   : > { %v4559_v56 = vpop.permute.xlu1 %3745 }
 0x4d5   : > { %v3748_v63 = vunpack.i.h.bf16 %v4559_v56  ;;  %v3747_v33 = vunpack.i.l.bf16 %v4559_v56  ;;  %v3756_v14 = vpop.permute.xlu0 %3755 }
 0x4d6   : > { %v3758_v36 = vunpack.i.h.bf16 %v3756_v14  ;;  %v3757_v39 = vunpack.i.l.bf16 %v3756_v14 }
 0x4d7   : > { %v1221_v0 = vsel %vm6632_vm15, %v3748_v63, %v3747_v33  ;;  %vm6643_vm15 = vmmov %vm6642_vm5 }
 0x4d8   : > { %v1229_v8 = vrot.slane %v1221_v0, 3  ;;  %v1135_v19 = vsel %vm6634_vm3, %v3758_v36, %v3727_v27  ;;  %v1136_v20 = vsel %vm6635_vm2, %v3757_v39, %v3758_v36  ;;  %v1137_v22 = vsel %vm6636_vm1, %v3728_v59, %v3757_v39  ;;  %v4577_v46 = vpop.permute.xlu1 %3750  ;;  %vm6645_vm3 = vmmov %vm6640_vm9 }
 0x4d9   : > { %v1144_v15 = vrot.slane %v1135_v19, 7  ;;  %v1142_v34 = vrot.slane %v1137_v22, 7  ;;  %v3753_v35 = vunpack.i.h.bf16 %v4577_v46  ;;  %v3761_v28 = vpop.permute.xlu0 %3760  ;;  %v3752_v7 = vunpack.i.l.bf16 %v4577_v46  ;;  %vm6646_vm2 = vmmov %vm6641_vm0 }
 0x4da   : > { %v1237_v4 = vsel %vm513_vm10, %v1229_v8, 0.0  ;;  %v3763_v2 = vunpack.i.h.bf16 %v3761_v28  ;;  %v3762_v10 = vunpack.i.l.bf16 %v3761_v28  ;;  %v1143_v59 = vrot.slane %v1136_v20, 7 }
 0x4db   : > { %v4585_v32 = vsel %vm1335_vm14, %v1334_v5, %v1237_v4  ;;  %v1312_v27 = vrot.slane %v4466_v42, 4  ;;  %v1249_v48 = vsel %vm6637_vm6, %v3753_v35, %v3752_v7  ;;  %v1152_v62 = vsel %vm512_vm7, %v1144_v15, 0.0 }
 0x4dc   : > { %v1163_v51 = vsel %vm6626_vm4, %v3763_v2, %v3732_v41  ;;  %v1164_v53 = vsel %vm6638_vm13, %v3762_v10, %v3763_v2  ;;  %v1165_v54 = vsel %vm6639_vm8, %v3733_v6, %v3762_v10  ;;  %v3766_v55 = vpop.permute.xlu1 %3765  ;;  %v1150_v58 = vsel %vm6640_vm9, %v1142_v34, 0.0  ;;  %vm6652_vm9 = vmmov %vm6645_vm3 }
 0x4dd   : > { %v1257_v11 = vrot.slane %v1249_v48, 2  ;;  %v1172_v57 = vrot.slane %v1163_v51, 6  ;;  %v3781_v60 = vpop.permute.xlu0 %3780  ;;  %v3768_v61 = vunpack.i.h.bf16 %v3766_v55  ;;  %v3767_v37 = vunpack.i.l.bf16 %v3766_v55 }
 0x4de   : > { %v3783_v40 = vunpack.i.h.bf16 %v3781_v60  ;;  %v3782_v41 = vunpack.i.l.bf16 %v3781_v60  ;;  %v1151_v49 = vsel %vm6641_vm0, %v1143_v59, 0.0  ;;  %v1170_v14 = vrot.slane %v1165_v54, 6 }
 0x4df   : > { %v4611_v6 = vsel %vm513_vm10, %v1257_v11, 0.0  ;;  %v1171_v36 = vrot.slane %v1164_v53, 6  ;;  %v1180_v39 = vsel %vm512_vm7, %v1172_v57, 0.0  ;;  %v1119_v5 = vsel %vm6642_vm5, %v3768_v61, %v3737_v31 }
 0x4e0   : > { %v1120_v0 = vsel %vm6643_vm15, %v3767_v37, %v3768_v61  ;;  %v1121_v17 = vsel %vm6644_vm12, %v3738_v47, %v3767_v37  ;;  %v3771_v21 = vpop.permute.xlu1 %3770  ;;  %v1124_v8 = vsel %vm512_vm7, %v1119_v5, 0.0  ;;  %vm6647_vm1 = vcmp.lt.s32.totalorder %v4074_v18, 127  ;;  %v4668_v61 = vld [vmem:[%s6426_s2 + $0x30] sm:$0x1] }
 0x4e1   : > { %v1122_v19 = vsel %vm6645_vm3, %v1121_v17, 0.0  ;;  %v1123_v20 = vsel %vm6646_vm2, %v1120_v0, 0.0  ;;  %v4633_v31 = vsel %vm6647_vm1, %v3782_v41, %v3783_v40  ;;  %vm6648_vm6 = vcmask 1040384   ;;  %vm6651_vm8 = vmmov %vm6647_vm1  ;;  %v3786_v34 = vpop.permute.xlu0 %3785 }
 0x4e2   : > { %v1320_v22 = vsel %vm6648_vm6, %v1124_v8, %v1152_v62  ;;  %vm6649_vm4 = vmmov %vm6648_vm6  ;;  %v1220_v15 = vsel %vm6651_vm8, %v3747_v33, %v3782_v41  ;;  %v1178_v28 = vsel %vm6652_vm9, %v1170_v14, 0.0  ;;  %v1179_v4 = vsel %vm6641_vm0, %v1171_v36, 0.0  ;;  %v4653_v33 = vld [vmem:[%s6426_s2 + $0x38] sm:$0x1] }
 0x4e3   : > { %v1318_v45 = vsel %vm6649_vm4, %v1122_v19, %v1150_v58  ;;  %vm6650_vm13 = vmmov %vm6649_vm4  ;;  %v1226_v10 = vrot.slane %v1220_v15, 3  ;;  %vm6654_vm15 = vcmask 1041408   ;;  %v3773_v51 = vunpack.i.h.bf16 %v3771_v21 }
 0x4e4   : > { %v1319_v47 = vsel %vm6650_vm13, %v1123_v20, %v1151_v49  ;;  %vm6653_vm5 = vmmov %vm6647_vm1  ;;  %v1324_v59 = vsel %vm6654_vm15, %v1320_v22, %v1180_v39  ;;  %v3772_v53 = vunpack.i.l.bf16 %v3771_v21  ;;  %v1227_v55 = vrot.slane %v4633_v31, 3  ;;  %v3776_v58 = vpop.permute.xlu1 %3775 }
 0x4e5   : > { %v1218_v2 = vsel %vm6653_vm5, %v3783_v40, %v3748_v63  ;;  %vm6655_vm12 = vmmov %vm6654_vm15  ;;  %v3788_v56 = vunpack.i.h.bf16 %v3786_v34  ;;  %v3787_v62 = vunpack.i.l.bf16 %v3786_v34  ;;  %vm6658_vm1 = vcmp.lt.s32.totalorder %v4074_v18, 1  ;;  %v3791_v39 = vpop.permute.xlu0 %3790 }
 0x4e6   : > { %v1322_v48 = vsel %vm6655_vm12, %v1318_v45, %v1178_v28  ;;  %vm6656_vm3 = vmmov %vm6655_vm12  ;;  %v1228_v63 = vrot.slane %v1218_v2, 3  ;;  %v1191_v57 = vsel %vm6658_vm1, %v3773_v51, %v3742_v52  ;;  %vm6661_vm13 = vcmp.lt.s32.totalorder %v4074_v18, 113 }
 0x4e7   : > { %v1323_v54 = vsel %vm6656_vm3, %v1319_v47, %v1179_v4  ;;  %vm6657_vm2 = vmmov %vm6652_vm9  ;;  %v1200_v37 = vrot.slane %v1191_v57, 5  ;;  %v1246_v52 = vsel %vm6661_vm13, %v3788_v56, %v3753_v35  ;;  %vm6523_vm8 = vcmp.gt.f32.partialorder %v4653_v33, 0.5 }
 0x4e8   : > { %v1234_v11 = vsel %vm6657_vm2, %v1226_v10, 0.0  ;;  %vm6659_vm6 = vmmov %vm6658_vm1  ;;  %v1256_v36 = vrot.slane %v1246_v52, 2  ;;  %vm1344_vm5 = vcmask 1046528   ;;  %vm6664_vm15 = vcmp.gt.f32.partialorder %v4061_v13, 0.5  ;;  %v3801_v45 = vpop.permute.xlu1 %3800 }
 0x4e9   : > { %v1192_v60 = vsel %vm6659_vm6, %v3772_v53, %v3773_v51  ;;  %vm6660_vm4 = vmmov %vm6658_vm1  ;;  %v3778_v0 = vunpack.i.h.bf16 %v3776_v58  ;;  %vm516_vm12 = vcmp.gt.f32.partialorder %v4668_v61, 0.5  ;;  %v1236_v17 = vsel %vm512_vm7, %v1228_v63, 0.0 }
 0x4ea   : > { %v1193_v40 = vsel %vm6660_vm4, %v3743_v26, %v3772_v53  ;;  %v1199_v41 = vrot.slane %v1192_v60, 5  ;;  %vm6662_vm9 = vmmov %vm6661_vm13  ;;  %v1208_v26 = vsel %vm512_vm7, %v1200_v37, 0.0  ;;  %v1264_v22 = vsel %vm512_vm7, %v1256_v36, 0.0  ;;  %v3796_v53 = vpop.permute.xlu0 %3795 }
 0x4eb   : > { %v1198_v49 = vrot.slane %v1193_v40, 5  ;;  %v1247_v14 = vsel %vm6662_vm9, %v3787_v62, %v3788_v56  ;;  %vm6663_vm0 = vmmov %vm6662_vm9  ;;  %v1329_v21 = vsel %vm1326_vm11, %v1324_v59, %v1208_v26  ;;  %v3777_v28 = vunpack.i.l.bf16 %v3776_v58 }
 0x4ec   : > { %v1248_v43 = vsel %vm6663_vm0, %v3752_v7, %v3787_v62  ;;  %v1207_v35 = vsel %vm6664_vm15, %v1199_v41, 0.0  ;;  %vm6665_vm3 = vmmov %vm6657_vm2  ;;  %vm6666_vm2 = vcmask 1043456   ;;  %v1255_v20 = vrot.slane %v1247_v14, 2 }
 0x4ed   : > { %v1254_v5 = vrot.slane %v1248_v43, 2  ;;  %v1206_v46 = vsel %vm6665_vm3, %v1198_v49, 0.0  ;;  %v1328_v7 = vsel %vm1326_vm11, %v1323_v54, %v1207_v35  ;;  %v1333_v19 = vsel %vm6666_vm2, %v1329_v21, %v1312_v27  ;;  %vm6667_vm1 = vmmov %vm6666_vm2 }
 0x4ee   : > { %v1327_v8 = vsel %vm1326_vm11, %v1322_v48, %v1206_v46  ;;  %vm6668_vm6 = vmmov %vm6667_vm1  ;;  %v1338_v34 = vsel %vm1335_vm14, %v1333_v19, %v1236_v17  ;;  %v3793_v2 = vunpack.i.h.bf16 %v3791_v39  ;;  %v3792_v10 = vunpack.i.l.bf16 %v3791_v39 }
 0x4ef   : > { %v1331_v47 = vsel %vm6667_vm1, %v1327_v8, %v1310_v38  ;;  %v1332_v15 = vsel %vm6668_vm6, %v1328_v7, %v1311_v16  ;;  %vm6669_vm11 = vmmov %vm6665_vm3  ;;  %vm6670_vm4 = vcmask 1045504   ;;  %vm6671_vm13 = vcmp.lt.s32.totalorder %v4074_v18, 112 }
 0x4f0   : > { %v1262_v4 = vsel %vm6669_vm11, %v1254_v5, 0.0  ;;  %v1336_v27 = vsel %vm1335_vm14, %v1331_v47, %v1234_v11  ;;  %v1342_v59 = vsel %vm6670_vm4, %v1338_v34, %v1264_v22  ;;  %v1277_v48 = vsel %vm6671_vm13, %v3778_v0, %v3777_v28  ;;  %vm6672_vm9 = vmmov %vm6671_vm13 }
 0x4f1   : > { %v3803_v38 = vunpack.i.h.bf16 %v3801_v45  ;;  %v3802_v51 = vunpack.i.l.bf16 %v3801_v45  ;;  %v1285_v54 = vrot.slane %v1277_v48, 1  ;;  %v1274_v16 = vsel %vm6672_vm9, %v3793_v2, %v3778_v0  ;;  %vm6673_vm0 = vmmov %vm6672_vm9 }
 0x4f2   : > { %v1275_v56 = vsel %vm6673_vm0, %v3792_v10, %v3793_v2  ;;  %vm6674_vm15 = vmmov %vm6673_vm0  ;;  %v1284_v11 = vrot.slane %v1274_v16, 1  ;;  %vm6676_vm2 = vcmp.lt.s32.totalorder %v4074_v18, 111  ;;  %v3798_v40 = vunpack.i.h.bf16 %v3796_v53 }
 0x4f3   : > { %v1276_v62 = vsel %vm6674_vm15, %v3777_v28, %v3792_v10  ;;  %vm6675_vm3 = vmmov %vm6670_vm4  ;;  %v1305_v57 = vsel %vm6676_vm2, %v3803_v38, %v3802_v51  ;;  %v1293_v60 = vsel %vm513_vm10, %v1285_v54, 0.0  ;;  %v1283_v37 = vrot.slane %v1275_v56, 1 }
 0x4f4   : > { %v1340_v58 = vsel %vm6675_vm3, %v1336_v27, %v1262_v4  ;;  %v1282_v63 = vrot.slane %v1276_v62, 1  ;;  %v3797_v41 = vunpack.i.l.bf16 %v3796_v53  ;;  %vm6677_vm1 = vmmov %vm6669_vm11  ;;  %v1292_v49 = vsel %vm512_vm7, %v1284_v11, 0.0 }
 0x4f5   : > { %v1309_v14 = vsel %vm6523_vm8, %v1305_v57, 0.0  ;;  %vm6678_vm6 = vmmov %vm6675_vm3  ;;  %vm6682_vm9 = vcmp.gt.f32.partialorder %v4101_v30, 0.5  ;;  %v1347_v17 = vsel %vm1344_vm5, %v1342_v59, %v1292_v49  ;;  %vm6683_vm0 = vcmp.gt.f32.partialorder %v4061_v13, 0.5 }
 0x4f6   : > { %v1290_v52 = vsel %vm6677_vm1, %v1282_v63, 0.0  ;;  %v1343_v43 = vsel %vm6678_vm6, %v4585_v32, %v4611_v6  ;;  %vm6679_vm11 = vmmov %vm6676_vm2  ;;  %v1235_v6 = vsel %vm6683_vm0, %v1227_v55, 0.0 }
 0x4f7   : > { %v1302_v36 = vsel %vm6679_vm11, %v3798_v40, %v3803_v38  ;;  %vm6680_vm4 = vmmov %vm6676_vm2  ;;  %v1345_v35 = vsel %vm1344_vm5, %v1340_v58, %v1290_v52  ;;  %v1348_v32 = vsel %vm1344_vm5, %v1343_v43, %v1293_v60  ;;  %v1337_v45 = vsel %vm1335_vm14, %v1332_v15, %v1235_v6  ;;  %v3112_v43 = vld [vmem:[#allocation3] sm:$0x1] }
 0x4f8   : > { %v1303_v39 = vsel %vm6680_vm4, %v3797_v41, %v3798_v40  ;;  %vm6681_vm13 = vmmov %vm6676_vm2  ;;  %v1308_v0 = vsel %vm516_vm12, %v1302_v36, 0.0  ;;  %v1352_v21 = vpack.c.bf16 %v1309_v14, %v1348_v32  ;;  %vm6686_vm2 = vcmp.gt.f32.partialorder %v4084_v24, 0.5 }
 0x4f9   : > { %v1304_v26 = vsel %vm6681_vm13, %v3802_v51, %v3797_v41  ;;  %vm6684_vm15 = vmmov %vm6683_vm0  ;;  %v1351_v7 = vpack.c.bf16 %v1308_v0, %v1347_v17  ;;  %v1307_v22 = vsel %vm6686_vm2, %v1303_v39, 0.0  ;;  %v3279_v36 = vsub.f32 %v4475_v23, %v4466_v42 }
 0x4fa   : > { %v1306_v5 = vsel %vm6682_vm9, %v1304_v26, 0.0  ;;  %v1291_v46 = vsel %vm6684_vm15, %v1283_v37, 0.0  ;;  %vm6685_vm3 = vmmov %vm6683_vm0  ;;  %v1376_v47 = vand.u32 %v4589_v44, %v1352_v21  ;;  %v1358_v27 = vpop.permute.xlu0 %1357  ;;  %v3280_v39 = vsub.f32 %v4478_v29, %v4038_v9 }
 0x4fb   : > { %v1263_v8 = vsel %vm6685_vm3, %v1255_v20, 0.0  ;;  %v1349_v19 = vpack.c.bf16 %v1306_v5, %v1345_v35  ;;  %vm6687_vm1 = vmmov %vm6678_vm6  ;;  %v1373_v55 = vand.u32 %v4589_v44, %v1351_v7  ;;  %v1353_v20 = vld [vmem:[%s6433_s9] sm:$0xf]  ;;  %vm1360_vm6 = vcmask 72704  }
 0x4fc   : > { %v1341_v31 = vsel %vm6687_vm1, %v1337_v45, %v1263_v8  ;;  %1419 = vmatprep.subr.bf16.mxu0 %v1376_v47  ;;  %v3295_v26 = vand.u32 2147483647, %v3279_v36  ;;  %v3296_v35 = vand.u32 2147483647, %v3280_v39  ;;  %vm6692_vm13 = vcmask 1040384  }
 0x4fd   : > { %v1346_v34 = vsel %vm1344_vm5, %v1341_v31, %v1291_v46  ;;  %1420 = vmatpush1.bf16.msra.mxu0 %v1373_v55  ;;  %v1367_v4 = vand.u32 %v4589_v44, %v1349_v19  ;;  %vm6693_vm9 = vmmov %vm6692_vm13  ;;  %v3335_v17 = vmul.f32 %v3279_v36, %v3279_v36  ;;  %v3336_v32 = vmul.f32 %v3280_v39, %v3280_v39 }
 0x4fe   : > { %v1350_v28 = vpack.c.bf16 %v1307_v22, %v1346_v34  ;;  %v3297_v5 = vsel %vm6692_vm13, %v3295_v26, 0.0  ;;  %v3298_v0 = vsel %vm6693_vm9, %v3296_v35, 0.0  ;;  %vm6694_vm0 = vmmov %vm6693_vm9  ;;  %vm6696_vm3 = vcmp.lt.s32.totalorder %v4074_v18, 16 }
 0x4ff   : > { %v3299_v6 = vadd.f32 %v3298_v0, %v3297_v5  ;;  %v3337_v46 = vsel %vm6694_vm0, %v3335_v17, 0.0  ;;  %vm6695_vm15 = vmmov %vm6694_vm0  ;;  %vm6697_vm2 = vcmp.lt.s32.totalorder %v4074_v18, 17  ;;  %vm6698_vm1 = vcmp.lt.s32.totalorder %v4074_v18, 1 }
 0x500   : > { %v1370_v15 = vand.u32 %v4589_v44, %v1350_v28  ;;  %3559 = vmatmul.mubr.msk.bf16.vlgmr.msra.gmra.mrb[8].mxu0 %vm1360_vm6, %v1353_v20  ;;  %v3338_v7 = vsel %vm6695_vm15, %v3336_v32, 0.0  ;;  %vm6706_vm13 = vmmov %vm6697_vm2  ;;  %vm6709_vm15 = vcmp.gt.f32.partialorder %v4056_v12, 0.5 }
 0x501   : > { %3210 = vmatprep.mubr.bf16.mxu0 %v3907_v3  ;;  %v3339_v21 = vadd.f32 %v3338_v7, %v3337_v46  ;;  %vm6707_vm9 = vmmov %vm6696_vm3 }
 0x502   : > { %1378 = vmatprep.subr.bf16.mxu1 %v1370_v15  ;;  %vm6708_vm0 = vmmov %vm6696_vm3 }
 0x503   : > { %1379 = vmatpush1.bf16.msra.mxu1 %v1367_v4 }
 0x506   : > { %3558 = vmatmul.mubr.msk.bf16.vlgmr.msra.gmra.mrb[4].mxu1 %vm1360_vm6, %v1353_v20  ;;  %vm6699_vm6 = vcmp.lt.s32.totalorder %v4074_v18, 15 }
 0x507   : > { %3169 = vmatprep.mubr.bf16.mxu1 %v3907_v3 }
 0x5d3   : > { %v1453_v2 = vpop.f32.mrb[8].mxu0 }
 0x5d4   : > { %v1454_v10 = vadd.f32 %v1453_v2, %v1358_v27  ;;  %v1455_v59 = vpop.f32.mrb[9].mxu0 }
 0x5d5   : > { %v1456_v48 = vadd.f32 %v1455_v59, %v1358_v27  ;;  %v1457_v38 = vpop.f32.mrb[10].mxu0 }
 0x5d6   : > { %vm1462_vm14 = vcmp.gt.f32.partialorder %v1454_v10, 0.0  ;;  %v1466_v51 = vmul.f32 0.2, %v1454_v10  ;;  %v1458_v53 = vpop.f32.mrb[11].mxu0 }
 0x5d7   : > { %vm1463_vm5 = vcmp.gt.f32.partialorder %v1456_v48, 0.0  ;;  %v1467_v44 = vmul.f32 0.2, %v1456_v48 }
 0x5d8   : > { %v4770_v16 = vsel %vm1462_vm14, %v1454_v10, %v1466_v51  ;;  %vm6700_vm14 = vcmp.lt.s32.totalorder %v4074_v18, 113 }
 0x5d9   : > { %v1412_v54 = vpop.f32.mrb[4].mxu1  ;;  %6688 = vst [vmem:[#allocation9_spill] sm:$0xff] %v4770_v16  ;;  %v4772_v58 = vsel %vm1463_vm5, %v1456_v48, %v1467_v44  ;;  %vm6702_vm5 = vcmp.lt.s32.totalorder %v4074_v18, 127 }
 0x5da   : > { %v1413_v56 = vadd.f32 %v1412_v54, %v1358_v27  ;;  %v1414_v62 = vpop.f32.mrb[5].mxu1  ;;  %6689 = vst [vmem:[#allocation10_spill] sm:$0xff] %v4772_v58  ;;  %v3809_v3 = vpack.i.bf16 %v4770_v16, %v4772_v58 }
 0x5db   : > { %v1416_v63 = vpop.f32.mrb[6].mxu1  ;;  %v1415_v60 = vadd.f32 %v1414_v62, %v1358_v27 }
 0x5dc   : > { %v1417_v11 = vpop.f32.mrb[7].mxu1  ;;  %v1464_v57 = vmul.f32 0.2, %v1413_v56  ;;  %vm1460_vm11 = vcmp.gt.f32.partialorder %v1413_v56, 0.0  ;;  %3810 = vrot.lane.b32.xlu0 %v3809_v3, %s3909_s26  ;;  %3805 = vrot.lane.b32.xlu1 %v3809_v3, %s3913_s30 }
 0x5dd   : > { %v1465_v40 = vmul.f32 0.2, %v1415_v60  ;;  %vm1461_vm4 = vcmp.gt.f32.partialorder %v1415_v60, 0.0 }
 0x5de   : > { %v4778_v37 = vsel %vm1460_vm11, %v1413_v56, %v1464_v57  ;;  %vm6704_vm11 = vmmov %vm6697_vm2 }
 0x5df   : > { %6690 = vst [vmem:[#allocation11_spill] sm:$0xff] %v4778_v37  ;;  %v3829_v41 = vpack.i.bf16 %v4772_v58, %v4778_v37  ;;  %v4784_v52 = vsel %vm1461_vm4, %v1415_v60, %v1465_v40  ;;  %vm6705_vm4 = vmmov %vm6697_vm2 }
 0x5e0   : > { %3820 = vrot.lane.b32.xlu0 %v3809_v3, %s3912_s29  ;;  %3815 = vrot.lane.b32.xlu1 %v3809_v3, %s3908_s25  ;;  %6691 = vst [vmem:[#allocation12_spill] sm:$0xff] %v4784_v52  ;;  %v3834_v49 = vpack.i.bf16 %v4784_v52, %v4778_v37  ;;  %v3859_v14 = vpack.i.bf16 %v4770_v16, %v4784_v52 }
 0x5e4   : > { %3830 = vrot.lane.b32.xlu1 %v3829_v41, %s3910_s27  ;;  %3825 = vrot.lane.b32.xlu0 %v3829_v41, %s3911_s28 }
 0x5e8   : > { %3835 = vrot.lane.b32.xlu1 %v3834_v49, %s3913_s30  ;;  %3840 = vrot.lane.b32.xlu0 %v3834_v49, %s3909_s26 }
 0x5ec   : > { %3845 = vrot.lane.b32.xlu1 %v3834_v49, %s3908_s25  ;;  %3850 = vrot.lane.b32.xlu0 %v3834_v49, %s3912_s29 }
 0x5f0   : > { %3860 = vrot.lane.b32.xlu1 %v3859_v14, %s3911_s28  ;;  %3855 = vrot.lane.b32.xlu0 %v3829_v41, %s3914_s15 }
 0x5f4   : > { %3865 = vrot.lane.b32.xlu1 %v3859_v14, %s3910_s27  ;;  %3870 = vrot.lane.b32.xlu0 %v3859_v14, %s3914_s15 }
 0x5f8   : > { %3875 = vrot.lane.b32.xlu1 %v3834_v49, %s3915_s16  ;;  %2238 = vrot.lane.b32.xlu0 %v4770_v16, %s3915_s16 }
 0x5fc   : > { %2240 = vrot.lane.b32.xlu1 %v4772_v58, %s3915_s16  ;;  %3115 = vperm.xlu0 %3642, %v3112_v43  }
 0x61b   : > { %3300 = vadd.xlane.f32.xlu0 %v3299_v6 }
 0x61f   : > { %3340 = vadd.xlane.f32.xlu0 %v3339_v21 }
 0x64e   : > { %v4813_v42 = vpop.permute.xlu0 %3810  ;;  %v4815_v8 = vpop.permute.xlu1 %3805 }
 0x64f   : > { %v3813_v9 = vunpack.i.h.bf16 %v4813_v42  ;;  %v3812_v19 = vunpack.i.l.bf16 %v4813_v42  ;;  %v3808_v22 = vunpack.i.h.bf16 %v4815_v8  ;;  %v3807_v45 = vunpack.i.l.bf16 %v4815_v8 }
 0x651   : > { %v4827_v47 = vsel %vm6696_vm3, %v3813_v9, %v3812_v19  ;;  %v1480_v31 = vsel %vm6697_vm2, %v3808_v22, %v3807_v45  ;;  %vm6710_vm3 = vmmov %vm6709_vm15 }
 0x652   : > { %v4833_v28 = vpop.permute.xlu0 %3820  ;;  %v4835_v4 = vpop.permute.xlu1 %3815  ;;  %v1497_v10 = vrot.slane %v1480_v31, 1  ;;  %v1501_v59 = vrot.slane %v1480_v31, 2  ;;  %v1505_v48 = vrot.slane %v1480_v31, 3  ;;  %v1509_v38 = vrot.slane %v1480_v31, 4  ;;  %vm6711_vm2 = vmmov %vm6710_vm3 }
 0x653   : > { %v6466_v20 = vunpack.i.h.bf16 %v4833_v28  ;;  %v6465_v15 = vunpack.i.l.bf16 %v4833_v28  ;;  %v3818_v27 = vunpack.i.h.bf16 %v4835_v4  ;;  %v3817_v2 = vunpack.i.l.bf16 %v4835_v4 }
 0x654   : > { %v1513_v54 = vrot.slane %v1480_v31, 5  ;;  %v1517_v44 = vrot.slane %v1480_v31, 6  ;;  %v1521_v11 = vrot.slane %v1480_v31, 7  ;;  %v4865_v57 = vsel %vm513_vm10, %v1480_v31, 0.0 }
 0x655   : > { %v4847_v51 = vsel %vm6698_vm1, %v6466_v20, %v6465_v15  ;;  %v4855_v53 = vsel %vm6699_vm6, %v3818_v27, %v3817_v2  ;;  %v4876_v39 = vsel %vm513_vm10, %v1497_v10, 0.0  ;;  %v4888_v35 = vsel %vm513_vm10, %v1501_v59, 0.0  ;;  %vm6712_vm1 = vmmov %vm6708_vm0 }
 0x656   : > { %v4859_v63 = vpop.permute.xlu1 %3830  ;;  %v4861_v3 = vpop.permute.xlu0 %3825  ;;  %v4892_v5 = vsel %vm513_vm10, %v1505_v48, 0.0  ;;  %v4896_v0 = vsel %vm513_vm10, %v1509_v38, 0.0  ;;  %v4909_v7 = vsel %vm513_vm10, %v1513_v54, 0.0  ;;  %v4913_v21 = vsel %vm513_vm10, %v1517_v44, 0.0  ;;  %vm6713_vm6 = vmmov %vm6711_vm2 }
 0x657   : > { %v6462_v40 = vunpack.i.h.bf16 %v4859_v63  ;;  %v6461_v41 = vunpack.i.l.bf16 %v4859_v63  ;;  %v6464_v49 = vunpack.i.h.bf16 %v4861_v3  ;;  %v6463_v36 = vunpack.i.l.bf16 %v4861_v3 }
 0x658   : > { %v4926_v44 = vsel %vm513_vm10, %v1521_v11, 0.0 }
 0x659   : > { %v4884_v26 = vsel %vm6700_vm14, %v6462_v40, %v6461_v41  ;;  %v4905_v32 = vsel %vm6702_vm5, %v6464_v49, %v6463_v36  ;;  %vm6714_vm14 = vmmov %vm6711_vm2 }
 0x65a   : > { %6701 = vst [vmem:[#allocation13_spill] sm:$0xff] %v4884_v26  ;;  %6703 = vst [vmem:[#allocation14_spill] sm:$0xff] %v4905_v32  ;;  %v3836_v6 = vpop.permute.xlu1 %3835  ;;  %v3841_v46 = vpop.permute.xlu0 %3840 }
 0x65b   : > { %v3838_v59 = vunpack.i.h.bf16 %v3836_v6  ;;  %v3837_v38 = vunpack.i.l.bf16 %v3836_v6  ;;  %v3843_v17 = vunpack.i.h.bf16 %v3841_v46  ;;  %v3842_v60 = vunpack.i.l.bf16 %v3841_v46  ;;  %vm6715_vm5 = vmmov %vm6711_vm2 }
 0x65d   : > { %v4922_v54 = vsel %vm6704_vm11, %v3838_v59, %v3808_v22  ;;  %v4936_v22 = vsel %vm6705_vm4, %v3837_v38, %v3838_v59  ;;  %v4940_v11 = vsel %vm6706_vm13, %v3807_v45, %v3837_v38  ;;  %v4946_v48 = vsel %vm6707_vm9, %v3843_v17, %v3813_v9  ;;  %vm6722_vm9 = vmmov %vm6711_vm2 }
 0x65e   : > { %v1496_v8 = vrot.slane %v4922_v54, 1  ;;  %v1500_v10 = vrot.slane %v4922_v54, 2  ;;  %v4951_v56 = vsel %vm512_vm7, %v4922_v54, 0.0  ;;  %v1494_v59 = vrot.slane %v4940_v11, 1  ;;  %v3846_v14 = vpop.permute.xlu1 %3845  ;;  %v3851_v46 = vpop.permute.xlu0 %3850 }
 0x65f   : > { %v4960_v45 = vsel %vm6708_vm0, %v3842_v60, %v3843_v17  ;;  %v1498_v62 = vrot.slane %v4940_v11, 2  ;;  %v1604_v40 = vrot.slane %v4946_v48, 7  ;;  %v1608_v17 = vrot.slane %v4946_v48, 1 }
 0x660   : > { %v4955_v43 = vsel %vm512_vm7, %v1496_v8, 0.0  ;;  %v4964_v38 = vsel %vm512_vm7, %v1500_v10, 0.0  ;;  %v4972_v8 = vsel %vm6709_vm15, %v1494_v59, 0.0  ;;  %v4980_v10 = vsel %vm6710_vm3, %v4940_v11, 0.0  ;;  %vm6727_vm15 = vmmov %vm6711_vm2 }
 0x661   : > { %v4984_v9 = vsel %vm6711_vm2, %v1498_v62, 0.0  ;;  %v4990_v49 = vsel %vm512_vm7, %v1604_v40, 0.0  ;;  %v4995_v36 = vsel %vm512_vm7, %v4946_v48, 0.0  ;;  %v5001_v62 = vsel %vm6712_vm1, %v3812_v19, %v3842_v60 }
 0x662   : > { %v5005_v41 = vsel %vm512_vm7, %v1608_v17, 0.0  ;;  %v1602_v59 = vrot.slane %v5001_v62, 7  ;;  %v1606_v6 = vrot.slane %v5001_v62, 1  ;;  %v3848_v42 = vunpack.i.h.bf16 %v3846_v14 }
 0x663   : > { %v3847_v55 = vunpack.i.l.bf16 %v3846_v14  ;;  %v5020_v17 = vsel %vm6714_vm14, %v5001_v62, 0.0  ;;  %v3853_v40 = vunpack.i.h.bf16 %v3851_v46  ;;  %vm6716_vm11 = vcmp.lt.s32.totalorder %v4074_v18, 15 }
 0x664   : > { %v5015_v60 = vsel %vm6713_vm6, %v1602_v59, 0.0  ;;  %v5024_v15 = vsel %vm6715_vm5, %v1606_v6, 0.0  ;;  %v5030_v14 = vsel %vm6716_vm11, %v3848_v42, %v3818_v27  ;;  %vm6717_vm4 = vmmov %vm6716_vm11  ;;  %v3852_v20 = vunpack.i.l.bf16 %v3851_v46 }
 0x665   : > { %v5034_v59 = vsel %vm6717_vm4, %v3847_v55, %v3848_v42  ;;  %vm6718_vm13 = vmmov %vm6717_vm4  ;;  %v1712_v31 = vrot.slane %v5030_v14, 6  ;;  %v1716_v6 = vrot.slane %v5030_v14, 7  ;;  %v6724_v46 = vunpack.i.h.bf16 %v4833_v28 }
 0x666   : > { %v5040_v19 = vsel %vm6718_vm13, %v3817_v2, %v3847_v55  ;;  %vm6725_vm0 = vcmp.lt.s32.totalorder %v4074_v18, 1  ;;  %vm2381_vm3 = vcmask 1041409   ;;  %vm2384_vm2 = vcmask 1042434   ;;  %vm6736_vm4 = vmmov %vm6722_vm9 }
 0x667   : > { %6719 = vst [vmem:[#allocation15_spill] sm:$0xff] %v5040_v19  ;;  %v1710_v34 = vrot.slane %v5040_v19, 6  ;;  %v1714_v23 = vrot.slane %v5040_v19, 7  ;;  %v5051_v4 = vsel %vm512_vm7, %v1712_v31, 0.0  ;;  %v5055_v55 = vsel %vm512_vm7, %v1716_v6, 0.0  ;;  %vm6729_vm1 = vmmov %vm6725_vm0 }
 0x668   : > { %6720 = vst [vmem:[#allocation16_spill] sm:$0xff] %v5051_v4  ;;  %6721 = vst [vmem:[#allocation17_spill] sm:$0xff] %v5055_v55  ;;  %v5065_v29 = vsel %vm6725_vm0, %v3853_v40, %v6724_v46  ;;  %v5082_v31 = vsel %vm6729_vm1, %v3852_v20, %v3853_v40  ;;  %vm2387_vm14 = vcmask 1043459   ;;  %v1625_v40 = vrot.slane %v4827_v47, 5 }
 0x669   : > { %v5059_v2 = vsel %vm6722_vm9, %v1710_v34, 0.0  ;;  %6726 = vst [vmem:[#allocation19_spill] sm:$0xff] %v5065_v29  ;;  %v5072_v6 = vsel %vm6727_vm15, %v1714_v23, 0.0  ;;  %v1820_v25 = vrot.slane %v5065_v29, 5  ;;  %v1824_v30 = vrot.slane %v5065_v29, 6  ;;  %vm6731_vm6 = vmmov %vm6725_vm0 }
 0x66a   : > { %6723 = vst [vmem:[#allocation18_spill] sm:$0xff] %v5059_v2  ;;  %6728 = vst [vmem:[#allocation20_spill] sm:$0xff] %v5072_v6  ;;  %v1828_v46 = vrot.slane %v5065_v29, 7  ;;  %v6730_v23 = vunpack.i.l.bf16 %v4833_v28  ;;  %vm2390_vm5 = vcmask 1044484   ;;  %vm2393_vm11 = vcmask 1045509  }
 0x66b   : > { %v5092_v37 = vsel %vm512_vm7, %v1820_v25, 0.0  ;;  %v5096_v42 = vsel %vm512_vm7, %v1824_v30, 0.0  ;;  %v1629_v25 = vrot.slane %v4827_v47, 6  ;;  %vm2396_vm13 = vcmask 1046534   ;;  %vm6738_vm9 = vmmov %vm6736_vm4 }
 0x66c   : > { %v5088_v34 = vsel %vm6731_vm6, %v6730_v23, %v3852_v20  ;;  %6733 = vst [vmem:[#allocation22_spill] sm:$0xff] %v5092_v37  ;;  %6734 = vst [vmem:[#allocation23_spill] sm:$0xff] %v5096_v42  ;;  %v5102_v28 = vsel %vm512_vm7, %v1828_v46, 0.0  ;;  %vm2399_vm0 = vcmask 1047559   ;;  %v1669_v20 = vsel %vm513_vm10, %v4827_v47, 0.0 }
 0x66d   : > { %6732 = vst [vmem:[#allocation21_spill] sm:$0xff] %v5088_v34  ;;  %v1818_v27 = vrot.slane %v5088_v34, 5  ;;  %6735 = vst [vmem:[#allocation24_spill] sm:$0xff] %v5102_v28  ;;  %v1822_v23 = vrot.slane %v5088_v34, 6  ;;  %v1826_v26 = vrot.slane %v5088_v34, 7  ;;  %v6745_v30 = vrot.slane %v4827_v47, 3  ;;  %v3861_v28 = vpop.permute.xlu1 %3860 }
 0x66e   : > { %vm6740_vm15 = vmmov %vm6736_vm4  ;;  %v1689_v6 = vsel %vm513_vm10, %v1625_v40, 0.0  ;;  %v2429_v2 = vrot.slane %v4876_v39, 7  ;;  %v2433_v34 = vrot.slane %v4892_v5, 5  ;;  %v2435_v19 = vrot.slane %v4896_v0, 4 }
 0x66f   : > { %v5112_v52 = vsel %vm6736_vm4, %v1818_v27, 0.0  ;;  %v5118_v58 = vsel %vm6738_vm9, %v1822_v23, 0.0  ;;  %v5123_v16 = vsel %vm6740_vm15, %v1826_v26, 0.0  ;;  %v6742_v27 = vrot.slane %v4827_v47, 7  ;;  %vm6757_vm15 = vmmov %vm6738_vm9 }
 0x670   : > { %6737 = vst [vmem:[#allocation25_spill] sm:$0xff] %v5112_v52  ;;  %6739 = vst [vmem:[#allocation26_spill] sm:$0xff] %v5118_v58  ;;  %v6743_v23 = vrot.slane %v4827_v47, 1  ;;  %v6744_v52 = vrot.slane %v4827_v47, 2  ;;  %v2439_v40 = vrot.slane %v4913_v21, 2  ;;  %v2441_v42 = vrot.slane %v4926_v44, 1  ;;  %v5168_v44 = vpop.permute.xlu0 %3855 }
 0x671   : > { %6741 = vst [vmem:[#allocation27_spill] sm:$0xff] %v5123_v16  ;;  %v1665_v46 = vsel %vm513_vm10, %v6742_v27, 0.0  ;;  %v1681_v16 = vsel %vm513_vm10, %v6745_v30, 0.0  ;;  %v6746_v27 = vrot.slane %v4827_v47, 4  ;;  %v2437_v30 = vrot.slane %v4909_v7, 3 }
 0x672   : > { %v1673_v32 = vsel %vm513_vm10, %v6743_v23, 0.0  ;;  %v1677_v26 = vsel %vm513_vm10, %v6744_v52, 0.0  ;;  %v1693_v23 = vsel %vm513_vm10, %v1629_v25, 0.0  ;;  %v2431_v52 = vrot.slane %v4888_v35, 6 }
 0x673   : > { %v1685_v58 = vsel %vm513_vm10, %v6746_v27, 0.0  ;;  %v2521_v47 = vrot.slane %v1665_v46, 1  ;;  %v2430_v27 = vsel %vm2381_vm3, %v2429_v2, %v4865_v57  ;;  %v2523_v25 = vrot.slane %v1673_v32, 7 }
 0x674   : > { %v2432_v39 = vsel %vm2384_vm2, %v2431_v52, %v2430_v27  ;;  %v2525_v37 = vrot.slane %v1677_v26, 6  ;;  %v2527_v5 = vrot.slane %v1681_v16, 5  ;;  %v2529_v46 = vrot.slane %v1685_v58, 4 }
 0x675   : > { %v2522_v35 = vsel %vm2381_vm3, %v1669_v20, %v2521_v47  ;;  %v2434_v0 = vsel %vm2387_vm14, %v2433_v34, %v2432_v39  ;;  %v3863_v55 = vunpack.i.h.bf16 %v3861_v28  ;;  %v2531_v21 = vrot.slane %v1689_v6, 3 }
 0x676   : > { %v2524_v7 = vsel %vm2384_vm2, %v2523_v25, %v2522_v35  ;;  %v2436_v4 = vsel %vm2390_vm5, %v2435_v19, %v2434_v0  ;;  %v3862_v2 = vunpack.i.l.bf16 %v3861_v28  ;;  %v2533_v26 = vrot.slane %v1693_v23, 2 }
 0x677   : > { %v2526_v57 = vsel %vm2387_vm14, %v2525_v37, %v2524_v7  ;;  %v2438_v32 = vsel %vm2393_vm11, %v2437_v30, %v2436_v4  ;;  %v6747_v16 = vunpack.i.h.bf16 %v4861_v3  ;;  %vm6748_vm1 = vcmp.lt.s32.totalorder %v4074_v18, 127 }
 0x678   : > { %v2528_v20 = vsel %vm2390_vm5, %v2527_v5, %v2526_v57  ;;  %v2440_v58 = vsel %vm2396_vm13, %v2439_v40, %v2438_v32  ;;  %vm6750_vm6 = vmmov %vm6748_vm1  ;;  %v6752_v6 = vunpack.i.l.bf16 %v4861_v3  ;;  %v3858_v30 = vunpack.i.h.bf16 %v5168_v44 }
 0x679   : > { %v5176_v34 = vsel %vm6748_vm1, %v3863_v55, %v6747_v16  ;;  %v2530_v19 = vsel %vm2393_vm11, %v2529_v46, %v2528_v20  ;;  %v5182_v37 = vsel %vm6750_vm6, %v3862_v2, %v3863_v55  ;;  %vm6753_vm4 = vmmov %vm6748_vm1  ;;  %v2442_v28 = vsel %vm2399_vm0, %v2441_v42, %v2440_v58  ;;  %v3866_v46 = vpop.permute.xlu1 %3865 }
 0x67a   : > { %6749 = vst [vmem:[#allocation28_spill] sm:$0xff] %v5176_v34  ;;  %6751 = vst [vmem:[#allocation29_spill] sm:$0xff] %v5182_v37  ;;  %v5188_v4 = vsel %vm6753_vm4, %v6752_v6, %v3862_v2  ;;  %v2532_v23 = vsel %vm2396_vm13, %v2531_v21, %v2530_v19  ;;  %v1928_v27 = vrot.slane %v5176_v34, 3  ;;  %v3857_v3 = vunpack.i.l.bf16 %v5168_v44 }
 0x67b   : > { %6754 = vst [vmem:[#allocation30_spill] sm:$0xff] %v5188_v4  ;;  %v1926_v52 = vrot.slane %v5188_v4, 3  ;;  %v2534_v47 = vsel %vm2399_vm0, %v2533_v26, %v2532_v23  ;;  %v1930_v55 = vrot.slane %v5188_v4, 4  ;;  %v1932_v39 = vrot.slane %v5176_v34, 4  ;;  %vm6760_vm1 = vmmov %vm6738_vm9  ;;  %v3871_v23 = vpop.permute.xlu0 %3870 }
 0x67c   : > { %v3094_v40 = vpack.c.bf16 %v2534_v47, %v2442_v28  ;;  %v1934_v42 = vrot.slane %v5188_v4, 5  ;;  %v1936_v0 = vrot.slane %v5176_v34, 5  ;;  %v5211_v21 = vsel %vm512_vm7, %v1928_v27, 0.0 }
 0x67d   : > { %v5206_v7 = vsel %vm6738_vm9, %v1926_v52, 0.0  ;;  %6756 = vst [vmem:[#allocation32_spill] sm:$0xff] %v5211_v21  ;;  %v5215_v2 = vsel %vm6757_vm15, %v1930_v55, 0.0  ;;  %v5219_v44 = vsel %vm512_vm7, %v1932_v39, 0.0  ;;  %vm6763_vm6 = vcmp.lt.s32.totalorder %v4074_v18, 112 }
 0x67e   : > { %6755 = vst [vmem:[#allocation31_spill] sm:$0xff] %v5206_v7  ;;  %3178 = vmatprep.subr.bf16.mxu0 %v3094_v40  ;;  %6758 = vst [vmem:[#allocation33_spill] sm:$0xff] %v5215_v2  ;;  %v5224_v20 = vsel %vm6760_vm1, %v1934_v42, 0.0  ;;  %v5228_v26 = vsel %vm512_vm7, %v1936_v0, 0.0  ;;  %v5234_v19 = vsel %vm6763_vm6, %v3858_v30, %v3857_v3  ;;  %v3868_v6 = vunpack.i.h.bf16 %v3866_v46 }
 0x67f   : > { %6759 = vst [vmem:[#allocation34_spill] sm:$0xff] %v5219_v44  ;;  %6761 = vst [vmem:[#allocation35_spill] sm:$0xff] %v5224_v20  ;;  %v3867_v28 = vunpack.i.l.bf16 %v3866_v46  ;;  %v6765_v39 = vunpack.i.h.bf16 %v4859_v63  ;;  %vm6766_vm4 = vcmp.lt.s32.totalorder %v4074_v18, 113  ;;  %v6770_v46 = vunpack.i.l.bf16 %v4859_v63 }
 0x680   : > { %6762 = vst [vmem:[#allocation36_spill] sm:$0xff] %v5228_v26  ;;  %6764 = vst [vmem:[#allocation37_spill] sm:$0xff] %v5234_v19  ;;  %v3873_v16 = vunpack.i.h.bf16 %v3871_v23  ;;  %v3872_v47 = vunpack.i.l.bf16 %v3871_v23 }
 0x681   : > { %v5245_v42 = vsel %vm6766_vm4, %v3868_v6, %v6765_v39  ;;  %vm6768_vm9 = vmmov %vm6766_vm4 }
 0x682   : > { %6767 = vst [vmem:[#allocation38_spill] sm:$0xff] %v5245_v42  ;;  %v5249_v0 = vsel %vm6768_vm9, %v3867_v28, %v3868_v6  ;;  %vm6771_vm15 = vmmov %vm6766_vm4  ;;  %v2036_v40 = vrot.slane %v5245_v42, 2  ;;  %v2040_v57 = vrot.slane %v5245_v42, 3  ;;  %vm6781_vm9 = vcmp.lt.s32.totalorder %v4074_v18, 112 }
 0x683   : > { %6769 = vst [vmem:[#allocation39_spill] sm:$0xff] %v5249_v0  ;;  %v5255_v58 = vsel %vm6771_vm15, %v6770_v46, %v3867_v28  ;;  %v2044_v28 = vrot.slane %v5245_v42, 4  ;;  %vm6775_vm6 = vmmov %vm6760_vm1 }
 0x684   : > { %6772 = vst [vmem:[#allocation40_spill] sm:$0xff] %v5255_v58  ;;  %v2034_v55 = vrot.slane %v5255_v58, 2  ;;  %v2038_v27 = vrot.slane %v5255_v58, 3  ;;  %v2042_v6 = vrot.slane %v5255_v58, 4  ;;  %v5274_v39 = vsel %vm512_vm7, %v2036_v40, 0.0  ;;  %vm6778_vm4 = vmmov %vm6760_vm1 }
 0x685   : > { %6774 = vst [vmem:[#allocation42_spill] sm:$0xff] %v5274_v39  ;;  %v5282_v52 = vsel %vm512_vm7, %v2040_v57, 0.0  ;;  %v5290_v32 = vsel %vm512_vm7, %v2044_v28, 0.0  ;;  %vm6783_vm15 = vmmov %vm6781_vm9 }
 0x686   : > { %v5268_v46 = vsel %vm6760_vm1, %v2034_v55, 0.0  ;;  %v5278_v23 = vsel %vm6775_vm6, %v2038_v27, 0.0  ;;  %6777 = vst [vmem:[#allocation44_spill] sm:$0xff] %v5282_v52  ;;  %v5286_v55 = vsel %vm6778_vm4, %v2042_v6, 0.0  ;;  %6780 = vst [vmem:[#allocation46_spill] sm:$0xff] %v5290_v32  ;;  %v5296_v27 = vsel %vm6781_vm9, %v3873_v16, %v3858_v30  ;;  %v5351_v32 = vpop.permute.xlu0 %2238 }
 0x687   : > { %6773 = vst [vmem:[#allocation41_spill] sm:$0xff] %v5268_v46  ;;  %6776 = vst [vmem:[#allocation43_spill] sm:$0xff] %v5278_v23  ;;  %v5300_v57 = vsel %vm6783_vm15, %v3872_v47, %v3873_v16  ;;  %v2144_v5 = vrot.slane %v5296_v27, 1  ;;  %v2148_v25 = vrot.slane %v5296_v27, 2  ;;  %v5321_v23 = vpop.permute.xlu1 %3875  ;;  %vm6795_vm15 = vcmp.lt.s32.totalorder %v4074_v18, 111 }
 0x688   : > { %6779 = vst [vmem:[#allocation45_spill] sm:$0xff] %v5286_v55  ;;  %6782 = vst [vmem:[#allocation47_spill] sm:$0xff] %v5296_v27  ;;  %v3878_v58 = vunpack.i.h.bf16 %v5321_v23  ;;  %v1515_v55 = vrot.slane %v4936_v22, 6 }
 0x689   : > { %6784 = vst [vmem:[#allocation48_spill] sm:$0xff] %v5300_v57  ;;  %vm6785_vm1 = vmmov %vm6781_vm9  ;;  %v5326_v30 = vsel %vm512_vm7, %v2144_v5, 0.0 }
 0x68a   : > { %v5304_v6 = vsel %vm6785_vm1, %v3857_v3, %v3872_v47  ;;  %v2152_v47 = vrot.slane %v5296_v27, 3  ;;  %vm6787_vm6 = vmmov %vm6778_vm4  ;;  %6789 = vst [vmem:[#allocation51_spill] sm:$0xff] %v5326_v30  ;;  %v5334_v3 = vsel %vm512_vm7, %v2148_v25, 0.0  ;;  %v6502_v25 = vunpack.i.l.bf16 %v5321_v23  ;;  %v6952_v50 = vld [vmem:[#allocation39_spill] sm:$0xff] }
 0x68b   : > { %6786 = vst [vmem:[#allocation49_spill] sm:$0xff] %v5304_v6  ;;  %v2142_v28 = vrot.slane %v5304_v6, 1  ;;  %v2146_v40 = vrot.slane %v5304_v6, 2  ;;  %v2150_v16 = vrot.slane %v5304_v6, 3  ;;  %6791 = vst [vmem:[#allocation53_spill] sm:$0xff] %v5334_v3  ;;  %v6808_v27 = vrot.slane %v4936_v22, 2 }
 0x68c   : > { %vm6792_vm9 = vmmov %vm6778_vm4  ;;  %v5343_v35 = vsel %vm512_vm7, %v2152_v47, 0.0  ;;  %v1511_v47 = vrot.slane %v4936_v22, 5  ;;  %v5360_v6 = vsel %vm6795_vm15, %v6502_v25, %v3878_v58  ;;  %v6800_v25 = vrot.slane %v4936_v22, 1 }
 0x68d   : > { %v5319_v63 = vsel %vm6787_vm6, %v2142_v28, 0.0  ;;  %v5330_v46 = vsel %vm6778_vm4, %v2146_v40, 0.0  ;;  %v5339_v28 = vsel %vm6792_vm9, %v2150_v16, 0.0  ;;  %6794 = vst [vmem:[#allocation55_spill] sm:$0xff] %v5343_v35  ;;  %v1503_v16 = vrot.slane %v4936_v22, 3  ;;  %6796 = vst [vmem:[#allocation56_spill] sm:$0xff] %v5360_v6 }
 0x68e   : > { %6788 = vst [vmem:[#allocation50_spill] sm:$0xff] %v5319_v63  ;;  %6790 = vst [vmem:[#allocation52_spill] sm:$0xff] %v5330_v46  ;;  %v1519_v40 = vrot.slane %v4936_v22, 7  ;;  %vm6799_vm6 = vcmp.gt.f32.partialorder %v4061_v13, 0.5  ;;  %vm6802_vm9 = vcmp.gt.f32.partialorder %v4084_v24, 0.5  ;;  %v1619_v24 = vrot.slane %v4960_v45, 4 }
 0x68f   : > { %6793 = vst [vmem:[#allocation54_spill] sm:$0xff] %v5339_v28  ;;  %v1507_v28 = vrot.slane %v4936_v22, 4  ;;  %vm6797_vm1 = vmmov %vm6795_vm15  ;;  %v1555_v35 = vsel %vm6799_vm6, %v4936_v22, 0.0  ;;  %v1611_v22 = vrot.slane %v4960_v45, 2 }
 0x690   : > { %v5365_v5 = vsel %vm6797_vm1, %v3878_v58, %v5351_v32  ;;  %vm6801_vm4 = vmmov %vm6799_vm6 }
 0x691   : > { %6798 = vst [vmem:[#allocation57_spill] sm:$0xff] %v5365_v5  ;;  %v2257_v46 = vrot.slane %v5365_v5, 1  ;;  %v2261_v63 = vrot.slane %v5365_v5, 2  ;;  %v1559_v3 = vsel %vm6801_vm4, %v6800_v25, 0.0  ;;  %v2265_v52 = vrot.slane %v5365_v5, 3  ;;  %vm6803_vm15 = vmmov %vm6802_vm9 }
 0x692   : > { %v5386_v42 = vsel %vm6802_vm9, %v5365_v5, 0.0  ;;  %vm6804_vm1 = vmmov %vm6802_vm9  ;;  %v1563_v39 = vsel %vm6801_vm4, %v6808_v27, 0.0  ;;  %v1615_v27 = vrot.slane %v4960_v45, 3  ;;  %v1623_v5 = vrot.slane %v4960_v45, 5 }
 0x693   : > { %v5390_v57 = vsel %vm6803_vm15, %v2257_v46, 0.0  ;;  %v5394_v25 = vsel %vm6804_vm1, %v2261_v63, 0.0  ;;  %vm6806_vm6 = vmmov %vm6804_vm1  ;;  %v1627_v46 = vrot.slane %v4960_v45, 6  ;;  %v2401_v20 = vrot.slane %v1559_v3, 7 }
 0x694   : > { %6805 = vst [vmem:[#allocation58_spill] sm:$0xff] %v5394_v25  ;;  %v5398_v30 = vsel %vm6806_vm6, %v2265_v52, 0.0  ;;  %vm6809_vm9 = vmmov %vm6801_vm4  ;;  %v2403_v2 = vrot.slane %v1563_v39, 6 }
 0x695   : > { %6807 = vst [vmem:[#allocation59_spill] sm:$0xff] %v5398_v30  ;;  %v1567_v6 = vsel %vm6809_vm9, %v1503_v16, 0.0  ;;  %vm6810_vm15 = vmmov %vm6801_vm4  ;;  %v6817_v30 = vrot.slane %v4960_v45, 1  ;;  %v2402_v26 = vsel %vm2381_vm3, %v2401_v20, %v1555_v35  ;;  %v1508_v35 = vrot.slane %v4922_v54, 4 }
 0x696   : > { %v1571_v63 = vsel %vm6810_vm15, %v1507_v28, 0.0  ;;  %vm6811_vm1 = vmmov %vm6801_vm4  ;;  %v6814_v28 = vrot.slane %v4960_v45, 7  ;;  %v2405_v7 = vrot.slane %v1567_v6, 5  ;;  %v1512_v20 = vrot.slane %v4922_v54, 5 }
 0x697   : > { %v1575_v52 = vsel %vm6811_vm1, %v1511_v47, 0.0  ;;  %vm6812_vm6 = vmmov %vm6811_vm1  ;;  %v1671_v25 = vsel %vm6811_vm1, %v6817_v30, 0.0  ;;  %v2407_v4 = vrot.slane %v1571_v63, 4 }
 0x698   : > { %v1579_v58 = vsel %vm6812_vm6, %v1515_v55, 0.0  ;;  %vm6813_vm4 = vmmov %vm6811_vm1  ;;  %v2409_v30 = vrot.slane %v1575_v52, 3  ;;  %v2495_v21 = vrot.slane %v1671_v25, 7  ;;  %v1572_v52 = vsel %vm512_vm7, %v1508_v35, 0.0 }
 0x699   : > { %v1583_v16 = vsel %vm6813_vm4, %v1519_v40, 0.0  ;;  %vm6815_vm9 = vmmov %vm6811_vm1  ;;  %v2421_v35 = vrot.slane %v1572_v52, 4 }
 0x69a   : > { %v1663_v47 = vsel %vm6815_vm9, %v6814_v28, 0.0  ;;  %vm6816_vm15 = vmmov %vm6811_vm1  ;;  %v2413_v34 = vrot.slane %v1583_v16, 1  ;;  %v1576_v16 = vsel %vm512_vm7, %v1512_v20, 0.0 }
 0x69b   : > { %v1667_v55 = vsel %vm6816_vm15, %v4960_v45, 0.0  ;;  %vm6818_vm6 = vmmov %vm6811_vm1  ;;  %v2493_v44 = vrot.slane %v1663_v47, 1  ;;  %v2423_v20 = vrot.slane %v1576_v16, 3 }
 0x69c   : > { %v1675_v40 = vsel %vm6818_vm6, %v1611_v22, 0.0  ;;  %vm6819_vm4 = vmmov %vm6811_vm1  ;;  %v2411_v22 = vrot.slane %v1579_v58, 2 }
 0x69d   : > { %v1679_v0 = vsel %vm6819_vm4, %v1615_v27, 0.0  ;;  %vm6820_vm8 = vmmov %vm6811_vm1  ;;  %v2404_v27 = vsel %vm2384_vm2, %v2403_v2, %v2402_v26  ;;  %v2494_v39 = vsel %vm2381_vm3, %v1667_v55, %v2493_v44  ;;  %v1516_v26 = vrot.slane %v4922_v54, 6 }
 0x69e   : > { %v1683_v19 = vsel %vm6820_vm8, %v1619_v24, 0.0  ;;  %vm6821_vm9 = vmmov %vm6811_vm1  ;;  %v2497_v24 = vrot.slane %v1675_v40, 6  ;;  %v2499_v37 = vrot.slane %v1679_v0, 5  ;;  %v1620_v55 = vrot.slane %v4946_v48, 4 }
 0x69f   : > { %v1687_v28 = vsel %vm6821_vm9, %v1623_v5, 0.0  ;;  %vm6822_vm15 = vmmov %vm6811_vm1  ;;  %v2406_v5 = vsel %vm2387_vm14, %v2405_v7, %v2404_v27  ;;  %v2501_v3 = vrot.slane %v1683_v19, 4  ;;  %v1520_v7 = vrot.slane %v4922_v54, 7 }
 0x6a0   : > { %v1691_v45 = vsel %vm6822_vm15, %v1627_v46, 0.0  ;;  %v2503_v29 = vrot.slane %v1687_v28, 3  ;;  %v2408_v6 = vsel %vm2390_vm5, %v2407_v4, %v2406_v5  ;;  %v2496_v46 = vsel %vm2384_vm2, %v2495_v21, %v2494_v39 }
 0x6a1   : > { %v2410_v58 = vsel %vm2393_vm11, %v2409_v30, %v2408_v6  ;;  %v2498_v2 = vsel %vm2387_vm14, %v2497_v24, %v2496_v46  ;;  %v2505_v0 = vrot.slane %v1691_v45, 2  ;;  %v6823_v4 = vrot.slane %v4922_v54, 3 }
 0x6a2   : > { %v2412_v44 = vsel %vm2396_vm13, %v2411_v22, %v2410_v58  ;;  %v2500_v19 = vsel %vm2390_vm5, %v2499_v37, %v2498_v2  ;;  %v1580_v37 = vsel %vm512_vm7, %v1516_v26, 0.0  ;;  %v1616_v54 = vrot.slane %v4946_v48, 3 }
 0x6a3   : > { %v1568_v21 = vsel %vm512_vm7, %v6823_v4, 0.0  ;;  %v2414_v25 = vsel %vm2399_vm0, %v2413_v34, %v2412_v44  ;;  %v2502_v63 = vsel %vm2393_vm11, %v2501_v3, %v2500_v19  ;;  %v1584_v34 = vsel %vm512_vm7, %v1520_v7, 0.0 }
 0x6a4   : > { %v2504_v47 = vsel %vm2396_vm13, %v2503_v29, %v2502_v63  ;;  %v1624_v28 = vrot.slane %v4946_v48, 5  ;;  %v1628_v45 = vrot.slane %v4946_v48, 6  ;;  %v6824_v22 = vrot.slane %v4946_v48, 2 }
 0x6a5   : > { %v2506_v40 = vsel %vm2399_vm0, %v2505_v0, %v2504_v47  ;;  %v1680_v27 = vsel %vm512_vm7, %v1616_v54, 0.0  ;;  %v6825_v24 = vrot.slane %v4955_v43, 7  ;;  %v1684_v39 = vsel %vm512_vm7, %v1620_v55, 0.0 }
 0x6a6   : > { %v3092_v30 = vpack.c.bf16 %v2506_v40, %v2414_v25  ;;  %v1676_v29 = vsel %vm512_vm7, %v6824_v22, 0.0  ;;  %v1688_v3 = vsel %vm512_vm7, %v1624_v28, 0.0  ;;  %v1692_v48 = vsel %vm512_vm7, %v1628_v45, 0.0 }
 0x6a7   : > { %v2416_v5 = vsel %vm2381_vm3, %v6825_v24, %v4951_v56  ;;  %v2417_v6 = vrot.slane %v4964_v38, 6  ;;  %v2419_v46 = vrot.slane %v1568_v21, 5  ;;  %v2425_v58 = vrot.slane %v1580_v37, 2 }
 0x6a8   : > { %3137 = vmatprep.subr.bf16.mxu1 %v3092_v30  ;;  %v2427_v2 = vrot.slane %v1584_v34, 1  ;;  %v6826_v56 = vrot.slane %v4990_v49, 1  ;;  %v2509_v7 = vrot.slane %v5005_v41, 7  ;;  %v2511_v19 = vrot.slane %v1676_v29, 6 }
 0x6a9   : > { %v2418_v43 = vsel %vm2384_vm2, %v2417_v6, %v2416_v5  ;;  %v2513_v0 = vrot.slane %v1680_v27, 5  ;;  %v2515_v38 = vrot.slane %v1684_v39, 4  ;;  %v2517_v25 = vrot.slane %v1688_v3, 3 }
 0x6aa   : > { %v2508_v26 = vsel %vm2381_vm3, %v4995_v36, %v6826_v56  ;;  %v2420_v44 = vsel %vm2387_vm14, %v2419_v46, %v2418_v43  ;;  %v1506_v63 = vrot.slane %v4940_v11, 4  ;;  %v1510_v36 = vrot.slane %v4940_v11, 5 }
 0x6ab   : > { %v2422_v4 = vsel %vm2390_vm5, %v2421_v35, %v2420_v44  ;;  %v2510_v21 = vsel %vm2384_vm2, %v2509_v7, %v2508_v26  ;;  %v1514_v41 = vrot.slane %v4940_v11, 6  ;;  %v2519_v37 = vrot.slane %v1692_v48, 2 }
 0x6ac   : > { %v2424_v52 = vsel %vm2393_vm11, %v2423_v20, %v2422_v4  ;;  %v2512_v49 = vsel %vm2387_vm14, %v2511_v19, %v2510_v21  ;;  %v1518_v54 = vrot.slane %v4940_v11, 7  ;;  %v6827_v34 = vrot.slane %v4940_v11, 3 }
 0x6ad   : > { %v2426_v16 = vsel %vm2396_vm13, %v2425_v58, %v2424_v52  ;;  %v2514_v47 = vsel %vm2390_vm5, %v2513_v0, %v2512_v49  ;;  %vm6828_vm8 = vcmp.gt.f32.partialorder %v4056_v12, 0.5  ;;  %v1614_v27 = vrot.slane %v5001_v62, 3 }
 0x6ae   : > { %v2428_v55 = vsel %vm2399_vm0, %v2427_v2, %v2426_v16  ;;  %v2516_v40 = vsel %vm2393_vm11, %v2515_v38, %v2514_v47  ;;  %v1566_v28 = vsel %vm6828_vm8, %v6827_v34, 0.0  ;;  %vm6829_vm1 = vmmov %vm6828_vm8  ;;  %v1618_v11 = vrot.slane %v5001_v62, 4 }
 0x6af   : > { %v1570_v45 = vsel %vm6829_vm1, %v1506_v63, 0.0  ;;  %v2518_v30 = vsel %vm2396_vm13, %v2517_v25, %v2516_v40  ;;  %vm6830_vm6 = vmmov %vm6829_vm1  ;;  %v1622_v5 = vrot.slane %v5001_v62, 5  ;;  %v1626_v39 = vrot.slane %v5001_v62, 6 }
 0x6b0   : > { %v1574_v22 = vsel %vm6830_vm6, %v1510_v36, 0.0  ;;  %vm6831_vm4 = vmmov %vm6829_vm1  ;;  %v2520_v24 = vsel %vm2399_vm0, %v2519_v37, %v2518_v30  ;;  %v6833_v6 = vrot.slane %v5001_v62, 2  ;;  %v6835_v35 = vrot.slane %v4972_v8, 7 }
 0x6b1   : > { %v1578_v29 = vsel %vm6831_vm4, %v1514_v41, 0.0  ;;  %v3093_v3 = vpack.c.bf16 %v2520_v24, %v2428_v55  ;;  %vm6832_vm9 = vmmov %vm6829_vm1  ;;  %v1682_v43 = vsel %vm6829_vm1, %v1618_v11, 0.0  ;;  %v2383_v56 = vrot.slane %v4984_v9, 6 }
 0x6b2   : > { %v1582_v48 = vsel %vm6832_vm9, %v1518_v54, 0.0  ;;  %vm6834_vm15 = vmmov %vm6829_vm1  ;;  %v2382_v20 = vsel %vm2381_vm3, %v6835_v35, %v4980_v10  ;;  %v2386_v26 = vrot.slane %v1566_v28, 5  ;;  %v2389_v7 = vrot.slane %v1570_v45, 4 }
 0x6b3   : > { %v1674_v46 = vsel %vm6834_vm15, %v6833_v6, 0.0  ;;  %vm6836_vm8 = vmmov %vm6829_vm1  ;;  %3179 = vmatpush1.bf16.msra.mxu0 %v3093_v3  ;;  %v2392_v8 = vrot.slane %v1574_v22, 3  ;;  %v2385_v10 = vsel %vm2384_vm2, %v2383_v56, %v2382_v20  ;;  %v2395_v44 = vrot.slane %v1578_v29, 2 }
 0x6b4   : > { %v1678_v58 = vsel %vm6836_vm8, %v1614_v27, 0.0  ;;  %vm6837_vm6 = vmmov %vm6829_vm1  ;;  %v6839_v19 = vrot.slane %v5015_v60, 1  ;;  %v2481_v38 = vrot.slane %v5024_v15, 7  ;;  %v2388_v4 = vsel %vm2387_vm14, %v2386_v26, %v2385_v10 }
 0x6b5   : > { %v1686_v2 = vsel %vm6837_vm6, %v1622_v5, 0.0  ;;  %vm6838_vm4 = vmmov %vm6829_vm1  ;;  %v2398_v9 = vrot.slane %v1582_v48, 1  ;;  %v2483_v21 = vrot.slane %v1674_v46, 6  ;;  %v2485_v25 = vrot.slane %v1678_v58, 5 }
 0x6b6   : > { %v1690_v62 = vsel %vm6838_vm4, %v1626_v39, 0.0  ;;  %v2480_v0 = vsel %vm2381_vm3, %v5020_v17, %v6839_v19  ;;  %v2391_v63 = vsel %vm2390_vm5, %v2389_v7, %v2388_v4  ;;  %v2487_v49 = vrot.slane %v1682_v43, 4 }
 0x6b7   : > { %v2482_v52 = vsel %vm2384_vm2, %v2481_v38, %v2480_v0  ;;  %v2489_v36 = vrot.slane %v1686_v2, 3  ;;  %v2394_v41 = vsel %vm2393_vm11, %v2392_v8, %v2391_v63  ;;  %v1721_v16 = vrot.slane %v4855_v53, 1 }
 0x6b8   : > { %v2484_v60 = vsel %vm2387_vm14, %v2483_v21, %v2482_v52  ;;  %v1725_v17 = vrot.slane %v4855_v53, 2  ;;  %v2397_v15 = vsel %vm2396_vm13, %v2395_v44, %v2394_v41  ;;  %v1729_v37 = vrot.slane %v4855_v53, 3 }
 0x6b9   : > { %v2486_v47 = vsel %vm2390_vm5, %v2485_v25, %v2484_v60  ;;  %v1733_v54 = vrot.slane %v4855_v53, 4  ;;  %v2400_v55 = vsel %vm2399_vm0, %v2398_v9, %v2397_v15  ;;  %v2491_v34 = vrot.slane %v1690_v62, 2 }
 0x6ba   : > { %v2488_v40 = vsel %vm2393_vm11, %v2487_v49, %v2486_v47  ;;  %v1737_v28 = vrot.slane %v4855_v53, 5  ;;  %v6840_v30 = vrot.slane %v4855_v53, 6  ;;  %v6841_v29 = vrot.slane %v4855_v53, 7 }
 0x6bb   : > { %v2490_v45 = vsel %vm2396_vm13, %v2489_v36, %v2488_v40  ;;  %v1781_v24 = vsel %vm513_vm10, %v4855_v53, 0.0  ;;  %v1785_v5 = vsel %vm513_vm10, %v1721_v16, 0.0  ;;  %v1789_v39 = vsel %vm513_vm10, %v1725_v17, 0.0  ;;  %v2241_v36 = vpop.permute.xlu1 %2240 }
 0x6bc   : > { %v1773_v22 = vsel %vm513_vm10, %v6840_v30, 0.0  ;;  %v1777_v27 = vsel %vm513_vm10, %v6841_v29, 0.0  ;;  %v2492_v11 = vsel %vm2399_vm0, %v2491_v34, %v2490_v45  ;;  %v1793_v3 = vsel %vm513_vm10, %v1729_v37, 0.0 }
 0x6bd   : > { %v3091_v48 = vpack.c.bf16 %v2492_v11, %v2400_v55  ;;  %v1797_v6 = vsel %vm513_vm10, %v1733_v54, 0.0  ;;  %v1833_v46 = vrot.slane %v4847_v51, 1  ;;  %v1837_v35 = vrot.slane %v4847_v51, 2 }
 0x6be   : > { %v1801_v53 = vsel %vm513_vm10, %v1737_v28, 0.0  ;;  %v1841_v20 = vrot.slane %v4847_v51, 3  ;;  %v1845_v58 = vrot.slane %v4847_v51, 4  ;;  %v6842_v43 = vrot.slane %v4847_v51, 5 }
 0x6bf   : > { %3138 = vmatpush1.bf16.msra.mxu1 %v3091_v48  ;;  %v6843_v56 = vrot.slane %v4847_v51, 6  ;;  %v6844_v26 = vrot.slane %v4847_v51, 7  ;;  %v1893_v8 = vsel %vm513_vm10, %v4847_v51, 0.0  ;;  %v1897_v10 = vsel %vm513_vm10, %v1833_v46, 0.0 }
 0x6c0   : > { %v1881_v2 = vsel %vm513_vm10, %v6842_v43, 0.0  ;;  %v1901_v44 = vsel %vm513_vm10, %v1837_v35, 0.0  ;;  %v1905_v19 = vsel %vm513_vm10, %v1841_v20, 0.0  ;;  %v2613_v0 = vrot.slane %v1773_v22, 2 }
 0x6c1   : > { %v1885_v62 = vsel %vm513_vm10, %v6843_v56, 0.0  ;;  %v1889_v7 = vsel %vm513_vm10, %v6844_v26, 0.0  ;;  %v2614_v38 = vrot.slane %v1777_v27, 1  ;;  %v1909_v4 = vsel %vm513_vm10, %v1845_v58, 0.0 }
 0x6c2   : > { %v2617_v9 = vrot.slane %v1785_v5, 7  ;;  %v2619_v21 = vrot.slane %v1789_v39, 6  ;;  %v2621_v25 = vrot.slane %v1793_v3, 5  ;;  %v2623_v51 = vrot.slane %v1797_v6, 4 }
 0x6c3   : > { %v2615_v63 = vsel %vm2381_vm3, %v2614_v38, %v2613_v0  ;;  %v2705_v52 = vrot.slane %v1881_v2, 3  ;;  %v2706_v49 = vrot.slane %v1885_v62, 2  ;;  %v2625_v60 = vrot.slane %v1801_v53, 3 }
 0x6c4   : > { %v2616_v41 = vsel %vm2384_vm2, %v1781_v24, %v2615_v63  ;;  %v2708_v16 = vrot.slane %v1889_v7, 1  ;;  %v2711_v17 = vrot.slane %v1897_v10, 7  ;;  %v2713_v37 = vrot.slane %v1901_v44, 6 }
 0x6c5   : > { %v2618_v15 = vsel %vm2387_vm14, %v2617_v9, %v2616_v41  ;;  %v2707_v47 = vsel %vm2381_vm3, %v2706_v49, %v2705_v52  ;;  %v2715_v54 = vrot.slane %v1905_v19, 5  ;;  %vm6845_vm9 = vcmp.lt.s32.totalorder %v4074_v18, 111 }
 0x6c6   : > { %v2620_v55 = vsel %vm2390_vm5, %v2619_v21, %v2618_v15  ;;  %v2709_v40 = vsel %vm2384_vm2, %v2708_v16, %v2707_v47  ;;  %v5627_v34 = vsel %vm6845_vm9, %v5351_v32, %v2241_v36  ;;  %v6846_v28 = vunpack.i.l.bf16 %v5321_v23  ;;  %vm6847_vm15 = vmmov %vm6845_vm9 }
 0x6c7   : > { %v2622_v30 = vsel %vm2393_vm11, %v2621_v25, %v2620_v55  ;;  %v2710_v22 = vsel %vm2387_vm14, %v1893_v8, %v2709_v40  ;;  %v2258_v29 = vrot.slane %v5627_v34, 1  ;;  %v2262_v32 = vrot.slane %v5627_v34, 2 }
 0x6c8   : > { %v5633_v45 = vsel %vm6847_vm15, %v2241_v36, %v6846_v28  ;;  %v2624_v24 = vsel %vm2396_vm13, %v2623_v51, %v2622_v30  ;;  %v2712_v11 = vsel %vm2390_vm5, %v2711_v17, %v2710_v22  ;;  %v2717_v3 = vrot.slane %v1909_v4, 4 }
 0x6c9   : > { %v2259_v27 = vrot.slane %v5633_v45, 1  ;;  %v2263_v23 = vrot.slane %v5633_v45, 2  ;;  %v2626_v5 = vsel %vm2399_vm0, %v2625_v60, %v2624_v24  ;;  %v2714_v39 = vsel %vm2393_vm11, %v2713_v37, %v2712_v11 }
 0x6ca   : > { %v2267_v48 = vrot.slane %v5633_v45, 3  ;;  %v6848_v6 = vrot.slane %v5390_v57, 7  ;;  %v2716_v35 = vsel %vm2396_vm13, %v2715_v54, %v2714_v39  ;;  %v2266_v53 = vrot.slane %v5627_v34, 3 }
 0x6cb   : > { %v2270_v20 = vrot.slane %v5627_v34, 4  ;;  %v2718_v58 = vsel %vm2399_vm0, %v2717_v3, %v2716_v35  ;;  %v2271_v43 = vrot.slane %v5633_v45, 4  ;;  %v2275_v2 = vrot.slane %v5633_v45, 5 }
 0x6cc   : > { %v5650_v46 = vsel %vm2381_vm3, %v6848_v6, %v5386_v42  ;;  %v5660_v56 = vsel %vm516_vm12, %v2258_v29, 0.0  ;;  %v3098_v57 = vpack.c.bf16 %v2718_v58, %v2626_v5  ;;  %vm6849_vm8 = vcmp.gt.f32.partialorder %v4653_v33, 0.5 }
 0x6cd   : > { %v2323_v42 = vsel %vm6849_vm8, %v2259_v27, 0.0  ;;  %v5666_v62 = vsel %vm516_vm12, %v2262_v32, 0.0  ;;  %vm6850_vm1 = vmmov %vm6849_vm8  ;;  %v3059_v10 = vrot.slane %v5660_v56, 7  ;;  %v1719_v38 = vrot.slane %v5034_v59, 1  ;;  %v3111_v56 = vld [vmem:[%s6435_s11] sm:$0x1] }
 0x6ce   : > { %v5670_v26 = vsel %vm6850_vm1, %v2263_v23, 0.0  ;;  %vm6851_vm6 = vmmov %vm6850_vm1  ;;  %v3073_v44 = vrot.slane %v2323_v42, 7  ;;  %3180 = vmatprep.subr.bf16.mxu0 %v3098_v57  ;;  %v3061_v19 = vrot.slane %v5666_v62, 6  ;;  %v1723_v4 = vrot.slane %v5034_v59, 2 }
 0x6cf   : > { %v2319_v7 = vsel %vm6851_vm6, %v5633_v45, 0.0  ;;  %vm6852_vm4 = vmmov %vm6850_vm1  ;;  %v3075_v0 = vrot.slane %v5670_v26, 6  ;;  %v1727_v21 = vrot.slane %v5034_v59, 3  ;;  %v1731_v25 = vrot.slane %v5034_v59, 4 }
 0x6d0   : > { %v5677_v8 = vsel %vm6852_vm4, %v2267_v48, 0.0  ;;  %v1735_v63 = vrot.slane %v5034_v59, 5  ;;  %v5689_v51 = vsel %vm2381_vm3, %v3073_v44, %v2319_v7  ;;  %v6853_v52 = vrot.slane %v5034_v59, 6 }
 0x6d1   : > { %v3077_v9 = vrot.slane %v5677_v8, 5  ;;  %vm6854_vm9 = vcmp.gt.f32.partialorder %v4061_v13, 0.5  ;;  %v6855_v36 = vrot.slane %v5034_v59, 7  ;;  %v1831_v37 = vrot.slane %v5082_v31, 1 }
 0x6d2   : > { %v1771_v49 = vsel %vm6854_vm9, %v6853_v52, 0.0  ;;  %vm6856_vm15 = vmmov %vm6854_vm9  ;;  %v1835_v54 = vrot.slane %v5082_v31, 2  ;;  %v1839_v55 = vrot.slane %v5082_v31, 3  ;;  %v6863_v28 = vrot.slane %v5082_v31, 5 }
 0x6d3   : > { %v1775_v41 = vsel %vm6856_vm15, %v6855_v36, 0.0  ;;  %vm6857_vm8 = vmmov %vm6854_vm9  ;;  %v6865_v22 = vrot.slane %v5082_v31, 6  ;;  %v6866_v27 = vrot.slane %v5082_v31, 7  ;;  %v2585_v3 = vrot.slane %v1771_v49, 2 }
 0x6d4   : > { %v1779_v60 = vsel %vm6857_vm8, %v5034_v59, 0.0  ;;  %vm6858_vm1 = vmmov %vm6857_vm8  ;;  %v1843_v59 = vrot.slane %v5082_v31, 4  ;;  %v2586_v48 = vrot.slane %v1775_v41, 1  ;;  %v1724_v36 = vrot.slane %v5030_v14, 2 }
 0x6d5   : > { %v1783_v16 = vsel %vm6858_vm1, %v1719_v38, 0.0  ;;  %vm6859_vm6 = vmmov %vm6858_vm1  ;;  %v1883_v29 = vsel %vm6858_vm1, %v6865_v22, 0.0  ;;  %v1728_v41 = vrot.slane %v5030_v14, 3 }
 0x6d6   : > { %v1787_v17 = vsel %vm6859_vm6, %v1723_v4, 0.0  ;;  %vm6860_vm4 = vmmov %vm6858_vm1  ;;  %v1907_v39 = vsel %vm6858_vm1, %v1843_v59, 0.0  ;;  %v2589_v6 = vrot.slane %v1783_v16, 7  ;;  %v2678_v44 = vrot.slane %v1883_v29, 2 }
 0x6d7   : > { %v1791_v15 = vsel %vm6860_vm4, %v1727_v21, 0.0  ;;  %vm6861_vm9 = vmmov %vm6858_vm1  ;;  %v2591_v35 = vrot.slane %v1787_v17, 6  ;;  %v1788_v22 = vsel %vm512_vm7, %v1724_v36, 0.0 }
 0x6d8   : > { %v1795_v47 = vsel %vm6861_vm9, %v1731_v25, 0.0  ;;  %vm6862_vm15 = vmmov %vm6858_vm1  ;;  %v2593_v58 = vrot.slane %v1791_v15, 5  ;;  %v2689_v15 = vrot.slane %v1907_v39, 4 }
 0x6d9   : > { %v1799_v40 = vsel %vm6862_vm15, %v1735_v63, 0.0  ;;  %vm6864_vm8 = vmmov %vm6858_vm1  ;;  %v2595_v57 = vrot.slane %v1795_v47, 4  ;;  %v1732_v47 = vrot.slane %v5030_v14, 4 }
 0x6da   : > { %v1879_v30 = vsel %vm6864_vm8, %v6863_v28, 0.0  ;;  %vm6867_vm6 = vmmov %vm6858_vm1  ;;  %v2597_v7 = vrot.slane %v1799_v40, 3  ;;  %v6872_v28 = vrot.slane %v5030_v14, 1 }
 0x6db   : > { %v1887_v24 = vsel %vm6867_vm6, %v6866_v27, 0.0  ;;  %vm6868_vm4 = vmmov %vm6858_vm1  ;;  %v2677_v42 = vrot.slane %v1879_v30, 3  ;;  %vm6884_vm6 = vcmp.gt.f32.partialorder %v4056_v12, 0.5 }
 0x6dc   : > { %v1891_v11 = vsel %vm6868_vm4, %v5082_v31, 0.0  ;;  %vm6869_vm9 = vmmov %vm6858_vm1  ;;  %v2587_v31 = vsel %vm2381_vm3, %v2586_v48, %v2585_v3  ;;  %v2680_v38 = vrot.slane %v1887_v24, 1  ;;  %v1784_v30 = vsel %vm512_vm7, %v6872_v28, 0.0 }
 0x6dd   : > { %v1895_v32 = vsel %vm6869_vm9, %v1831_v37, 0.0  ;;  %vm6870_vm15 = vmmov %vm6858_vm1  ;;  %v2588_v4 = vsel %vm2384_vm2, %v1779_v60, %v2587_v31  ;;  %v2679_v49 = vsel %vm2381_vm3, %v2678_v44, %v2677_v42  ;;  %v1792_v24 = vsel %vm512_vm7, %v1728_v41, 0.0 }
 0x6de   : > { %v1899_v23 = vsel %vm6870_vm15, %v1835_v54, 0.0  ;;  %vm6871_vm8 = vmmov %vm6858_vm1  ;;  %v2683_v21 = vrot.slane %v1895_v32, 7  ;;  %v2590_v52 = vsel %vm2387_vm14, %v2589_v6, %v2588_v4  ;;  %v2681_v17 = vsel %vm2384_vm2, %v2680_v38, %v2679_v49 }
 0x6df   : > { %v1903_v5 = vsel %vm6871_vm8, %v1839_v55, 0.0  ;;  %v2685_v25 = vrot.slane %v1899_v23, 6  ;;  %v2592_v16 = vsel %vm2390_vm5, %v2591_v35, %v2590_v52  ;;  %v2682_v37 = vsel %vm2387_vm14, %v1891_v11, %v2681_v17  ;;  %v6873_v23 = vld [vmem:[#allocation19_spill] sm:$0xff]  ;;  %v6874_v35 = vld [vmem:[#allocation16_spill] sm:$0xff]  ;;  %vm6886_vm4 = vmmov %vm6884_vm6 }
 0x6e0   : > { %v2687_v63 = vrot.slane %v1903_v5, 5  ;;  %v2594_v60 = vsel %vm2393_vm11, %v2593_v58, %v2592_v16  ;;  %v1736_v54 = vrot.slane %v5030_v14, 5  ;;  %v1780_v55 = vsel %vm512_vm7, %v5030_v14, 0.0  ;;  %v6878_v16 = vld [vmem:[#allocation22_spill] sm:$0xff]  ;;  %vm6887_vm9 = vmmov %vm6886_vm4 }
 0x6e1   : > { %v2596_v59 = vsel %vm2396_vm13, %v2595_v57, %v2594_v60  ;;  %v2684_v40 = vsel %vm2390_vm5, %v2683_v21, %v2682_v37  ;;  %v1796_v11 = vsel %vm512_vm7, %v1732_v47, 0.0  ;;  %v1832_v14 = vrot.slane %v6873_v23, 1  ;;  %v6876_v57 = vld [vmem:[#allocation17_spill] sm:$0xff]  ;;  %vm6888_vm15 = vmmov %vm6886_vm4 }
 0x6e2   : > { %v2598_v29 = vsel %vm2399_vm0, %v2597_v7, %v2596_v59  ;;  %v2686_v27 = vsel %vm2393_vm11, %v2685_v25, %v2684_v40  ;;  %v1836_v5 = vrot.slane %v6873_v23, 2  ;;  %v1840_v39 = vrot.slane %v6873_v23, 3  ;;  %v6882_v59 = vld [vmem:[#allocation24_spill] sm:$0xff]  ;;  %vm6889_vm8 = vmmov %vm6886_vm4 }
 0x6e3   : > { %v2688_v32 = vsel %vm2396_vm13, %v2687_v63, %v2686_v27  ;;  %v1800_v48 = vsel %vm512_vm7, %v1736_v54, 0.0  ;;  %v1844_v6 = vrot.slane %v6873_v23, 4  ;;  %v6875_v58 = vrot.slane %v6874_v35, 2  ;;  %v6883_v27 = vld [vmem:[#allocation15_spill] sm:$0xff]  ;;  %vm6891_vm1 = vmmov %vm6886_vm4 }
 0x6e4   : > { %v2690_v3 = vsel %vm2399_vm0, %v2689_v15, %v2688_v32  ;;  %v6877_v42 = vrot.slane %v6876_v57, 1  ;;  %v1892_v44 = vsel %vm512_vm7, %v6873_v23, 0.0  ;;  %v1896_v38 = vsel %vm512_vm7, %v1832_v14, 0.0  ;;  %v6880_v15 = vld [vmem:[#allocation23_spill] sm:$0xff] }
 0x6e5   : > { %v3096_v7 = vpack.c.bf16 %v2690_v3, %v2598_v29  ;;  %v1900_v4 = vsel %vm512_vm7, %v1836_v5, 0.0  ;;  %v1904_v21 = vsel %vm512_vm7, %v1840_v39, 0.0  ;;  %v1908_v25 = vsel %vm512_vm7, %v1844_v6, 0.0 }
 0x6e6   : > { %v2601_v31 = vsel %vm2381_vm3, %v6877_v42, %v6875_v58  ;;  %v2603_v52 = vrot.slane %v1784_v30, 7  ;;  %v2605_v49 = vrot.slane %v1788_v22, 6  ;;  %v2607_v36 = vrot.slane %v1792_v24, 5 }
 0x6e7   : > { %v2602_v63 = vsel %vm2384_vm2, %v1780_v55, %v2601_v31  ;;  %3139 = vmatprep.subr.bf16.mxu1 %v3096_v7  ;;  %v2609_v41 = vrot.slane %v1796_v11, 4  ;;  %v6879_v17 = vrot.slane %v6878_v16, 3  ;;  %v6881_v47 = vrot.slane %v6880_v15, 2 }
 0x6e8   : > { %v2604_v37 = vsel %vm2387_vm14, %v2603_v52, %v2602_v63  ;;  %v2611_v54 = vrot.slane %v1800_v48, 3  ;;  %v2694_v40 = vrot.slane %v6882_v59, 1  ;;  %v2697_v28 = vrot.slane %v1896_v38, 7 }
 0x6e9   : > { %v2693_v60 = vsel %vm2381_vm3, %v6881_v47, %v6879_v17  ;;  %v2606_v29 = vsel %vm2390_vm5, %v2605_v49, %v2604_v37  ;;  %v2699_v55 = vrot.slane %v1900_v4, 6  ;;  %v2701_v30 = vrot.slane %v1904_v21, 5  ;;  %v6890_v4 = vld [vmem:[#allocation21_spill] sm:$0xff]  ;;  %v6894_v17 = vld [vmem:[#allocation20_spill] sm:$0xff] }
 0x6ea   : > { %v1722_v22 = vrot.slane %v6883_v27, 2  ;;  %v2608_v24 = vsel %vm2393_vm11, %v2607_v36, %v2606_v29  ;;  %v2695_v11 = vsel %vm2384_vm2, %v2694_v40, %v2693_v60  ;;  %v1726_v32 = vrot.slane %v6883_v27, 3 }
 0x6eb   : > { %v1730_v23 = vrot.slane %v6883_v27, 4  ;;  %v2610_v14 = vsel %vm2396_vm13, %v2609_v41, %v2608_v24  ;;  %v2696_v5 = vsel %vm2387_vm14, %v1892_v44, %v2695_v11  ;;  %v2703_v39 = vrot.slane %v1908_v25, 4  ;;  %v6892_v41 = vld [vmem:[#allocation18_spill] sm:$0xff]  ;;  %v6901_v24 = vld [vmem:[#allocation25_spill] sm:$0xff] }
 0x6ec   : > { %v1734_v3 = vrot.slane %v6883_v27, 5  ;;  %v2612_v48 = vsel %vm2399_vm0, %v2611_v54, %v2610_v14  ;;  %v2698_v6 = vsel %vm2390_vm5, %v2697_v28, %v2696_v5  ;;  %v1778_v35 = vsel %vm6884_vm6, %v6883_v27, 0.0  ;;  %vm6896_vm6 = vmmov %vm6891_vm1 }
 0x6ed   : > { %v6885_v58 = vrot.slane %v6883_v27, 1  ;;  %v2700_v42 = vsel %vm2393_vm11, %v2699_v55, %v2698_v6  ;;  %v1786_v31 = vsel %vm6887_vm9, %v1722_v22, 0.0  ;;  %v1790_v7 = vsel %vm6888_vm15, %v1726_v32, 0.0  ;;  %vm6898_vm9 = vmmov %vm6891_vm1  ;;  %v6903_v32 = vld [vmem:[#allocation26_spill] sm:$0xff] }
 0x6ee   : > { %v1794_v44 = vsel %vm6889_vm8, %v1730_v23, 0.0  ;;  %v2702_v38 = vsel %vm2396_vm13, %v2701_v30, %v2700_v42  ;;  %v1830_v21 = vrot.slane %v6890_v4, 1  ;;  %v1834_v25 = vrot.slane %v6890_v4, 2  ;;  %vm6899_vm15 = vmmov %vm6891_vm1  ;;  %v6906_v42 = vld [vmem:[#allocation14_spill] sm:$0xff] }
 0x6ef   : > { %v1782_v57 = vsel %vm6886_vm4, %v6885_v58, 0.0  ;;  %v1838_v63 = vrot.slane %v6890_v4, 3  ;;  %v2704_v52 = vsel %vm2399_vm0, %v2703_v39, %v2702_v38  ;;  %v1798_v49 = vsel %vm6891_vm1, %v1734_v3, 0.0  ;;  %vm6897_vm4 = vmmov %vm6891_vm1  ;;  %v6905_v3 = vld [vmem:[#allocation27_spill] sm:$0xff] }
 0x6f0   : > { %v1842_v36 = vrot.slane %v6890_v4, 4  ;;  %v6893_v16 = vrot.slane %v6892_v41, 2  ;;  %v6895_v15 = vrot.slane %v6894_v17, 1  ;;  %v3097_v60 = vpack.c.bf16 %v2704_v52, %v2612_v48  ;;  %vm6900_vm8 = vmmov %vm6891_vm1 }
 0x6f1   : > { %v1890_v37 = vsel %vm6896_vm6, %v6890_v4, 0.0  ;;  %v1894_v54 = vsel %vm6897_vm4, %v1830_v21, 0.0  ;;  %v1898_v59 = vsel %vm6898_vm9, %v1834_v25, 0.0  ;;  %v1902_v40 = vsel %vm6899_vm15, %v1838_v63, 0.0 }
 0x6f2   : > { %v2573_v47 = vsel %vm2381_vm3, %v6895_v15, %v6893_v16  ;;  %v1906_v28 = vsel %vm6900_vm8, %v1842_v36, 0.0  ;;  %v2575_v55 = vrot.slane %v1782_v57, 7  ;;  %3181 = vmatpush1.bf16.msra.mxu0 %v3097_v60  ;;  %v2577_v30 = vrot.slane %v1786_v31, 6 }
 0x6f3   : > { %v2574_v29 = vsel %vm2384_vm2, %v1778_v35, %v2573_v47  ;;  %v2579_v27 = vrot.slane %v1790_v7, 5  ;;  %v2581_v22 = vrot.slane %v1794_v44, 4  ;;  %v6902_v11 = vrot.slane %v6901_v24, 3 }
 0x6f4   : > { %v6904_v23 = vrot.slane %v6903_v32, 2  ;;  %v2576_v5 = vsel %vm2387_vm14, %v2575_v55, %v2574_v29  ;;  %v2583_v39 = vrot.slane %v1798_v49, 3  ;;  %v2666_v48 = vrot.slane %v6905_v3, 1 }
 0x6f5   : > { %v2669_v6 = vrot.slane %v1894_v54, 7  ;;  %v2578_v58 = vsel %vm2390_vm5, %v2577_v30, %v2576_v5  ;;  %v2671_v35 = vrot.slane %v1898_v59, 6  ;;  %v2673_v57 = vrot.slane %v1902_v40, 5 }
 0x6f6   : > { %v2665_v14 = vsel %vm2381_vm3, %v6904_v23, %v6902_v11  ;;  %v1941_v31 = vrot.slane %v6906_v42, 6  ;;  %v2580_v7 = vsel %vm2393_vm11, %v2579_v27, %v2578_v58  ;;  %v1945_v38 = vrot.slane %v6906_v42, 7 }
 0x6f7   : > { %v2667_v44 = vsel %vm2384_vm2, %v2666_v48, %v2665_v14  ;;  %v1949_v4 = vrot.slane %v6906_v42, 1  ;;  %v2582_v21 = vsel %vm2396_vm13, %v2581_v22, %v2580_v7  ;;  %v1953_v63 = vrot.slane %v6906_v42, 2 }
 0x6f8   : > { %v2668_v25 = vsel %vm2387_vm14, %v1890_v37, %v2667_v44  ;;  %v6907_v52 = vrot.slane %v6906_v42, 3  ;;  %v2675_v41 = vrot.slane %v1906_v28, 4  ;;  %v6908_v16 = vrot.slane %v6906_v42, 4 }
 0x6f9   : > { %v2670_v36 = vsel %vm2390_vm5, %v2669_v6, %v2668_v25  ;;  %v6909_v15 = vrot.slane %v6906_v42, 5  ;;  %v2584_v60 = vsel %vm2399_vm0, %v2583_v39, %v2582_v21  ;;  %v2001_v54 = vsel %vm513_vm10, %v1941_v31, 0.0  ;;  %v6910_v39 = vld [vmem:[#allocation29_spill] sm:$0xff] }
 0x6fa   : > { %v1989_v49 = vsel %vm513_vm10, %v6907_v52, 0.0  ;;  %v1993_v17 = vsel %vm513_vm10, %v6908_v16, 0.0  ;;  %v2672_v37 = vsel %vm2393_vm11, %v2671_v35, %v2670_v36  ;;  %v2005_v59 = vsel %vm513_vm10, %v1945_v38, 0.0 }
 0x6fb   : > { %v1997_v47 = vsel %vm513_vm10, %v6909_v15, 0.0  ;;  %v2674_v40 = vsel %vm2396_vm13, %v2673_v57, %v2672_v37  ;;  %v2009_v28 = vsel %vm513_vm10, %v6906_v42, 0.0  ;;  %v2013_v29 = vsel %vm513_vm10, %v1949_v4, 0.0 }
 0x6fc   : > { %v2797_v55 = vrot.slane %v1989_v49, 5  ;;  %v2676_v30 = vsel %vm2399_vm0, %v2675_v41, %v2674_v40  ;;  %v2017_v27 = vsel %vm513_vm10, %v1953_v63, 0.0  ;;  %v2798_v22 = vrot.slane %v1993_v17, 4 }
 0x6fd   : > { %v2800_v24 = vrot.slane %v1997_v47, 3  ;;  %v3095_v11 = vpack.c.bf16 %v2676_v30, %v2584_v60  ;;  %v2802_v32 = vrot.slane %v2001_v54, 2  ;;  %v2804_v23 = vrot.slane %v2005_v59, 1 }
 0x6fe   : > { %v2807_v14 = vrot.slane %v2013_v29, 7  ;;  %v2799_v5 = vsel %vm2381_vm3, %v2798_v22, %v2797_v55  ;;  %v1939_v3 = vrot.slane %v6910_v39, 6  ;;  %v1943_v48 = vrot.slane %v6910_v39, 7  ;;  %v6921_v55 = vld [vmem:[#allocation28_spill] sm:$0xff] }
 0x6ff   : > { %v1947_v6 = vrot.slane %v6910_v39, 1  ;;  %3140 = vmatpush1.bf16.msra.mxu1 %v3095_v11  ;;  %v2801_v58 = vsel %vm2384_vm2, %v2800_v24, %v2799_v5  ;;  %v1951_v35 = vrot.slane %v6910_v39, 2  ;;  %v6911_v57 = vrot.slane %v6910_v39, 3 }
 0x700   : > { %vm6912_vm1 = vcmp.gt.f32.partialorder %v4061_v13, 0.5  ;;  %v6913_v31 = vrot.slane %v6910_v39, 4  ;;  %v2803_v44 = vsel %vm2387_vm14, %v2802_v32, %v2801_v58  ;;  %v6915_v38 = vrot.slane %v6910_v39, 5  ;;  %v6924_v58 = vld [vmem:[#allocation32_spill] sm:$0xff] }
 0x701   : > { %v1987_v42 = vsel %vm6912_vm1, %v6911_v57, 0.0  ;;  %vm6914_vm6 = vmmov %vm6912_vm1  ;;  %v2805_v63 = vsel %vm2390_vm5, %v2804_v23, %v2803_v44  ;;  %v2809_v52 = vrot.slane %v2017_v27, 6  ;;  %v2011_v36 = vsel %vm6912_vm1, %v1947_v6, 0.0  ;;  %v6922_v27 = vld [vmem:[#allocation10_spill] sm:$0xff] }
 0x702   : > { %v1991_v7 = vsel %vm6914_vm6, %v6913_v31, 0.0  ;;  %vm6916_vm4 = vmmov %vm6912_vm1  ;;  %v2806_v41 = vsel %vm2393_vm11, %v2009_v28, %v2805_v63  ;;  %v2769_v16 = vrot.slane %v1987_v42, 5  ;;  %v2779_v29 = vrot.slane %v2011_v36, 7  ;;  %v6926_v57 = vld [vmem:[#allocation34_spill] sm:$0xff] }
 0x703   : > { %v1995_v4 = vsel %vm6916_vm4, %v6915_v38, 0.0  ;;  %vm6917_vm9 = vmmov %vm6912_vm1  ;;  %v2770_v17 = vrot.slane %v1991_v7, 4  ;;  %v2808_v47 = vsel %vm2396_vm13, %v2807_v14, %v2806_v41  ;;  %v1944_v30 = vrot.slane %v6921_v55, 7  ;;  %v6928_v38 = vld [vmem:[#allocation36_spill] sm:$0xff]  ;;  %v6929_v36 = vld [vmem:[#allocation30_spill] sm:$0xff] }
 0x704   : > { %v1999_v21 = vsel %vm6917_vm9, %v1939_v3, 0.0  ;;  %vm6918_vm15 = vmmov %vm6912_vm1  ;;  %v2772_v15 = vrot.slane %v1995_v4, 3  ;;  %v2810_v59 = vsel %vm2399_vm0, %v2809_v52, %v2808_v47  ;;  %v1948_v24 = vrot.slane %v6921_v55, 1  ;;  %v6930_v47 = vld [vmem:[#allocation12_spill] sm:$0xff] }
 0x705   : > { %v2003_v25 = vsel %vm6918_vm15, %v1943_v48, 0.0  ;;  %vm6919_vm8 = vmmov %vm6912_vm1  ;;  %v2774_v37 = vrot.slane %v1999_v21, 2  ;;  %v2771_v40 = vsel %vm2381_vm3, %v2770_v17, %v2769_v16  ;;  %v3102_v22 = vpack.c.bf16 %v2810_v59, %v6922_v27 }
 0x706   : > { %v2007_v49 = vsel %vm6919_vm8, %v6910_v39, 0.0  ;;  %vm6920_vm6 = vmmov %vm6912_vm1  ;;  %v2776_v54 = vrot.slane %v2003_v25, 1  ;;  %v2773_v28 = vsel %vm2384_vm2, %v2772_v15, %v2771_v40  ;;  %v1952_v11 = vrot.slane %v6921_v55, 2 }
 0x707   : > { %v2015_v60 = vsel %vm6920_vm6, %v1951_v35, 0.0  ;;  %v2775_v32 = vsel %vm2387_vm14, %v2774_v37, %v2773_v28  ;;  %v6923_v14 = vrot.slane %v6921_v55, 6  ;;  %v2004_v39 = vsel %vm512_vm7, %v1944_v30, 0.0  ;;  %3182 = vmatprep.subr.bf16.mxu0 %v3102_v22 }
 0x708   : > { %v2781_v23 = vrot.slane %v2015_v60, 6  ;;  %v2777_v3 = vsel %vm2390_vm5, %v2776_v54, %v2775_v32  ;;  %v2008_v48 = vsel %vm512_vm7, %v6921_v55, 0.0  ;;  %v2012_v6 = vsel %vm512_vm7, %v1948_v24, 0.0  ;;  %v6937_v24 = vld [vmem:[#allocation31_spill] sm:$0xff]  ;;  %v6939_v32 = vld [vmem:[#allocation33_spill] sm:$0xff] }
 0x709   : > { %v2000_v5 = vsel %vm512_vm7, %v6923_v14, 0.0  ;;  %v6925_v35 = vrot.slane %v6924_v58, 5  ;;  %v6927_v42 = vrot.slane %v6926_v57, 4  ;;  %v2778_v7 = vsel %vm2393_vm11, %v2007_v49, %v2777_v3 }
 0x70a   : > { %v2016_v44 = vsel %vm512_vm7, %v1952_v11, 0.0  ;;  %v2786_v4 = vrot.slane %v6928_v38, 3  ;;  %v2788_v21 = vrot.slane %v2000_v5, 2  ;;  %v2780_v25 = vsel %vm2396_vm13, %v2779_v29, %v2778_v7  ;;  %v6941_v5 = vld [vmem:[#allocation35_spill] sm:$0xff] }
 0x70b   : > { %v2785_v31 = vsel %vm2381_vm3, %v6927_v42, %v6925_v35  ;;  %v2790_v63 = vrot.slane %v2004_v39, 1  ;;  %v2793_v52 = vrot.slane %v2012_v6, 7  ;;  %v1942_v41 = vrot.slane %v6929_v36, 7  ;;  %v6942_v42 = vld [vmem:[#allocation13_spill] sm:$0xff] }
 0x70c   : > { %v2782_v16 = vsel %vm2399_vm0, %v2781_v23, %v2780_v25  ;;  %v2787_v17 = vsel %vm2384_vm2, %v2786_v4, %v2785_v31  ;;  %v1946_v15 = vrot.slane %v6929_v36, 1  ;;  %v1950_v49 = vrot.slane %v6929_v36, 2 }
 0x70d   : > { %v3100_v60 = vpack.c.bf16 %v2782_v16, %v6930_v47  ;;  %v2789_v37 = vsel %vm2387_vm14, %v2788_v21, %v2787_v17  ;;  %v6931_v54 = vrot.slane %v6929_v36, 6  ;;  %vm6932_vm4 = vcmp.gt.f32.partialorder %v4056_v12, 0.5 }
 0x70e   : > { %vm6933_vm9 = vmmov %vm6932_vm4  ;;  %v2791_v29 = vsel %vm2390_vm5, %v2790_v63, %v2789_v37  ;;  %v2795_v55 = vrot.slane %v2016_v44, 6  ;;  %v6938_v11 = vrot.slane %v6937_v24, 5  ;;  %v6940_v23 = vrot.slane %v6939_v32, 4  ;;  %v6943_v44 = vld [vmem:[#allocation9_spill] sm:$0xff]  ;;  %v6948_v24 = vld [vmem:[#allocation11_spill] sm:$0xff] }
 0x70f   : > { %v1998_v59 = vsel %vm6932_vm4, %v6931_v54, 0.0  ;;  %v2002_v40 = vsel %vm6933_vm9, %v1942_v41, 0.0  ;;  %vm6934_vm15 = vmmov %vm6932_vm4  ;;  %3141 = vmatprep.subr.bf16.mxu1 %v3100_v60  ;;  %v2792_v22 = vsel %vm2393_vm11, %v2008_v48, %v2791_v29  ;;  %v2758_v39 = vrot.slane %v6941_v5, 3  ;;  %v6947_v29 = vld [vmem:[#allocation37_spill] sm:$0xff] }
 0x710   : > { %v2006_v30 = vsel %vm6934_vm15, %v6929_v36, 0.0  ;;  %vm6935_vm8 = vmmov %vm6932_vm4  ;;  %v2757_v14 = vsel %vm2381_vm3, %v6940_v23, %v6938_v11  ;;  %v2794_v3 = vsel %vm2396_vm13, %v2793_v52, %v2792_v22  ;;  %v2760_v6 = vrot.slane %v1998_v59, 2 }
 0x711   : > { %v2010_v27 = vsel %vm6935_vm8, %v1946_v15, 0.0  ;;  %vm6936_vm1 = vmmov %vm6932_vm4  ;;  %v2762_v58 = vrot.slane %v2002_v40, 1  ;;  %v2796_v57 = vsel %vm2399_vm0, %v2795_v55, %v2794_v3  ;;  %v2759_v48 = vsel %vm2384_vm2, %v2758_v39, %v2757_v14 }
 0x712   : > { %v2014_v28 = vsel %vm6936_vm1, %v1950_v49, 0.0  ;;  %v2765_v35 = vrot.slane %v2010_v27, 7  ;;  %v2049_v31 = vrot.slane %v6942_v42, 5  ;;  %v2053_v7 = vrot.slane %v6942_v42, 6  ;;  %vm6957_vm4 = vmmov %vm6920_vm6 }
 0x713   : > { %v3101_v38 = vpack.c.bf16 %v2796_v57, %v6943_v44  ;;  %v2761_v4 = vsel %vm2387_vm14, %v2760_v6, %v2759_v48  ;;  %v2767_v21 = vrot.slane %v2014_v28, 6  ;;  %v2057_v25 = vrot.slane %v6942_v42, 7  ;;  %vm6958_vm9 = vmmov %vm6957_vm4 }
 0x714   : > { %v2763_v63 = vsel %vm2390_vm5, %v2762_v58, %v2761_v4  ;;  %v2061_v52 = vrot.slane %v6942_v42, 1  ;;  %v6944_v36 = vrot.slane %v6942_v42, 2  ;;  %v6945_v16 = vrot.slane %v6942_v42, 3  ;;  %vm6959_vm15 = vmmov %vm6957_vm4 }
 0x715   : > { %3183 = vmatpush1.bf16.msra.mxu0 %v3101_v38  ;;  %v2764_v15 = vsel %vm2393_vm11, %v2006_v30, %v2763_v63  ;;  %v6946_v49 = vrot.slane %v6942_v42, 4  ;;  %v2109_v60 = vsel %vm513_vm10, %v2049_v31, 0.0  ;;  %v2113_v37 = vsel %vm513_vm10, %v2053_v7, 0.0  ;;  %vm6960_vm8 = vmmov %vm6957_vm4 }
 0x716   : > { %v2097_v41 = vsel %vm513_vm10, %v6944_v36, 0.0  ;;  %v2101_v17 = vsel %vm513_vm10, %v6945_v16, 0.0  ;;  %v2766_v54 = vsel %vm2396_vm13, %v2765_v35, %v2764_v15  ;;  %v2117_v59 = vsel %vm513_vm10, %v2057_v25, 0.0  ;;  %vm6961_vm1 = vmmov %vm6957_vm4 }
 0x717   : > { %v2105_v47 = vsel %vm513_vm10, %v6946_v49, 0.0  ;;  %v2121_v40 = vsel %vm513_vm10, %v6942_v42, 0.0  ;;  %v2157_v55 = vrot.slane %v6947_v29, 4  ;;  %v2768_v30 = vsel %vm2399_vm0, %v2767_v21, %v2766_v54 }
 0x718   : > { %v2161_v27 = vrot.slane %v6947_v29, 5  ;;  %v2165_v22 = vrot.slane %v6947_v29, 6  ;;  %v2169_v28 = vrot.slane %v6947_v29, 7  ;;  %v3099_v11 = vpack.c.bf16 %v2768_v30, %v6948_v24 }
 0x719   : > { %v2125_v32 = vsel %vm513_vm10, %v2061_v52, 0.0  ;;  %v6949_v23 = vrot.slane %v6947_v29, 1  ;;  %v6950_v5 = vrot.slane %v6947_v29, 2  ;;  %v6951_v3 = vrot.slane %v6947_v29, 3 }
 0x71a   : > { %v2217_v58 = vsel %vm513_vm10, %v2157_v55, 0.0  ;;  %v2221_v35 = vsel %vm513_vm10, %v2161_v27, 0.0  ;;  %v2225_v57 = vsel %vm513_vm10, %v2165_v22, 0.0  ;;  %3142 = vmatpush1.bf16.msra.mxu1 %v3099_v11  ;;  %v2229_v48 = vsel %vm513_vm10, %v2169_v28, 0.0 }
 0x71b   : > { %v2205_v14 = vsel %vm513_vm10, %v6949_v23, 0.0  ;;  %v2209_v39 = vsel %vm513_vm10, %v6950_v5, 0.0  ;;  %v2213_v6 = vsel %vm513_vm10, %v6951_v3, 0.0  ;;  %v2889_v42 = vrot.slane %v2097_v41, 6 }
 0x71c   : > { %v2890_v31 = vrot.slane %v2101_v17, 5  ;;  %v2892_v7 = vrot.slane %v2105_v47, 4  ;;  %v2233_v44 = vsel %vm513_vm10, %v6947_v29, 0.0  ;;  %v2894_v38 = vrot.slane %v2109_v60, 3  ;;  %vm6954_vm10 = vmmov %vm6920_vm6 }
 0x71d   : > { %v2896_v4 = vrot.slane %v2113_v37, 2  ;;  %v2898_v21 = vrot.slane %v2117_v59, 1  ;;  %v2981_v63 = vrot.slane %v2205_v14, 7  ;;  %v2982_v52 = vrot.slane %v2209_v39, 6 }
 0x71e   : > { %v2891_v25 = vsel %vm2381_vm3, %v2890_v31, %v2889_v42  ;;  %v2984_v36 = vrot.slane %v2213_v6, 5  ;;  %v2901_v15 = vrot.slane %v2125_v32, 7  ;;  %v2986_v49 = vrot.slane %v2217_v58, 4 }
 0x71f   : > { %v2893_v16 = vsel %vm2384_vm2, %v2892_v7, %v2891_v25  ;;  %v2988_v54 = vrot.slane %v2221_v35, 3  ;;  %v2983_v17 = vsel %vm2381_vm3, %v2982_v52, %v2981_v63  ;;  %v2990_v47 = vrot.slane %v2225_v57, 2  ;;  %v6962_v7 = vld [vmem:[#allocation48_spill] sm:$0xff] }
 0x720   : > { %v2895_v41 = vsel %vm2387_vm14, %v2894_v38, %v2893_v16  ;;  %v2047_v29 = vrot.slane %v6952_v50, 5  ;;  %v2985_v37 = vsel %vm2384_vm2, %v2984_v36, %v2983_v17  ;;  %v2051_v59 = vrot.slane %v6952_v50, 6 }
 0x721   : > { %v2897_v60 = vsel %vm2390_vm5, %v2896_v4, %v2895_v41  ;;  %v2055_v55 = vrot.slane %v6952_v50, 7  ;;  %v2987_v27 = vsel %vm2387_vm14, %v2986_v49, %v2985_v37  ;;  %v2992_v22 = vrot.slane %v2229_v48, 1 }
 0x722   : > { %v2899_v30 = vsel %vm2393_vm11, %v2898_v21, %v2897_v60  ;;  %v2059_v28 = vrot.slane %v6952_v50, 1  ;;  %v2989_v11 = vsel %vm2390_vm5, %v2988_v54, %v2987_v27  ;;  %v6953_v32 = vrot.slane %v6952_v50, 2 }
 0x723   : > { %v2900_v24 = vsel %vm2396_vm13, %v2121_v40, %v2899_v30  ;;  %v6955_v14 = vrot.slane %v6952_v50, 3  ;;  %v2991_v3 = vsel %vm2393_vm11, %v2990_v47, %v2989_v11  ;;  %v6956_v6 = vrot.slane %v6952_v50, 4 }
 0x724   : > { %v2095_v23 = vsel %vm6954_vm10, %v6953_v32, 0.0  ;;  %v2902_v39 = vsel %vm2399_vm0, %v2901_v15, %v2900_v24  ;;  %v2107_v58 = vsel %vm6958_vm9, %v2047_v29, 0.0  ;;  %v2993_v35 = vsel %vm2396_vm13, %v2992_v22, %v2991_v3  ;;  %vm6963_vm10 = vmmov %vm6961_vm1 }
 0x725   : > { %v2099_v5 = vsel %vm6920_vm6, %v6955_v14, 0.0  ;;  %v2103_v40 = vsel %vm6957_vm4, %v6956_v6, 0.0  ;;  %v2111_v57 = vsel %vm6959_vm15, %v2051_v59, 0.0  ;;  %v2115_v48 = vsel %vm6960_vm8, %v2055_v55, 0.0  ;;  %vm6965_vm6 = vmmov %vm6961_vm1 }
 0x726   : > { %v2119_v42 = vsel %vm6961_vm1, %v6952_v50, 0.0  ;;  %v2994_v31 = vsel %vm2399_vm0, %v2233_v44, %v2993_v35  ;;  %v2155_v38 = vrot.slane %v6962_v7, 4  ;;  %v2159_v4 = vrot.slane %v6962_v7, 5  ;;  %vm6967_vm4 = vmmov %vm6961_vm1 }
 0x727   : > { %v2163_v21 = vrot.slane %v6962_v7, 6  ;;  %v3106_v25 = vpack.c.bf16 %v2994_v31, %v2902_v39  ;;  %v2123_v63 = vsel %vm6963_vm10, %v2059_v28, 0.0  ;;  %v2167_v52 = vrot.slane %v6962_v7, 7  ;;  %vm6969_vm9 = vmmov %vm6961_vm1 }
 0x728   : > { %v6964_v36 = vrot.slane %v6962_v7, 1  ;;  %v6966_v15 = vrot.slane %v6962_v7, 2  ;;  %v6968_v49 = vrot.slane %v6962_v7, 3  ;;  %vm6970_vm15 = vmmov %vm6961_vm1  ;;  %v2861_v29 = vrot.slane %v2095_v23, 6 }
 0x729   : > { %v2215_v41 = vsel %vm6970_vm15, %v2155_v38, 0.0  ;;  %vm6971_vm8 = vmmov %vm6961_vm1  ;;  %3184 = vmatprep.subr.bf16.mxu0 %v3106_v25  ;;  %v2223_v47 = vsel %vm6961_vm1, %v2163_v21, 0.0  ;;  %v2862_v60 = vrot.slane %v2099_v5, 5  ;;  %v2864_v59 = vrot.slane %v2103_v40, 4 }
 0x72a   : > { %v2203_v16 = vsel %vm6965_vm6, %v6964_v36, 0.0  ;;  %v2207_v44 = vsel %vm6967_vm4, %v6966_v15, 0.0  ;;  %v2211_v54 = vsel %vm6969_vm9, %v6968_v49, 0.0  ;;  %v2219_v17 = vsel %vm6971_vm8, %v2159_v4, 0.0  ;;  %vm6972_vm10 = vmmov %vm6961_vm1  ;;  %v6976_v49 = vld [vmem:[#allocation47_spill] sm:$0xff] }
 0x72b   : > { %v2227_v50 = vsel %vm6972_vm10, %v2167_v52, 0.0  ;;  %vm6973_vm6 = vmmov %vm6961_vm1  ;;  %v2866_v55 = vrot.slane %v2107_v58, 3  ;;  %v2868_v30 = vrot.slane %v2111_v57, 2  ;;  %v2863_v27 = vsel %vm2381_vm3, %v2862_v60, %v2861_v29  ;;  %v6974_v58 = vld [vmem:[#allocation38_spill] sm:$0xff] }
 0x72c   : > { %v2231_v37 = vsel %vm6973_vm6, %v6962_v7, 0.0  ;;  %v2870_v22 = vrot.slane %v2115_v48, 1  ;;  %v2953_v28 = vrot.slane %v2203_v16, 7  ;;  %v2954_v24 = vrot.slane %v2207_v44, 6 }
 0x72d   : > { %v2865_v11 = vsel %vm2384_vm2, %v2864_v59, %v2863_v27  ;;  %v2873_v32 = vrot.slane %v2123_v63, 7  ;;  %v2956_v14 = vrot.slane %v2211_v54, 5  ;;  %v2958_v39 = vrot.slane %v2215_v41, 4 }
 0x72e   : > { %v2867_v23 = vsel %vm2387_vm14, %v2866_v55, %v2865_v11  ;;  %v2955_v5 = vsel %vm2381_vm3, %v2954_v24, %v2953_v28  ;;  %v2960_v3 = vrot.slane %v2219_v17, 3  ;;  %v2962_v13 = vrot.slane %v2223_v47, 2  ;;  %v6980_v28 = vld [vmem:[#allocation44_spill] sm:$0xff] }
 0x72f   : > { %v2869_v6 = vsel %vm2390_vm5, %v2868_v30, %v2867_v23  ;;  %v2957_v40 = vsel %vm2384_vm2, %v2956_v14, %v2955_v5  ;;  %v2052_v35 = vrot.slane %v6974_v58, 6  ;;  %v2056_v57 = vrot.slane %v6974_v58, 7  ;;  %v6982_v14 = vld [vmem:[#allocation46_spill] sm:$0xff] }
 0x730   : > { %v2871_v48 = vsel %vm2393_vm11, %v2870_v22, %v2869_v6  ;;  %v2959_v31 = vsel %vm2387_vm14, %v2958_v39, %v2957_v40  ;;  %v2964_v7 = vrot.slane %v2227_v50, 1  ;;  %v2060_v38 = vrot.slane %v6974_v58, 1  ;;  %v6983_v6 = vld [vmem:[#allocation51_spill] sm:$0xff] }
 0x731   : > { %v2872_v4 = vsel %vm2396_vm13, %v2119_v42, %v2871_v48  ;;  %v2961_v21 = vsel %vm2390_vm5, %v2960_v3, %v2959_v31  ;;  %v6975_v25 = vrot.slane %v6974_v58, 5  ;;  %v2112_v52 = vsel %vm512_vm7, %v2052_v35, 0.0  ;;  %v6987_v48 = vld [vmem:[#allocation55_spill] sm:$0xff] }
 0x732   : > { %v2874_v36 = vsel %vm2399_vm0, %v2873_v32, %v2872_v4  ;;  %v2963_v16 = vsel %vm2393_vm11, %v2962_v13, %v2961_v21  ;;  %v2116_v15 = vsel %vm512_vm7, %v2056_v57, 0.0  ;;  %v2120_v42 = vsel %vm512_vm7, %v6974_v58, 0.0  ;;  %v6985_v58 = vld [vmem:[#allocation53_spill] sm:$0xff] }
 0x733   : > { %v2108_v63 = vsel %vm512_vm7, %v6975_v25, 0.0  ;;  %v2965_v44 = vsel %vm2396_vm13, %v2964_v7, %v2963_v16  ;;  %v2160_v54 = vrot.slane %v6976_v49, 5  ;;  %v2164_v41 = vrot.slane %v6976_v49, 6 }
 0x734   : > { %v2168_v17 = vrot.slane %v6976_v49, 7  ;;  %v2966_v47 = vsel %vm2399_vm0, %v2231_v37, %v2965_v44  ;;  %v2124_v50 = vsel %vm512_vm7, %v2060_v38, 0.0  ;;  %v6977_v29 = vrot.slane %v6976_v49, 4  ;;  %v6978_v37 = vld [vmem:[#allocation42_spill] sm:$0xff] }
 0x735   : > { %v2232_v59 = vsel %vm512_vm7, %v6976_v49, 0.0  ;;  %v3104_v55 = vpack.c.bf16 %v2966_v47, %v2874_v36  ;;  %v2220_v30 = vsel %vm512_vm7, %v2160_v54, 0.0  ;;  %v2224_v27 = vsel %vm512_vm7, %v2164_v41, 0.0 }
 0x736   : > { %v2216_v60 = vsel %vm512_vm7, %v6977_v29, 0.0  ;;  %v6979_v22 = vrot.slane %v6978_v37, 6  ;;  %v6981_v24 = vrot.slane %v6980_v28, 5  ;;  %v2228_v32 = vsel %vm512_vm7, %v2168_v17, 0.0 }
 0x737   : > { %v2878_v39 = vrot.slane %v6982_v14, 4  ;;  %v2880_v23 = vrot.slane %v2108_v63, 3  ;;  %v2882_v5 = vrot.slane %v2112_v52, 2  ;;  %3143 = vmatprep.subr.bf16.mxu1 %v3104_v55  ;;  %v2884_v3 = vrot.slane %v2116_v15, 1  ;;  %v6988_v63 = vld [vmem:[#allocation40_spill] sm:$0xff] }
 0x738   : > { %v2877_v11 = vsel %vm2381_vm3, %v6981_v24, %v6979_v22  ;;  %v2887_v13 = vrot.slane %v2124_v50, 7  ;;  %v6984_v40 = vrot.slane %v6983_v6, 7  ;;  %v6986_v35 = vrot.slane %v6985_v58, 6  ;;  %v6994_v22 = vld [vmem:[#allocation49_spill] sm:$0xff]  ;;  %v7002_v6 = vld [vmem:[#allocation43_spill] sm:$0xff] }
 0x739   : > { %v2970_v31 = vrot.slane %v6987_v48, 5  ;;  %v2879_v7 = vsel %vm2384_vm2, %v2878_v39, %v2877_v11  ;;  %v2972_v38 = vrot.slane %v2216_v60, 4  ;;  %v2974_v1 = vrot.slane %v2220_v30, 3  ;;  %v7006_v48 = vld [vmem:[#allocation45_spill] sm:$0xff] }
 0x73a   : > { %v2969_v57 = vsel %vm2381_vm3, %v6986_v35, %v6984_v40  ;;  %v2976_v4 = vrot.slane %v2224_v27, 2  ;;  %v2881_v21 = vsel %vm2387_vm14, %v2880_v23, %v2879_v7  ;;  %v2050_v52 = vrot.slane %v6988_v63, 6 }
 0x73b   : > { %v2971_v25 = vsel %vm2384_vm2, %v2970_v31, %v2969_v57  ;;  %v2054_v36 = vrot.slane %v6988_v63, 7  ;;  %v2883_v16 = vsel %vm2390_vm5, %v2882_v5, %v2881_v21  ;;  %v2978_v44 = vrot.slane %v2228_v32, 1 }
 0x73c   : > { %v2973_v15 = vsel %vm2387_vm14, %v2972_v38, %v2971_v25  ;;  %v2058_v49 = vrot.slane %v6988_v63, 1  ;;  %v2885_v54 = vsel %vm2393_vm11, %v2884_v3, %v2883_v16  ;;  %v6989_v17 = vrot.slane %v6988_v63, 5  ;;  %v7009_v25 = vld [vmem:[#allocation52_spill] sm:$0xff] }
 0x73d   : > { %v2975_v41 = vsel %vm2390_vm5, %v2974_v1, %v2973_v15  ;;  %vm6990_vm7 = vcmp.gt.f32.partialorder %v4056_v12, 0.5  ;;  %v2886_v29 = vsel %vm2396_vm13, %v2120_v42, %v2885_v54  ;;  %v2158_v28 = vrot.slane %v6994_v22, 5 }
 0x73e   : > { %v2106_v47 = vsel %vm6990_vm7, %v6989_v17, 0.0  ;;  %vm6991_vm4 = vmmov %vm6990_vm7  ;;  %v2977_v60 = vsel %vm2393_vm11, %v2976_v4, %v2975_v41  ;;  %v2888_v27 = vsel %vm2399_vm0, %v2887_v13, %v2886_v29  ;;  %v2162_v24 = vrot.slane %v6994_v22, 6  ;;  %v7000_v13 = vld [vmem:[#allocation41_spill] sm:$0xff]  ;;  %v7007_v4 = vld [vmem:[#allocation50_spill] sm:$0xff] }
 0x73f   : > { %v2110_v50 = vsel %vm6991_vm4, %v2050_v52, 0.0  ;;  %vm6992_vm9 = vmmov %vm6991_vm4  ;;  %v2979_v37 = vsel %vm2396_vm13, %v2978_v44, %v2977_v60  ;;  %v2166_v32 = vrot.slane %v6994_v22, 7  ;;  %v6996_v14 = vrot.slane %v6994_v22, 4  ;;  %v7012_v60 = vld [vmem:[#allocation57_spill] sm:$0xff] }
 0x740   : > { %v2114_v55 = vsel %vm6992_vm9, %v2054_v36, 0.0  ;;  %vm6993_vm15 = vmmov %vm6991_vm4  ;;  %v2980_v11 = vsel %vm2399_vm0, %v2232_v59, %v2979_v37  ;;  %v7001_v59 = vrot.slane %v7000_v13, 6  ;;  %v7003_v40 = vrot.slane %v7002_v6, 5  ;;  %v7011_v36 = vld [vmem:[#allocation54_spill] sm:$0xff] }
 0x741   : > { %v2118_v30 = vsel %vm6993_vm15, %v6988_v63, 0.0  ;;  %vm6995_vm8 = vmmov %vm6991_vm4  ;;  %v3105_v23 = vpack.c.bf16 %v2980_v11, %v2888_v27  ;;  %v2850_v31 = vrot.slane %v7006_v48, 4  ;;  %v2852_v7 = vrot.slane %v2106_v47, 3  ;;  %v7020_v6 = vld [vmem:[#allocation58_spill] sm:$0xff] }
 0x742   : > { %v2122_v42 = vsel %vm6995_vm8, %v2058_v49, 0.0  ;;  %vm6997_vm1 = vmmov %vm6991_vm4  ;;  %v2849_v58 = vsel %vm2381_vm3, %v7003_v40, %v7001_v59  ;;  %v2854_v38 = vrot.slane %v2110_v50, 2  ;;  %v2856_v1 = vrot.slane %v2114_v55, 1 }
 0x743   : > { %v2214_v39 = vsel %vm6997_vm1, %v6996_v14, 0.0  ;;  %vm6998_vm10 = vmmov %vm6997_vm1  ;;  %3185 = vmatpush1.bf16.msra.mxu0 %v3105_v23  ;;  %v7008_v21 = vrot.slane %v7007_v4, 7  ;;  %v7010_v63 = vrot.slane %v7009_v25, 6  ;;  %v2942_v16 = vrot.slane %v7011_v36, 5  ;;  %v7024_v25 = vld [vmem:[#allocation56_spill] sm:$0xff] }
 0x744   : > { %v2218_v5 = vsel %vm6998_vm10, %v2158_v28, 0.0  ;;  %vm6999_vm6 = vmmov %vm6997_vm1  ;;  %v2851_v15 = vsel %vm2384_vm2, %v2850_v31, %v2849_v58  ;;  %v2859_v44 = vrot.slane %v2122_v42, 7  ;;  %v2944_v49 = vrot.slane %v2214_v39, 4 }
 0x745   : > { %v2230_v3 = vsel %vm6999_vm6, %v6994_v22, 0.0  ;;  %vm7004_vm7 = vmmov %vm6997_vm1  ;;  %v2941_v52 = vsel %vm2381_vm3, %v7010_v63, %v7008_v21  ;;  %v2946_v12 = vrot.slane %v2218_v5, 3  ;;  %v2853_v54 = vsel %vm2387_vm14, %v2852_v7, %v2851_v15 }
 0x746   : > { %v2222_v35 = vsel %vm7004_vm7, %v2162_v24, 0.0  ;;  %vm7005_vm4 = vmmov %vm6997_vm1  ;;  %v2943_v41 = vsel %vm2384_vm2, %v2942_v16, %v2941_v52  ;;  %v2855_v50 = vsel %vm2390_vm5, %v2854_v38, %v2853_v54  ;;  %v2277_v55 = vrot.slane %v7012_v60, 6  ;;  %v7014_v24 = vld [vmem:[#allocation4_spill] sm:$0xff] }
 0x747   : > { %v2226_v57 = vsel %vm7005_vm4, %v2166_v32, 0.0  ;;  %v2948_v17 = vrot.slane %v2222_v35, 2  ;;  %v2945_v29 = vsel %vm2387_vm14, %v2944_v49, %v2943_v41  ;;  %v2281_v27 = vrot.slane %v7012_v60, 7 }
 0x748   : > { %v2950_v47 = vrot.slane %v2226_v57, 1  ;;  %v2857_v37 = vsel %vm2393_vm11, %v2856_v1, %v2855_v50  ;;  %v2947_v22 = vsel %vm2390_vm5, %v2946_v12, %v2945_v29  ;;  %v7013_v28 = vrot.slane %v7012_v60, 4  ;;  %v7022_v57 = vld [vmem:[#allocation59_spill] sm:$0xff] }
 0x749   : > { %vm7015_vm9 = vcmp.gt.f32.partialorder %v7014_v24, 0.5  ;;  %v7016_v42 = vrot.slane %v7012_v60, 5  ;;  %v2858_v14 = vsel %vm2396_vm13, %v2118_v30, %v2857_v37  ;;  %v2949_v39 = vsel %vm2393_vm11, %v2948_v17, %v2947_v22 }
 0x74a   : > { %v2333_v11 = vsel %vm7015_vm9, %v7013_v28, 0.0  ;;  %vm7017_vm15 = vmmov %vm7015_vm9  ;;  %v2860_v13 = vsel %vm2399_vm0, %v2859_v44, %v2858_v14  ;;  %v2951_v59 = vsel %vm2396_vm13, %v2950_v47, %v2949_v39  ;;  %v7021_v40 = vrot.slane %v7020_v6, 6  ;;  %v7025_v44 = vld [vmem:[#allocation6_spill] sm:$0xff] }
 0x74b   : > { %v2337_v32 = vsel %vm7017_vm15, %v7016_v42, 0.0  ;;  %vm7018_vm8 = vmmov %vm7015_vm9  ;;  %v3051_v35 = vrot.slane %v2333_v11, 4  ;;  %v2952_v30 = vsel %vm2399_vm0, %v2230_v3, %v2951_v59  ;;  %v7023_v48 = vrot.slane %v7022_v57, 5 }
 0x74c   : > { %v2341_v23 = vsel %vm7018_vm8, %v2277_v55, 0.0  ;;  %vm7019_vm1 = vmmov %vm7018_vm8  ;;  %v3048_v58 = vsel %vm2384_vm2, %v7021_v40, %v5650_v46  ;;  %v3053_v7 = vrot.slane %v2337_v32, 3  ;;  %v3103_v1 = vpack.c.bf16 %v2952_v30, %v2860_v13 }
 0x74d   : > { %v2345_v5 = vsel %vm7019_vm1, %v2281_v27, 0.0  ;;  %v3050_v31 = vsel %vm2387_vm14, %v7023_v48, %v3048_v58  ;;  %v3055_v38 = vrot.slane %v2341_v23, 2  ;;  %v2264_v63 = vrot.slane %v7024_v25, 3 }
 0x74e   : > { %v3052_v4 = vsel %vm2390_vm5, %v3051_v35, %v3050_v31  ;;  %v3057_v21 = vrot.slane %v2345_v5, 1  ;;  %v2268_v36 = vrot.slane %v7024_v25, 4  ;;  %v2272_v46 = vrot.slane %v7024_v25, 5  ;;  %3144 = vmatpush1.bf16.msra.mxu1 %v3103_v1 }
 0x74f   : > { %v3054_v52 = vsel %vm2393_vm11, %v3053_v7, %v3052_v4  ;;  %v2276_v3 = vrot.slane %v7024_v25, 6  ;;  %v2280_v15 = vrot.slane %v7024_v25, 7  ;;  %vm7026_vm10 = vcmp.gt.f32.partialorder %v7025_v44, 0.5 }
 0x750   : > { %v3056_v16 = vsel %vm2396_vm13, %v3055_v38, %v3054_v52  ;;  %v2316_v49 = vsel %vm7026_vm10, %v7024_v25, 0.0  ;;  %v7027_v12 = vrot.slane %v7024_v25, 1  ;;  %vm7028_vm6 = vmmov %vm7026_vm10  ;;  %v7029_v17 = vrot.slane %v7024_v25, 2 }
 0x751   : > { %v3058_v41 = vsel %vm2399_vm0, %v3057_v21, %v3056_v16  ;;  %vm7030_vm7 = vmmov %vm7028_vm6  ;;  %vm7036_vm10 = vcmask 1043456   ;;  %v2279_v39 = vrot.slane %v5633_v45, 6  ;;  %v2283_v5 = vrot.slane %v5633_v45, 7 }
 0x752   : > { %v2320_v54 = vsel %vm7028_vm6, %v7027_v12, 0.0  ;;  %v2324_v47 = vsel %vm7030_vm7, %v7029_v17, 0.0  ;;  %vm7031_vm4 = vmmov %vm7028_vm6  ;;  %v3108_v60 = vpack.c.bf16 %v3058_v41, %v3058_v41  ;;  %vm7037_vm6 = vcmp.gt.f32.partialorder %v4653_v33, 0.5 }
 0x753   : > { %v2328_v50 = vsel %vm7031_vm4, %v2264_v63, 0.0  ;;  %vm7032_vm9 = vmmov %vm7031_vm4  ;;  %v3031_v22 = vrot.slane %v2320_v54, 7  ;;  %v3033_v28 = vrot.slane %v2324_v47, 6  ;;  %v2335_v13 = vsel %vm7037_vm6, %v2271_v43, 0.0 }
 0x754   : > { %v2332_v29 = vsel %vm7032_vm9, %v2268_v36, 0.0  ;;  %vm7033_vm15 = vmmov %vm7031_vm4  ;;  %v3035_v24 = vrot.slane %v2328_v50, 5  ;;  %3560 = vmatprep.subr.msk.bf16.mxu1 %vm7036_vm10, %v3108_v60  ;;  %v3076_v58 = vsel %vm2384_vm2, %v3075_v0, %v5689_v51  ;;  %v3079_v35 = vrot.slane %v2335_v13, 4  ;;  %v3116_v50 = vpop.permute.xlu0 %3115 }
 0x755   : > { %v2336_v55 = vsel %vm7033_vm15, %v2272_v46, 0.0  ;;  %vm7034_vm8 = vmmov %vm7031_vm4  ;;  %v3037_v11 = vrot.slane %v2332_v29, 4  ;;  %v3032_v23 = vsel %vm2381_vm3, %v3031_v22, %v2316_v49  ;;  %v3078_v45 = vsel %vm2387_vm14, %v3077_v9, %v3076_v58  ;;  %v7046_v29 = vld [vmem:[#allocation5_spill] sm:$0xff] }
 0x756   : > { %v2340_v27 = vsel %vm7034_vm8, %v2276_v3, 0.0  ;;  %vm7035_vm1 = vmmov %vm7031_vm4  ;;  %v3039_v42 = vrot.slane %v2336_v55, 3  ;;  %v3034_v6 = vsel %vm2384_vm2, %v3033_v28, %v3032_v23  ;;  %v3080_v48 = vsel %vm2390_vm5, %v3079_v35, %v3078_v45 }
 0x757   : > { %v2344_v37 = vsel %vm7035_vm1, %v2280_v15, 0.0  ;;  %v3041_v32 = vrot.slane %v2340_v27, 2  ;;  %vm7038_vm7 = vmmov %vm7037_vm6  ;;  %v3036_v30 = vsel %vm2387_vm14, %v3035_v24, %v3034_v6  ;;  %v2274_v51 = vrot.slane %v5627_v34, 5 }
 0x758   : > { %v3043_v14 = vrot.slane %v2344_v37, 1  ;;  %v2339_v59 = vsel %vm7038_vm7, %v2275_v2, 0.0  ;;  %vm7039_vm4 = vmmov %vm7037_vm6  ;;  %v3038_v57 = vsel %vm2390_vm5, %v3037_v11, %v3036_v30  ;;  %v2278_v33 = vrot.slane %v5627_v34, 6 }
 0x759   : > { %v2343_v40 = vsel %vm7039_vm4, %v2279_v39, 0.0  ;;  %vm7040_vm9 = vmmov %vm7039_vm4  ;;  %v3081_v2 = vrot.slane %v2339_v59, 3  ;;  %v3040_v26 = vsel %vm2393_vm11, %v3039_v42, %v3038_v57  ;;  %v2282_v9 = vrot.slane %v5627_v34, 7 }
 0x75a   : > { %v2347_v43 = vsel %vm7040_vm9, %v2283_v5, 0.0  ;;  %v3083_v31 = vrot.slane %v2343_v40, 2  ;;  %v3042_v38 = vsel %vm2396_vm13, %v3041_v32, %v3040_v26  ;;  %v2330_v1 = vsel %vm516_vm12, %v2266_v53, 0.0  ;;  %vm7041_vm15 = vmmov %vm7036_vm10 }
 0x75b   : > { %v3085_v7 = vrot.slane %v2347_v43, 1  ;;  %v3082_v0 = vsel %vm2393_vm11, %v3081_v2, %v3080_v48  ;;  %v3044_v4 = vsel %vm2399_vm0, %v3043_v14, %v3042_v38  ;;  %v2334_v25 = vsel %vm516_vm12, %v2270_v20, 0.0  ;;  %vm7042_vm8 = vmmov %vm7036_vm10 }
 0x75c   : > { %v3084_v8 = vsel %vm2396_vm13, %v3083_v31, %v3082_v0  ;;  %v2318_v63 = vsel %vm516_vm12, %v5627_v34, 0.0  ;;  %v3107_v52 = vpack.c.bf16 %v3044_v4, %v3044_v4  ;;  %v2338_v46 = vsel %vm516_vm12, %v2274_v51, 0.0 }
 0x75d   : > { %v3086_v21 = vsel %vm2399_vm0, %v3085_v7, %v3084_v8  ;;  %v2342_v53 = vsel %vm516_vm12, %v2278_v33, 0.0  ;;  %v3060_v3 = vsel %vm2381_vm3, %v3059_v10, %v2318_v63  ;;  %v3063_v16 = vrot.slane %v2330_v1, 5  ;;  %vm7044_vm3 = vmmov %vm7042_vm8 }
 0x75e   : > { %v3110_v36 = vpack.c.bf16 %v3086_v21, %v3086_v21  ;;  %v3126_v15 = vsel %vm7041_vm15, %v3107_v52, 0  ;;  %v2346_v34 = vsel %vm516_vm12, %v2282_v9, 0.0  ;;  %v3062_v20 = vsel %vm2384_vm2, %v3061_v19, %v3060_v3 }
 0x75f   : > { %v3065_v44 = vrot.slane %v2334_v25, 4  ;;  %3146 = vmatpush1.bf16.msra.mxu1 %v3126_v15  ;;  %v3064_v49 = vsel %vm2387_vm14, %v3063_v16, %v3062_v20  ;;  %v3067_v12 = vrot.slane %v2338_v46, 3  ;;  %v3069_v54 = vrot.slane %v2342_v53, 2 }
 0x760   : > { %3562 = vmatprep.subr.msk.bf16.mxu0 %vm7042_vm8, %v3110_v36  ;;  %v3071_v61 = vrot.slane %v2346_v34, 1  ;;  %vm7043_vm12 = vcmask 588800   ;;  %v3121_v60 = vrot.slane %v3116_v50, %v7046_v29 }
 0x761   : > { %v3066_v10 = vsel %vm2390_vm5, %v3065_v44, %v3064_v49  ;;  %vm7045_vm2 = vmmov %vm7043_vm12 }
 0x762   : > { %v3068_v41 = vsel %vm2393_vm11, %v3067_v12, %v3066_v10  ;;  %3561 = vmatmul.mubr.msk.bf16.vlgmr.msra.gmra.mrb[8].mxu1 %vm7043_vm12, %v3111_v56  ;;  %vm7047_vm11 = vcmask 1040384  }
 0x763   : > { %v3070_v17 = vsel %vm2396_vm13, %v3069_v54, %v3068_v41  ;;  %vm7048_vm13 = vmmov %vm7047_vm11 }
 0x764   : > { %v3072_v62 = vsel %vm2399_vm0, %v3071_v61, %v3070_v17  ;;  %vm7050_vm0 = vmmov %vm7047_vm11 }
 0x765   : > { %v3109_v19 = vpack.c.bf16 %v3072_v62, %v3072_v62  ;;  %vm7052_vm1 = vmmov %vm7050_vm0 }
 0x766   : > { %vm7053_vm10 = vmmov %vm7050_vm0 }
 0x767   : > { %v3132_v47 = vsel %vm7044_vm3, %v3109_v19, 0  ;;  %vm7054_vm6 = vmmov %vm7050_vm0 }
 0x768   : > { %3187 = vmatpush1.bf16.msra.mxu0 %v3132_v47  ;;  %vm7055_vm9 = vmmov %vm7050_vm0 }
 0x769   : > { %vm7056_vm15 = vmmov %vm7050_vm0 }
 0x76a   : > { %vm7057_vm8 = vmmov %vm7050_vm0 }
 0x76b   : > { %3563 = vmatmul.mubr.msk.bf16.vlgmr.msra.gmra.mrb[12].mxu0 %vm7045_vm2, %v3111_v56  ;;  %vm7058_vm12 = vmmov %vm7050_vm0 }
 0x76c   : > { %vm7059_vm3 = vmmov %vm7050_vm0 }
 0x76d   : > { %vm7060_vm2 = vmmov %vm7050_vm0 }
 0x835   : > { %v3171_v55 = vpop.f32.mrb[8].mxu1 }
 0x836   : > { %v6367_v27 = vadd.f32 %v3171_v55, %v3121_v60  ;;  %v3173_v37 = vpop.f32.mrb[9].mxu1 }
 0x837   : > { %v6369_v22 = vadd.f32 %v3173_v37, %v3121_v60  ;;  %v3175_v28 = vpop.f32.mrb[10].mxu1  ;;  %v7051_v37 = vld [vmem:[#allocation8_spill] sm:$0xff] }
 0x838   : > { %v3221_v24 = vand.u32 2147483647, %v6367_v27  ;;  %v3176_v11 = vpop.f32.mrb[11].mxu1  ;;  %v3219_v36 = vmax.f32 %v6367_v27, 0.0  ;;  %v3362_v28 = vsel %vm7052_vm1, %v7051_v37, -inf  ;;  %vm3400_vm1 = vcmp.eq.s32.totalorder %v4074_v18, 5 }
 0x839   : > { %v3222_v42 = vand.u32 2147483647, %v6369_v22  ;;  %v3220_v20 = vmax.f32 %v6369_v22, 0.0 }
 0x83a   : > { %v3223_v32 = vsub.f32 0.0, %v3221_v24 }
 0x83b   : > { %v3224_v14 = vsub.f32 0.0, %v3222_v42 }
 0x83c   : > { %v3225_v39 = vmul.f32 1.442695, %v3223_v32 }
 0x83d   : > { %v3227_v23 = vmul.f32 1.442695, %v3224_v14 }
 0x83e   : > { %v3212_v5 = vpop.f32.mrb[12].mxu0  ;;  %3883 = vpow2.f32 %v3225_v39 }
 0x83f   : > { %v6373_v13 = vadd.f32 %v3212_v5, %v3121_v60  ;;  %v3214_v59 = vpop.f32.mrb[13].mxu0  ;;  %3885 = vpow2.f32 %v3227_v23 }
 0x840   : > { %v6375_v6 = vadd.f32 %v3214_v59, %v3121_v60  ;;  %v3216_v40 = vpop.f32.mrb[14].mxu0  ;;  %v7049_v60 = vld [vmem:[#allocation7_spill] sm:$0xff] }
 0x841   : > { %v3251_v58 = vand.u32 2147483647, %v6373_v13  ;;  %v3217_v35 = vpop.f32.mrb[15].mxu0  ;;  %v3361_v55 = vsel %vm7050_vm0, %v7049_v60, -inf  ;;  %v3249_v42 = vmax.f32 %v6373_v13, 0.0  ;;  %vm3397_vm0 = vcmp.eq.s32.totalorder %v4074_v18, 4 }
 0x842   : > { %v3252_v30 = vand.u32 2147483647, %v6375_v6  ;;  %v3250_v5 = vmax.f32 %v6375_v6, 0.0  ;;  %v3363_v35 = vmax.f32 %v3361_v55, %v3362_v28 }
 0x843   : > { %v3253_v43 = vsub.f32 0.0, %v3251_v58 }
 0x844   : > { %v3254_v45 = vsub.f32 0.0, %v3252_v30 }
 0x845   : > { %v3255_v2 = vmul.f32 1.442695, %v3253_v43 }
 0x846   : > { %v3257_v57 = vmul.f32 1.442695, %v3254_v45 }
 0x847   : > { %3887 = vpow2.f32 %v3255_v2 }
 0x848   : > { %3889 = vpow2.f32 %v3257_v57  ;;  %v3884_v48 = vpop.eup %3883 }
 0x849   : > { %v3886_v31 = vpop.eup %3885  ;;  %v3229_v7 = vadd.f32 1.0, %v3884_v48  ;;  %v3232_v0 = vmul.f32 -0.5, %v3884_v48  ;;  %v3235_v4 = vand.u32 2147483647, %v3884_v48 }
 0x84a   : > { %v3238_v26 = vadd.f32 1.0, %v3886_v31  ;;  %v3241_v51 = vmul.f32 -0.5, %v3886_v31  ;;  %v3244_v25 = vand.u32 2147483647, %v3886_v31 }
 0x84b   : > { %3891 = vlog2.f32 %v3229_v7  ;;  %v3233_v9 = vadd.f32 1.0, %v3232_v0  ;;  %vm3236_vm14 = vcmp.lt.f32.partialorder %v3235_v4, 0.0004427343  ;;  %v3350_v7 = vsel %vm7058_vm12, %v7051_v37, inf }
 0x84c   : > { %3893 = vlog2.f32 %v3238_v26  ;;  %v3242_v21 = vadd.f32 1.0, %v3241_v51  ;;  %vm3245_vm5 = vcmp.lt.f32.partialorder %v3244_v25, 0.0004427343  ;;  %v3301_v51 = vpop.xlane.xlu0 %3300 }
 0x84d   : > { %v3234_v53 = vmul.f32 %v3884_v48, %v3233_v9 }
 0x84e   : > { %v3243_v15 = vmul.f32 %v3886_v31, %v3242_v21  ;;  %v3349_v31 = vsel %vm7057_vm8, %v7049_v60, inf }
 0x84f   : > { %v3351_v26 = vmin.f32 %v3349_v31, %v3350_v7 }
 0x851   : > { %v3888_v33 = vpop.eup %3887 }
 0x852   : > { %v3890_v38 = vpop.eup %3889  ;;  %v3259_v8 = vadd.f32 1.0, %v3888_v33  ;;  %v3262_v3 = vmul.f32 -0.5, %v3888_v33  ;;  %v3265_v41 = vand.u32 2147483647, %v3888_v33 }
 0x853   : > { %v3268_v1 = vadd.f32 1.0, %v3890_v38  ;;  %v3271_v34 = vmul.f32 -0.5, %v3890_v38  ;;  %v3274_v19 = vand.u32 2147483647, %v3890_v38 }
 0x854   : > { %3895 = vlog2.f32 %v3259_v8  ;;  %v3263_v10 = vadd.f32 1.0, %v3262_v3  ;;  %vm3266_vm7 = vcmp.lt.f32.partialorder %v3265_v41, 0.0004427343  ;;  %v3302_v8 = vrot.slane %v3301_v51, 4 }
 0x855   : > { %3897 = vlog2.f32 %v3268_v1  ;;  %v3892_v63 = vpop.eup %3891  ;;  %v3272_v61 = vadd.f32 1.0, %v3271_v34  ;;  %vm3275_vm4 = vcmp.lt.f32.partialorder %v3274_v19, 0.0004427343 }
 0x856   : > { %v3894_v52 = vpop.eup %3893  ;;  %v3231_v46 = vmul.f32 0.6931472, %v3892_v63  ;;  %v3303_v21 = vadd.f32 %v3302_v8, %v3301_v51 }
 0x857   : > { %v3240_v16 = vmul.f32 0.6931472, %v3894_v52  ;;  %v3273_v39 = vmul.f32 %v3890_v38, %v3272_v61 }
 0x858   : > { %v3237_v44 = vsel %vm3236_vm14, %v3234_v53, %v3231_v46  ;;  %v3304_v3 = vrot.slane %v3303_v21, 2  ;;  %vm3385_vm14 = vcmp.eq.s32.totalorder %v4074_v18, 0 }
 0x859   : > { %v3246_v49 = vsel %vm3245_vm5, %v3243_v15, %v3240_v16  ;;  %v3247_v12 = vadd.f32 %v3237_v44, %v3219_v36  ;;  %vm3388_vm5 = vcmp.eq.s32.totalorder %v4074_v18, 1 }
 0x85a   : > { %v3248_v56 = vadd.f32 %v3246_v49, %v3220_v20 }
 0x85b   : > { %v3309_v54 = vsel %vm7047_vm11, %v3247_v12, 0.0  ;;  %v3281_v17 = vsub.f32 %v3247_v12, %v6367_v27  ;;  %v3264_v27 = vmul.f32 %v3888_v33, %v3263_v10  ;;  %v3341_v33 = vpop.xlane.xlu0 %3340  ;;  %v3305_v10 = vadd.f32 %v3304_v3, %v3303_v21 }
 0x85c   : > { %v3310_v62 = vsel %vm7048_vm13, %v3248_v56, 0.0  ;;  %v3282_v47 = vsub.f32 %v3248_v56, %v6369_v22  ;;  %v3342_v4 = vrot.slane %v3341_v33, 4  ;;  %vm3391_vm11 = vcmp.eq.s32.totalorder %v4074_v18, 2 }
 0x85d   : > { %v3311_v29 = vadd.f32 %v3310_v62, %v3309_v54  ;;  %v3283_v24 = vsel %vm7053_vm10, %v3281_v17, 0.0  ;;  %vm3394_vm13 = vcmp.eq.s32.totalorder %v4074_v18, 3  ;;  %vm3403_vm10 = vcmp.eq.s32.totalorder %v4074_v18, 6 }
 0x85e   : > { %v3896_v50 = vpop.eup %3895  ;;  %v3284_v14 = vsel %vm7054_vm6, %v3282_v47, 0.0  ;;  %v3343_v46 = vadd.f32 %v3342_v4, %v3341_v33  ;;  %vm3406_vm6 = vcmp.eq.s32.totalorder %v4074_v18, 7 }
 0x85f   : > { %v3898_v11 = vpop.eup %3897  ;;  %v3261_v32 = vmul.f32 0.6931472, %v3896_v50  ;;  %3312 = vadd.xlane.f32.xlu0 %v3311_v29  ;;  %v3285_v23 = vadd.f32 %v3284_v14, %v3283_v24 }
 0x860   : > { %v3270_v22 = vmul.f32 0.6931472, %v3898_v11  ;;  %v3344_v49 = vrot.slane %v3343_v46, 2 }
 0x861   : > { %v3267_v59 = vsel %vm3266_vm7, %v3264_v27, %v3261_v32 }
 0x862   : > { %v3276_v40 = vsel %vm3275_vm4, %v3273_v39, %v3270_v22  ;;  %v3277_v58 = vadd.f32 %v3267_v59, %v3249_v42  ;;  %v3345_v50 = vadd.f32 %v3344_v49, %v3343_v46 }
 0x863   : > { %v3278_v30 = vadd.f32 %v3276_v40, %v3250_v5  ;;  %3364 = vmax.xlane.f32.xlu0 %v3363_v35 }
 0x864   : > { %v3321_v43 = vsub.f32 %v3277_v58, %v6373_v13  ;;  %v3373_v13 = vsel %vm7059_vm3, %v7049_v60, 0.0  ;;  %v3306_v60 = vrot.slane %v3305_v10, 1  ;;  %v3346_v14 = vrot.slane %v3345_v50, 1 }
 0x865   : > { %v3322_v45 = vsub.f32 %v3278_v30, %v6375_v6  ;;  %v3374_v6 = vsel %vm7060_vm2, %v7051_v37, 0.0 }
 0x866   : > { %v3323_v2 = vsel %vm7055_vm9, %v3321_v43, 0.0  ;;  %v3375_v0 = vadd.f32 %v3374_v6, %v3373_v13  ;;  %v3307_v39 = vadd.f32 %v3306_v60, %v3305_v10  ;;  %v3347_v30 = vadd.f32 %v3346_v14, %v3345_v50 }
 0x867   : > { %v3324_v57 = vsel %vm7056_vm15, %v3322_v45, 0.0 }
 0x868   : > { %v3325_v48 = vadd.f32 %v3324_v57, %v3323_v2 }
 0x86a   : > { %3326 = vadd.xlane.f32.xlu1 %v3325_v48 }
 0x86e   : > { %3286 = vadd.xlane.f32.xlu1 %v3285_v23 }
 0x872   : > { %3352 = vmin.xlane.f32.xlu1 %v3351_v26 }
 0x876   : > { %3376 = vadd.xlane.f32.xlu1 %v3375_v0 }
 0x8ec   : > { %v3313_v38 = vpop.xlane.xlu0 %3312 }
 0x8ed   : > { %v3314_v9 = vrot.slane %v3313_v38, 4 }
 0x8ef   : > { %v3315_v25 = vadd.f32 %v3314_v9, %v3313_v38 }
 0x8f0   : > { %v3365_v1 = vpop.xlane.xlu0 %3364 }
 0x8f1   : > { %v3366_v36 = vrot.slane %v3365_v1, 4  ;;  %v3316_v16 = vrot.slane %v3315_v25, 2 }
 0x8f3   : > { %v3367_v34 = vmax.f32 %v3365_v1, %v3366_v36  ;;  %v3317_v54 = vadd.f32 %v3316_v16, %v3315_v25 }
 0x8f5   : > { %v3368_v41 = vrot.slane %v3367_v34, 2  ;;  %v3318_v55 = vrot.slane %v3317_v54, 1 }
 0x8f7   : > { %v3327_v63 = vpop.xlane.xlu1 %3326  ;;  %v3369_v37 = vmax.f32 %v3367_v34, %v3368_v41  ;;  %v3319_v5 = vadd.f32 %v3318_v55, %v3317_v54 }
 0x8f8   : > { %v3328_v52 = vrot.slane %v3327_v63, 4 }
 0x8f9   : > { %v3370_v40 = vrot.slane %v3369_v37, 1 }
 0x8fa   : > { %v3329_v53 = vadd.f32 %v3328_v52, %v3327_v63 }
 0x8fb   : > { %v3287_v15 = vpop.xlane.xlu1 %3286  ;;  %v3371_v45 = vmax.f32 %v3369_v37, %v3370_v40 }
 0x8fc   : > { %v3288_v20 = vrot.slane %v3287_v15, 4  ;;  %v3330_v44 = vrot.slane %v3329_v53, 2 }
 0x8fe   : > { %v3289_v12 = vadd.f32 %v3288_v20, %v3287_v15  ;;  %v3331_v62 = vadd.f32 %v3330_v44, %v3329_v53 }
 0x8ff   : > { %v3353_v56 = vpop.xlane.xlu1 %3352 }
 0x900   : > { %v3290_v61 = vrot.slane %v3289_v12, 2  ;;  %v3354_v17 = vrot.slane %v3353_v56, 4  ;;  %v3332_v42 = vrot.slane %v3331_v62, 1 }
 0x902   : > { %v3355_v19 = vmin.f32 %v3353_v56, %v3354_v17  ;;  %v3291_v47 = vadd.f32 %v3290_v61, %v3289_v12  ;;  %v3333_v58 = vadd.f32 %v3332_v42, %v3331_v62 }
 0x903   : > { %v3377_v29 = vpop.xlane.xlu1 %3376 }
 0x904   : > { %v3356_v28 = vrot.slane %v3355_v19, 2  ;;  %v3378_v24 = vrot.slane %v3377_v29, 4  ;;  %v3292_v11 = vrot.slane %v3291_v47, 1 }
 0x906   : > { %v3379_v32 = vadd.f32 %v3378_v24, %v3377_v29  ;;  %v3293_v27 = vadd.f32 %v3292_v11, %v3291_v47  ;;  %v3357_v22 = vmin.f32 %v3355_v19, %v3356_v28 }
 0x908   : > { %v3380_v23 = vrot.slane %v3379_v32, 2  ;;  %3566 = vpush %v3293_v27  ;;  %v3358_v59 = vrot.slane %v3357_v22, 1 }
 0x909   : > { %3568 = vpush %v3307_v39 }
 0x90a   : > { %v3381_v35 = vadd.f32 %v3380_v23, %v3379_v32  ;;  %3570 = vpush %v3319_v5  ;;  %v3359_v43 = vmin.f32 %v3357_v22, %v3358_v59 }
 0x90b   : > { %3572 = vpush %v3333_v58 }
 0x90c   : > { %3574 = vpush %v3347_v30  ;;  %v3382_v2 = vrot.slane %v3381_v35, 1 }
 0x90d   : > { %3576 = vpush %v3359_v43 }
 0x90e   : > { %3578 = vpush %v3371_v45  ;;  %v3383_v57 = vadd.f32 %v3382_v2, %v3381_v35 }
 0x910   : > { %3580 = vpush %v3383_v57 }
 0x939   : > { %s3567_s27 = spop %3566 }
 0x93a   : > { %v3386_v48 = vstv %s3567_s27  ;;  %s3569_s28 = spop %3568 }
 0x93b   : > { %v3387_v31 = vsel %vm3385_vm14, %v3386_v48, 0.0  ;;  %v3389_v7 = vstv %s3569_s28  ;;  %s3571_s29 = spop %3570 }
 0x93c   : > { %v3390_v26 = vsel %vm3388_vm5, %v3389_v7, %v3387_v31  ;;  %v3392_v13 = vstv %s3571_s29  ;;  %s3573_s30 = spop %3572 }
 0x93d   : > { %v3393_v6 = vsel %vm3391_vm11, %v3392_v13, %v3390_v26  ;;  %v3395_v0 = vstv %s3573_s30  ;;  %s3575_s15 = spop %3574 }
 0x93e   : > { %v3396_v51 = vsel %vm3394_vm13, %v3395_v0, %v3393_v6  ;;  %v3398_v33 = vstv %s3575_s15  ;;  %s3577_s16 = spop %3576 }
 0x93f   : > { %v3399_v38 = vsel %vm3397_vm0, %v3398_v33, %v3396_v51  ;;  %v3401_v8 = vstv %s3577_s16  ;;  %s3579_s21 = spop %3578 }
 0x940   : > { %v3402_v9 = vsel %vm3400_vm1, %v3401_v8, %v3399_v38  ;;  %v3404_v1 = vstv %s3579_s21 }
 0x941   : > { %v3405_v4 = vsel %vm3403_vm10, %v3404_v1, %v3402_v9  ;;  %s3581_s8 = spop %3580 }
 0x942   : > { %v3407_v21 = vstv %s3581_s8 }
 0x943   : > { %v3408_v25 = vsel %vm3406_vm6, %v3407_v21, %v3405_v4 }
 0x944   : > { %3409 = vst [vmem:[%s500_s24] sm:$0x1] %v3408_v25 }
 0x945 PF: > { %s29_s17 = sadd.s32 1, %s3905_s17  }
 0x946   : > { %p26_p5 = scmp.ge.s32.totalorder %s29_s17, 4  }
 0x948   :  { %28 = sbr.rel (!%p26_p5) target bundleno = 3 (0x3), region = 117 }

</bundles_post_ra>
